<compile_context>
chip_gen: v6e
topology: v6e:2x2x1
jax: 0.10.0
libtpu: 0.0.40
codegen_flags: <defaults>
</compile_context>

<pallas_src>
import jax
import jax.numpy as jnp
from jax.experimental import pallas as pl
from jax.experimental.pallas import tpu as pltpu

IN_DIM = 512
HID = 512
OUT_DIM = 1
BN_EPS = 1e-5


def _mlp_kernel(x_ref, w1_ref, b1_ref, w2_ref, b2_ref, w3_ref, b3_ref, o_ref):
    # Cast the f32 input tile to the weight dtype in-kernel (cheap VPU work).
    x = x_ref[...].astype(w1_ref.dtype)                               # (tb, 512)

    # Linear(512, 512) [+ folded BatchNorm1d] + ReLU     (Dropout = identity, eval)
    h = jnp.dot(x, w1_ref[...], preferred_element_type=jnp.float32) + b1_ref[...]
    h = jnp.maximum(h, 0.0)

    # Linear(512, 512) [+ folded BatchNorm1d] + ReLU     (Dropout = identity, eval)
    h = jnp.dot(h.astype(w2_ref.dtype), w2_ref[...],
                preferred_element_type=jnp.float32) + b2_ref[...]
    h = jnp.maximum(h, 0.0)

    # Linear(512, 1): contract the row-vector w3 (1, 512) against h (tb, 512) on the
    # last dims (q @ k.T pattern) -> lane-dense (1, tb) logits, no transpose needed.
    logits = jax.lax.dot_general(
        w3_ref[...], h.astype(w3_ref.dtype),
        dimension_numbers=(((1,), (1,)), ((), ())),
        preferred_element_type=jnp.float32) + b3_ref[...]             # (1, tb)

    # Exact sigmoid (the (1, tb) vector makes the divide cost negligible).
    o_ref[...] = 1.0 / (1.0 + jnp.exp(-logits))


def fold_params(params, dtype=jnp.bfloat16):
    """Fold eval-mode BatchNorm into the Linear weights/biases; cast weights to `dtype`.

    (x @ W + b) * s + t  ==  x @ (W * s) + (b * s + t)
    bf16 (default) is MXU-native on v5e/v6e/v7x; accumulation stays f32 in-kernel.
    """
    (w1, b1, s1, t1, w2, b2, s2, t2, w3, b3) = params
    w1f = (w1 * s1).astype(dtype)
    b1f = (b1 * s1 + t1).astype(jnp.float32)
    w2f = (w2 * s2).astype(dtype)
    b2f = (b2 * s2 + t2).astype(jnp.float32)
    w3f = w3.reshape(1, HID).astype(dtype)          # stored as a row for the contraction
    b3f = b3.reshape(1, 1).astype(jnp.float32)
    return (w1f, b1f, w2f, b2f, w3f, b3f)


def domain_classifier_forward(x, folded_params, *, tb=512):
    """x: (B, 512) float32. Returns (B, 1) float32 probabilities.

    Tiling guidance:
      * tb should be a multiple of 256 on v6e/v7x (2x256x256 MXU rows) and at least
        512 to amortize the ~0.35us/grid-step overhead; 128-multiples suffice on v5e.
      * On v7x keep B/tb >= 2 (ideally even) so the parallel grid axis is sharded
        across both TensorCores.
    """
    B = x.shape[0]
    w1f, b1f, w2f, b2f, w3f, b3f = folded_params

    tb = min(tb, B)
    assert B % tb == 0, "batch must be a multiple of the batch tile"
    # lane-dense output block needs its minor dim to be 128-aligned (or the full dim)
    assert tb == B or tb % 128 == 0, "batch tile must be a multiple of 128"
    # TODO(synk): batches with B < 128 produce a sub-128-lane (masked) output store;
    # pad B up to 128 in the caller if that case matters for throughput.

    grid = (B // tb,)
    full = lambda shape: pl.BlockSpec(shape, lambda i: (0, 0))  # constant index_map:
    # Pallas only re-issues a block DMA when its block index changes, so these
    # parameter tiles are fetched once and stay VMEM-resident across the grid.

    flops = 2 * B * (IN_DIM * HID + HID * HID + HID * OUT_DIM)
    bytes_accessed = int(
        x.size * x.dtype.itemsize
        + sum(p.size * p.dtype.itemsize for p in folded_params)
        + B * OUT_DIM * 4)

    out = pl.pallas_call(
        _mlp_kernel,
        out_shape=jax.ShapeDtypeStruct((1, B), jnp.float32),
        grid_spec=pltpu.PrefetchScalarGridSpec(
            num_scalar_prefetch=0,
            grid=grid,
            in_specs=[
                pl.BlockSpec((tb, IN_DIM), lambda i: (i, 0)),   # x tile (streamed, f32)
                full((IN_DIM, HID)), full((1, HID)),            # W1', b1' (resident)
                full((HID, HID)),    full((1, HID)),            # W2', b2'
                full((1, HID)),      full((1, 1)),              # w3 row, b3
            ],
            out_specs=pl.BlockSpec((1, tb), lambda i: (0, i)),  # lane-dense output row
        ),
        compiler_params=pltpu.CompilerParams(
            dimension_semantics=("parallel",),
            vmem_limit_bytes=32 * 1024 * 1024),
        cost_estimate=pl.CostEstimate(
            flops=int(flops), transcendentals=int(B), bytes_accessed=bytes_accessed),
    )(x, w1f, b1f, w2f, b2f, w3f, b3f)

    return out.reshape(B, OUT_DIM)


def init_params(key):
    """Deterministic parameter init mirroring the PyTorch module's shapes.

    nn.Linear(in, out): weight (out, in), bias (out,) -> stored transposed (in, out).
    nn.BatchNorm1d(C): gamma/beta/running_mean/running_var (C,), expressed here as
    scale = gamma / sqrt(running_var + eps), shift = beta - running_mean * scale.
    """
    keys = jax.random.split(key, 14)

    def linear(kw, kb, fan_in, fan_out):
        bound = 1.0 / jnp.sqrt(fan_in)
        w = jax.random.uniform(kw, (fan_in, fan_out), jnp.float32, -bound, bound)
        b = jax.random.uniform(kb, (1, fan_out), jnp.float32, -bound, bound)
        return w, b

    def bn_fold(kg, kb, km, kv, c):
        gamma = 1.0 + 0.1 * jax.random.normal(kg, (1, c), jnp.float32)
        beta = 0.1 * jax.random.normal(kb, (1, c), jnp.float32)
        running_mean = 0.1 * jax.random.normal(km, (1, c), jnp.float32)
        running_var = 1.0 + 0.1 * jax.random.uniform(kv, (1, c), jnp.float32)
        scale = gamma * jax.lax.rsqrt(running_var + BN_EPS)
        shift = beta - running_mean * scale
        return scale, shift

    w1, b1 = linear(keys[0], keys[1], IN_DIM, HID)
    s1, t1 = bn_fold(keys[2], keys[3], keys[4], keys[5], HID)
    w2, b2 = linear(keys[6], keys[7], HID, HID)
    s2, t2 = bn_fold(keys[8], keys[9], keys[10], keys[11], HID)
    w3, b3 = linear(keys[12], keys[13], HID, OUT_DIM)

    return (w1, b1, s1, t1, w2, b2, s2, t2, w3, b3)


def reference_forward(x, params):
    """Plain-JAX reference with identical semantics (eval-mode PyTorch forward)."""
    (w1, b1, s1, t1, w2, b2, s2, t2, w3, b3) = params
    h = x @ w1 + b1
    h = jnp.maximum(h * s1 + t1, 0.0)
    h = h @ w2 + b2
    h = jnp.maximum(h * s2 + t2, 0.0)
    return jax.nn.sigmoid(h @ w3 + b3)


if __name__ == "__main__":
    key = jax.random.PRNGKey(0)
    k_x, k_p = jax.random.split(key)

    B = 512                      # keeps the demo small; grid=2 at tb=256 below
    x = jax.random.normal(k_x, (B, IN_DIM), jnp.float32)
    params = init_params(k_p)
    ref = reference_forward(x, params)

    # f32 weights path (tb=256 -> 2 grid steps). Tolerance covers TPU default matmul
    # precision differences between the kernel and the plain-JAX reference.
    out_f32 = domain_classifier_forward(x, fold_params(params, jnp.float32), tb=256)
    out_f32 = jax.block_until_ready(out_f32)
    assert out_f32.shape == (B, OUT_DIM)
    assert jnp.allclose(out_f32, ref, atol=1e-2, rtol=1e-2), "f32 mismatch vs reference"

    # Default bf16 weights/activations path (MXU-native), f32 accumulation.
    out_bf16 = domain_classifier_forward(x, fold_params(params), tb=512)
    out_bf16 = jax.block_until_ready(out_bf16)
    assert out_bf16.shape == (B, OUT_DIM)
    assert jnp.allclose(out_bf16, ref, atol=5e-2, rtol=5e-2), "bf16 mismatch vs reference"

    # TODO(synk): train-mode Dropout masking / batch-statistics BatchNorm are not
    # modeled (this kernel implements the deterministic eval-mode forward pass).
    print("KERNEL_OK")
</pallas_src>

<mosaic_0001>
module attributes {stable_mosaic.version = 11 : i64} {
  func.func @_mlp_kernel(%arg0: i32, %arg1: memref<256x512xf32, #tpu.memory_space<vmem>>, %arg2: memref<512x512xf32, #tpu.memory_space<vmem>>, %arg3: memref<1x512xf32, #tpu.memory_space<vmem>>, %arg4: memref<512x512xf32, #tpu.memory_space<vmem>>, %arg5: memref<1x512xf32, #tpu.memory_space<vmem>>, %arg6: memref<1x512xf32, #tpu.memory_space<vmem>>, %arg7: memref<1x1xf32, #tpu.memory_space<vmem>>, %arg8: memref<1x256xf32, #tpu.memory_space<vmem>>) attributes {dimension_semantics = [#tpu.dimension_semantics<parallel>], iteration_bounds = array<i64: 2>, scalar_prefetch = 0 : i64, scratch_operands = 0 : i64, tpu.core_type = #tpu.core_type<tc>, window_params = [{transform_indices = @transform_0, window_bounds = array<i64: 256, 512>}, {pipeline_mode = #tpu.pipeline_mode<synchronous>, transform_indices = @transform_1, window_bounds = array<i64: 512, 512>}, {pipeline_mode = #tpu.pipeline_mode<synchronous>, transform_indices = @transform_2, window_bounds = array<i64: 1, 512>}, {pipeline_mode = #tpu.pipeline_mode<synchronous>, transform_indices = @transform_3, window_bounds = array<i64: 512, 512>}, {pipeline_mode = #tpu.pipeline_mode<synchronous>, transform_indices = @transform_4, window_bounds = array<i64: 1, 512>}, {pipeline_mode = #tpu.pipeline_mode<synchronous>, transform_indices = @transform_5, window_bounds = array<i64: 1, 512>}, {pipeline_mode = #tpu.pipeline_mode<synchronous>, transform_indices = @transform_6, window_bounds = array<i64: 1, 1>}, {transform_indices = @transform_7, window_bounds = array<i64: 1, 256>}]} {
    %c0 = arith.constant 0 : index
    %c0_0 = arith.constant 0 : index
    %0 = vector.load %arg1[%c0, %c0_0] : memref<256x512xf32, #tpu.memory_space<vmem>>, vector<256x512xf32>
    %c0_1 = arith.constant 0 : index
    %c0_2 = arith.constant 0 : index
    %1 = vector.load %arg2[%c0_1, %c0_2] : memref<512x512xf32, #tpu.memory_space<vmem>>, vector<512x512xf32>
    %cst = arith.constant dense<0.000000e+00> : vector<256x512xf32>
    %2 = tpu.matmul %0, %1, %cst {dimension_numbers = #tpu.dot_dimension_numbers<[1], [0], [0], [1], [0, 0, 1, 1], [], []>} : vector<256x512xf32>, vector<512x512xf32>, vector<256x512xf32> -> vector<256x512xf32>
    %c0_3 = arith.constant 0 : index
    %c0_4 = arith.constant 0 : index
    %3 = vector.load %arg3[%c0_3, %c0_4] : memref<1x512xf32, #tpu.memory_space<vmem>>, vector<1x512xf32>
    %4 = vector.broadcast %3 : vector<1x512xf32> to vector<256x512xf32>
    %5 = arith.addf %2, %4 : vector<256x512xf32>
    %cst_5 = arith.constant 0.000000e+00 : f32
    %6 = vector.broadcast %cst_5 : f32 to vector<256x512xf32>
    %7 = arith.maximumf %5, %6 : vector<256x512xf32>
    %c0_6 = arith.constant 0 : index
    %c0_7 = arith.constant 0 : index
    %8 = vector.load %arg4[%c0_6, %c0_7] : memref<512x512xf32, #tpu.memory_space<vmem>>, vector<512x512xf32>
    %cst_8 = arith.constant dense<0.000000e+00> : vector<256x512xf32>
    %9 = tpu.matmul %7, %8, %cst_8 {dimension_numbers = #tpu.dot_dimension_numbers<[1], [0], [0], [1], [0, 0, 1, 1], [], []>} : vector<256x512xf32>, vector<512x512xf32>, vector<256x512xf32> -> vector<256x512xf32>
    %c0_9 = arith.constant 0 : index
    %c0_10 = arith.constant 0 : index
    %10 = vector.load %arg5[%c0_9, %c0_10] : memref<1x512xf32, #tpu.memory_space<vmem>>, vector<1x512xf32>
    %11 = vector.broadcast %10 : vector<1x512xf32> to vector<256x512xf32>
    %12 = arith.addf %9, %11 : vector<256x512xf32>
    %cst_11 = arith.constant 0.000000e+00 : f32
    %13 = vector.broadcast %cst_11 : f32 to vector<256x512xf32>
    %14 = arith.maximumf %12, %13 : vector<256x512xf32>
    %c0_12 = arith.constant 0 : index
    %c0_13 = arith.constant 0 : index
    %15 = vector.load %arg6[%c0_12, %c0_13] : memref<1x512xf32, #tpu.memory_space<vmem>>, vector<1x512xf32>
    %cst_14 = arith.constant dense<0.000000e+00> : vector<1x256xf32>
    %16 = tpu.matmul %15, %14, %cst_14 {dimension_numbers = #tpu.dot_dimension_numbers<[1], [1], [0], [0], [0, 0, 1, 0], [], []>} : vector<1x512xf32>, vector<256x512xf32>, vector<1x256xf32> -> vector<1x256xf32>
    %c0_15 = arith.constant 0 : index
    %c0_16 = arith.constant 0 : index
    %17 = vector.load %arg7[%c0_15, %c0_16] : memref<1x1xf32, #tpu.memory_space<vmem>>, vector<1x1xf32>
    %18 = vector.broadcast %17 : vector<1x1xf32> to vector<1x256xf32>
    %19 = arith.addf %16, %18 : vector<1x256xf32>
    %cst_17 = arith.constant 0.000000e+00 : f32
    %20 = vector.broadcast %cst_17 : f32 to vector<1x256xf32>
    %21 = arith.subf %20, %19 : vector<1x256xf32>
    %22 = math.exp %21 : vector<1x256xf32>
    %cst_18 = arith.constant 1.000000e+00 : f32
    %23 = vector.broadcast %cst_18 : f32 to vector<1x256xf32>
    %24 = arith.addf %23, %22 : vector<1x256xf32>
    %cst_19 = arith.constant 1.000000e+00 : f32
    %25 = vector.broadcast %cst_19 : f32 to vector<1x256xf32>
    %26 = arith.divf %25, %24 : vector<1x256xf32>
    %c0_20 = arith.constant 0 : index
    %c0_21 = arith.constant 0 : index
    %27 = vector.load %arg8[%c0_20, %c0_21] : memref<1x256xf32, #tpu.memory_space<vmem>>, vector<1x256xf32>
    tpu.vector_store %arg8[%c0_20, %c0_21], %26 {strides = array<i32>} : memref<1x256xf32, #tpu.memory_space<vmem>>, vector<1x256xf32>,
    return
  }
  func.func @transform_0(%arg0: i32) -> (i32, i32) {
    %c0_i32 = arith.constant 0 : i32
    %c0_i32_0 = arith.constant 0 : i32
    return %arg0, %c0_i32 : i32, i32
  }
  func.func @transform_1(%arg0: i32) -> (i32, i32) {
    %c0_i32 = arith.constant 0 : i32
    %c0_i32_0 = arith.constant 0 : i32
    %c0_i32_1 = arith.constant 0 : i32
    return %c0_i32, %c0_i32_0 : i32, i32
  }
  func.func @transform_2(%arg0: i32) -> (i32, i32) {
    %c0_i32 = arith.constant 0 : i32
    %c0_i32_0 = arith.constant 0 : i32
    %c0_i32_1 = arith.constant 0 : i32
    return %c0_i32, %c0_i32_0 : i32, i32
  }
  func.func @transform_3(%arg0: i32) -> (i32, i32) {
    %c0_i32 = arith.constant 0 : i32
    %c0_i32_0 = arith.constant 0 : i32
    %c0_i32_1 = arith.constant 0 : i32
    return %c0_i32, %c0_i32_0 : i32, i32
  }
  func.func @transform_4(%arg0: i32) -> (i32, i32) {
    %c0_i32 = arith.constant 0 : i32
    %c0_i32_0 = arith.constant 0 : i32
    %c0_i32_1 = arith.constant 0 : i32
    return %c0_i32, %c0_i32_0 : i32, i32
  }
  func.func @transform_5(%arg0: i32) -> (i32, i32) {
    %c0_i32 = arith.constant 0 : i32
    %c0_i32_0 = arith.constant 0 : i32
    %c0_i32_1 = arith.constant 0 : i32
    return %c0_i32, %c0_i32_0 : i32, i32
  }
  func.func @transform_6(%arg0: i32) -> (i32, i32) {
    %c0_i32 = arith.constant 0 : i32
    %c0_i32_0 = arith.constant 0 : i32
    %c0_i32_1 = arith.constant 0 : i32
    return %c0_i32, %c0_i32_0 : i32, i32
  }
  func.func @transform_7(%arg0: i32) -> (i32, i32) {
    %c0_i32 = arith.constant 0 : i32
    %c0_i32_0 = arith.constant 0 : i32
    return %c0_i32, %arg0 : i32, i32
  }
}

</mosaic_0001>

<bundles_post_ra>
// kernel: tpu_custom_call.1
= control target key start
LH: loop header
LB: loop body
LE: loop exit
PB: predicated region body
PF: predicated region fallthrough
CT: control target
= control target key end

     0   :  { %s7104_s0 = inlined_call_operand.hbm [shape: f32[512,512], index: 0, kind: input, shape index: {}]   ;;  %s7105_s1 = inlined_call_operand.hbm [shape: f32[512,512], index: 1, kind: input, shape index: {}]   ;;  %s7106_s2 = inlined_call_operand.vmem [shape: f32[1,512], index: 2, kind: input, shape index: {}]   ;;  %s7107_s3 = inlined_call_operand.hbm [shape: f32[512,512], index: 3, kind: input, shape index: {}]   ;;  %s7108_s4 = inlined_call_operand.vmem [shape: f32[1,512], index: 4, kind: input, shape index: {}]   ;;  %s7109_s5 = inlined_call_operand.hbm [shape: f32[1,512], index: 5, kind: input, shape index: {}]   ;;  %s7110_s6 = inlined_call_operand.<no memory space> [shape: f32[1,1], index: 6, kind: input, shape index: {}]   ;;  %s7111_s7 = inlined_call_operand.hbm [shape: f32[1,512], index: 7, kind: output, shape index: {}]  }
   0x1   :  { %v12_v0 = vstv %s7110_s6 }
   0x2   :  { %13 = vst [vmem:[#allocation2] sm:$0x1] %v12_v0 }
   0x3   :  { %14 = vsyncpa [#allocation4], 0 }
   0x4   :  { %16 = vsyncpa [#allocation4 + $0x1], 0 }
   0x5   :  { %17 = vsyncpa [#allocation7], 0 }
   0x6   :  { %18 = vsyncpa [#allocation10], 0 }
   0x7   :  { %19 = vsyncpa [#allocation5], 0 }
   0x8   :  { %21 = vsyncpa [#allocation5 + $0x1], 0  ;;  %s4015_s26 = smov 0   ;;  %s4017_s27 = smov 0  }
   0x9   :  { %s4019_s28 = smov 0   ;;  %s4021_s29 = smov 0  }
   0xa LB: > { %s4036_s6 = sadd.s32 4294967295, %s3961_s29   ;;  %s3663_s30 = sadd.s32 4294967294, %s3961_s29   ;;  %s3961_s29 = sphi %s4021_s29, %s8041_s29   ;;  %s3957_s28 = sphi %s4019_s28, %s8040_s28   ;;  %s3953_s27 = sphi %s4017_s27, %s8039_s27   ;;  %s3949_s26 = sphi %s4015_s26, %s8038_s26  }
   0xb   : > { %p47_p0 = scmp.ne.s32.totalorder %s3953_s27, %s3949_s26  ;;  %p7112_p1 = scmp.eq.s32.totalorder %s4036_s6, 0 }
   0xc   : > { %p197_p2 = scmp.eq.s32.totalorder %s4036_s6, 1  ;;  %p203_p3 = scmp.eq.s32.totalorder %s3663_s30, 1 }
   0xd   : > { %p4045_p4 = por %p7112_p1, %p47_p0  ;;  %p3664_p5 = scmp.ge.s32.totalorder %s3961_s29, 1 }
   0xe   : > { %p4050_p6 = por %p203_p3, %p47_p0  ;;  %p210_p7 = scmp.lt.s32.totalorder %s3961_s29, 3 }
   0xf   : > { %s7359_s8 = scalar_select %p4045_p4, 1, 0 }
  0x10   : > { %s7360_s9 = scalar_select %p4050_p6, 1, 0 }
  0x11   : > { %p4055_p8 = pnand %p3664_p5, %p210_p7  ;;  %s3963_s11 = smov [#allocation6]  }
  0x12   : > { %s222_s12 = sshll.u32 %s3963_s11, 4  ;;  %s3964_s14 = smov [#allocation8]   ;;  %s223_s12 = int_to_ptr.vmem [resolvable:$true] %s222_s12 }
  0x13   : > { %s7361_s10 = scalar_select %p4055_p8, 1, 0 }
  0x14   : > { %p3703_p9 = pneg %p4055_p8  ;;  %s238_s15 = sshll.u32 %s3964_s14, 4  ;;  %s239_s15 = int_to_ptr.vmem [resolvable:$true] %s238_s15 }
  0x15   : > { %s3965_s16 = smov [#allocation9]   ;;  %s3794_s18 = scalar_lea.vmem %s223_s12, 32768 }
  0x16   : > { %p4064_p11 = pnand %p3703_p9, %p7112_p1  ;;  %s255_s17 = sshll.u32 %s3965_s16, 4  ;;  %s256_s17 = int_to_ptr.vmem [resolvable:$true] %s255_s17 }
  0x17   : > { %p3795_p13 = scmp.ne.s32.totalorder %s223_s12, %s3794_s18  ;;  %p3802_p5 = scmp.lt.s32.totalorder %s223_s12, %s223_s12 }
  0x18   : > { %p3785_p12 = pneg %p4064_p11  ;;  %p3803_p7 = scmp.lt.s32.totalorder %s3794_s18, %s3794_s18 }
  0x1a   : > { %p3797_p0 = pnand %p3795_p13, %p3785_p12  ;;  %p3804_p9 = por %p3803_p7, %p3802_p5 }
  0x1c   : > { %p3798_p3 = pneg %p3797_p0 }
  0x1e   : > { %p3805_p10 = pnand %p3804_p9, %p3798_p3 }
  0x20   : > { %3808 = shalt.err (!%p3805_p10)
}
  0x21   : > { %s7113_s19 = smov 512   ;;  %s7114_s20 = smov 32  }
  0x22   : > { %3706 = dma.hbm_to_vmem [thread:$0]  (!%p4064_p11), %s7105_s1, 32768, %s223_s12, [#allocation7], %s7113_s19, %s7113_s19, %s7114_s20  }
  0x23   : > { %s3820_s23 = scalar_lea.vmem %s239_s15, 32768  ;;  %p3828_p3 = scmp.lt.s32.totalorder %s239_s15, %s239_s15 }
  0x24   : > { %p3821_p13 = scmp.ne.s32.totalorder %s239_s15, %s3820_s23  ;;  %p3829_p10 = scmp.lt.s32.totalorder %s3820_s23, %s3820_s23 }
  0x26   : > { %p3823_p0 = pnand %p3821_p13, %p3785_p12  ;;  %p3830_p7 = por %p3829_p10, %p3828_p3 }
  0x28   : > { %p3824_p5 = pneg %p3823_p0 }
  0x2a   : > { %p3831_p9 = pnand %p3830_p7, %p3824_p5 }
  0x2c   : > { %3834 = shalt.err (!%p3831_p9)
}
  0x2d   : > { %3709 = dma.hbm_to_vmem [thread:$0]  (!%p4064_p11), %s7107_s3, 32768, %s239_s15, [#allocation7], %s7113_s19, %s7113_s19, %s7114_s20  }
  0x2e   : > { %s3846_s30 = scalar_lea.vmem %s256_s17, 64  ;;  %p3854_p3 = scmp.lt.s32.totalorder %s256_s17, %s256_s17 }
  0x2f   : > { %p3847_p1 = scmp.ne.s32.totalorder %s256_s17, %s3846_s30  ;;  %p3855_p5 = scmp.lt.s32.totalorder %s3846_s30, %s3846_s30 }
  0x31   : > { %p3849_p13 = pnand %p3847_p1, %p3785_p12  ;;  %p3856_p10 = por %p3855_p5, %p3854_p3 }
  0x33   : > { %p3850_p0 = pneg %p3849_p13 }
  0x35   : > { %p3857_p7 = pnand %p3856_p10, %p3850_p0 }
  0x37   : > { %3860 = shalt.err (!%p3857_p7)
}
  0x38   : > { %3712 = dma.hbm_to_vmem [thread:$0]  (!%p4064_p11), %s7109_s5, 64, %s256_s17, [#allocation10]  }
  0x39   : > { %s4101_s14 = sadd.s32 1, %s3961_s29   ;;  %s34_s13 = sadd.s32 1, %s3957_s28 }
  0x3a   : > { %s31_s15 = ssub.s32 %s3961_s29, %s4101_s14  ;;  %p41_p12 = scmp.ne.s32.totalorder %s3957_s28, %s3953_s27 }
  0x3b   : > { %p32_p1 = scmp.eq.s32.totalorder %s31_s15, 0  ;;  %p42_p9 = scmp.eq.s32.totalorder %s3961_s29, 0 }
  0x3c   : > { %p3724_p13 = scmp.lt.s32.totalorder %s3961_s29, 2  ;;  %p4115_p3 = por %p197_p2, %p41_p12 }
  0x3d   : > { %s4111_s16 = scalar_select %p32_p1, %s3957_s28, %s34_s13  }
  0x3e   : > { %p43_p0 = por %p42_p9, %p41_p12  ;;  %s269_s21 = sand.u32 1, %s3957_s28  }
  0x3f   : > { %s7363_s18 = scalar_select %p4115_p3, 1, 0 }
  0x40   : > { %s3685_s22 = sshll.u32 %s3961_s29, 14  ;;  %s3669_s17 = sshll.u32 %s269_s21, 10 }
  0x41   : > { %s4124_s25 = scalar_lea.hbm %s7104_s0, %s3685_s22  ;;  %s273_s30 = scalar_lea.vmem [#allocation3], %s3669_s17 }
  0x42   : > { %s281_s11 = sshll.u32 %s273_s30, 4  ;;  %p4126_p11 = pnand %p3724_p13, %p43_p0  ;;  %s4130_s11 = int_to_ptr.vmem [resolvable:$true] %s281_s11 }
  0x43   : > { %s4132_s15 = scalar_lea.sflag [#allocation4], %s269_s21  ;;  %s3861_s13 = scalar_lea.hbm %s4124_s25, 16384 }
  0x44   : > { %p3862_p2 = scmp.ne.s32.totalorder %s4124_s25, %s3861_s13  ;;  %p3863_p5 = pneg %p4126_p11 }
  0x45   : > { %s3866_s17 = scalar_lea.hbm %s7104_s0, 32768  ;;  %p3867_p1 = scmp.lt.s32.totalorder %s4124_s25, %s7104_s0 }
  0x46   : > { %p3864_p10 = pnand %p3863_p5, %p3862_p2  ;;  %p3868_p12 = scmp.lt.s32.totalorder %s3866_s17, %s3861_s13 }
  0x48   : > { %p3865_p7 = pneg %p3864_p10  ;;  %p3869_p9 = por %p3868_p12, %p3867_p1 }
  0x4a   : > { %p3870_p13 = pnand %p3869_p9, %p3865_p7 }
  0x4c   : > { %3873 = shalt.err (!%p3870_p13)
}
  0x4d   : > { %s3874_s21 = scalar_lea.vmem %s4130_s11, 16384  ;;  %s3968_s19 = smov [#allocation3]  }
  0x4e   : > { %p3875_p0 = scmp.ne.s32.totalorder %s4130_s11, %s3874_s21  ;;  %s3879_s20 = sshll.u32 %s3968_s19, 4  ;;  %s3880_s20 = int_to_ptr.vmem [resolvable:$false] %s3879_s20 }
  0x4f   : > { %s3881_s22 = scalar_lea.vmem %s3880_s20, 32768  ;;  %p3882_p10 = scmp.lt.s32.totalorder %s4130_s11, %s3880_s20 }
  0x50   : > { %p3877_p6 = pnand %p3875_p0, %p3863_p5  ;;  %p3883_p3 = scmp.lt.s32.totalorder %s3881_s22, %s3874_s21 }
  0x52   : > { %p3878_p2 = pneg %p3877_p6  ;;  %p3884_p4 = por %p3883_p3, %p3882_p10 }
  0x54   : > { %p3885_p8 = pnand %p3884_p4, %p3878_p2 }
  0x56   : > { %3888 = shalt.err (!%p3885_p8)
}
  0x57   : > { %s7365_s13 = smov 32   ;;  %s7366_s23 = smov 512  }
  0x58   : > { %3716 = dma.hbm_to_vmem [thread:$0]  (!%p4126_p11), %s4124_s25, 16384, %s4130_s11, %s4132_s15, %s7366_s23, %s7366_s23, %s7365_s13  }
  0x59   : > { %p7367_p6 = scmp.ne.s32.totalorder %s7361_s10, 0 }
  0x5b   : > { %293 = sbr.rel (%p7367_p6) target bundleno = 1269 (0x4f5), region = 48 }
  0x60   : > { %s4159_s19 = sand.u32 1, %s3953_s27   ;;  %p7368_p4 = scmp.ne.s32.totalorder %s7359_s8, 0 }
  0x61   : > { %s3674_s20 = sshll.u32 %s4159_s19, 10  ;;  %s296_s17 = scalar_lea.sflag [#allocation4], %s4159_s19 }
  0x62   : > { %s4163_s24 = scalar_lea.vmem [#allocation3], %s3674_s20 }
  0x63   : > { %3932 = dma.done.wait (%p7368_p4), %s296_s17, 16384  }
  0x64   : > { %3934 = vsyncadd (%p7368_p4), %s296_s17, 4294950912  ;;  %p7369_p8 = scmp.eq.s32.totalorder %s4036_s6, 0 }
  0x66   : > { %3936 = dma.done.wait (%p7369_p8), [#allocation7], 65536   ;;  %p7370_p3 = pmov %p7369_p8 }
  0x68   : > { %3938 = vsyncadd (%p7370_p3), [#allocation7], 4294901760  ;;  %p7371_p11 = pmov %p7370_p3 }
  0x69   : > { %p7372_p5 = pmov %p7370_p3 }
  0x6a   : > { %3940 = dma.done.wait (%p7371_p11), [#allocation10], 64  }
  0x6b   : > { %3942 = vsyncadd (%p7372_p5), [#allocation10], 4294967232  ;;  %v533_v1 = vld [vmem:[#allocation6 + $0x1e8] sm:$0xff]  ;;  %v532_v3 = vld [vmem:[#allocation6 + $0x1e0] sm:$0xff]  ;;  %s3678_s12 = sshll.u32 %s4159_s19, 1  ;;  %s3686_s15 = sshll.u32 %s4036_s6, 5 }
  0x6c   : > { %v661_v2 = vld [vmem:[#allocation6 + $0x5e8] sm:$0xff]  ;;  %750 = vmatprep.subr.mxu0 %v533_v1  ;;  %v660_v4 = vld [vmem:[#allocation6 + $0x5e0] sm:$0xff]  ;;  %s341_s30 = scalar_lea.vmem [#allocation11], %s3678_s12  ;;  %s3562_s23 = scalar_lea.hbm %s7111_s7, %s3686_s15 }
  0x6d   : > { %1007 = vmatprep.subr.mxu1 %v661_v2  ;;  %v529_v5 = vld [vmem:[#allocation6 + $0x1c8] sm:$0xff]  ;;  %751 = vmatpush1.msra.mxu0 %v532_v3  ;;  %v528_v7 = vld [vmem:[#allocation6 + $0x1c0] sm:$0xff]  ;;  %s3564_s21 = sshll.u32 %s341_s30, 4  ;;  %s3550_s20 = scalar_lea.sflag [#allocation5], %s4159_s19  ;;  %s3565_s21 = int_to_ptr.vmem [resolvable:$true] %s3564_s21 }
  0x6e   : > { %v657_v6 = vld [vmem:[#allocation6 + $0x5c8] sm:$0xff]  ;;  %1008 = vmatpush1.msra.mxu1 %v660_v4  ;;  %v656_v8 = vld [vmem:[#allocation6 + $0x5c0] sm:$0xff]  ;;  %752 = vmatprep.subr.mxu0 %v529_v5  ;;  %s3889_s17 = scalar_lea.vmem %s3565_s21, 32  ;;  %p8035_p1 = scmp.ne.s32.totalorder %s7363_s18, 0 }
  0x6f   : > { %v525_v9 = vld [vmem:[#allocation6 + $0x1a8] sm:$0xff]  ;;  %1009 = vmatprep.subr.mxu1 %v657_v6  ;;  %v524_v11 = vld [vmem:[#allocation6 + $0x1a0] sm:$0xff]  ;;  %753 = vmatpush1.msra.mxu0 %v528_v7  ;;  %p3890_p7 = scmp.ne.s32.totalorder %s3565_s21, %s3889_s17 }
  0x70   : > { %v653_v10 = vld [vmem:[#allocation6 + $0x5a8] sm:$0xff]  ;;  %v652_v12 = vld [vmem:[#allocation6 + $0x5a0] sm:$0xff]  ;;  %1010 = vmatpush1.msra.mxu1 %v656_v8  ;;  %754 = vmatprep.subr.mxu0 %v525_v9 }
  0x71   : > { %v521_v13 = vld [vmem:[#allocation6 + $0x188] sm:$0xff]  ;;  %1011 = vmatprep.subr.mxu1 %v653_v10  ;;  %v520_v15 = vld [vmem:[#allocation6 + $0x180] sm:$0xff]  ;;  %755 = vmatpush1.msra.mxu0 %v524_v11  ;;  %p3891_p12 = pnand %p3890_p7, %p8035_p1 }
  0x72   : > { %v649_v14 = vld [vmem:[#allocation6 + $0x588] sm:$0xff]  ;;  %v648_v16 = vld [vmem:[#allocation6 + $0x580] sm:$0xff]  ;;  %1012 = vmatpush1.msra.mxu1 %v652_v12  ;;  %756 = vmatprep.subr.mxu0 %v521_v13 }
  0x73   : > { %v517_v17 = vld [vmem:[#allocation6 + $0x168] sm:$0xff]  ;;  %1013 = vmatprep.subr.mxu1 %v649_v14  ;;  %v516_v19 = vld [vmem:[#allocation6 + $0x160] sm:$0xff]  ;;  %757 = vmatpush1.msra.mxu0 %v520_v15  ;;  %p3892_p9 = pneg %p3891_p12 }
  0x74   : > { %v645_v18 = vld [vmem:[#allocation6 + $0x568] sm:$0xff]  ;;  %v644_v20 = vld [vmem:[#allocation6 + $0x560] sm:$0xff]  ;;  %1014 = vmatpush1.msra.mxu1 %v648_v16  ;;  %758 = vmatprep.subr.mxu0 %v517_v17 }
  0x75   : > { %v513_v21 = vld [vmem:[#allocation6 + $0x148] sm:$0xff]  ;;  %1015 = vmatprep.subr.mxu1 %v645_v18  ;;  %v512_v23 = vld [vmem:[#allocation6 + $0x140] sm:$0xff]  ;;  %759 = vmatpush1.msra.mxu0 %v516_v19 }
  0x76   : > { %v641_v22 = vld [vmem:[#allocation6 + $0x548] sm:$0xff]  ;;  %v640_v24 = vld [vmem:[#allocation6 + $0x540] sm:$0xff]  ;;  %1016 = vmatpush1.msra.mxu1 %v644_v20  ;;  %760 = vmatprep.subr.mxu0 %v513_v21 }
  0x77   : > { %v509_v25 = vld [vmem:[#allocation6 + $0x128] sm:$0xff]  ;;  %1017 = vmatprep.subr.mxu1 %v641_v22  ;;  %v508_v27 = vld [vmem:[#allocation6 + $0x120] sm:$0xff]  ;;  %761 = vmatpush1.msra.mxu0 %v512_v23 }
  0x78   : > { %v637_v26 = vld [vmem:[#allocation6 + $0x528] sm:$0xff]  ;;  %v636_v28 = vld [vmem:[#allocation6 + $0x520] sm:$0xff]  ;;  %1018 = vmatpush1.msra.mxu1 %v640_v24  ;;  %762 = vmatprep.subr.mxu0 %v509_v25 }
  0x79   : > { %v505_v29 = vld [vmem:[#allocation6 + $0x108] sm:$0xff]  ;;  %1019 = vmatprep.subr.mxu1 %v637_v26  ;;  %v504_v31 = vld [vmem:[#allocation6 + $0x100] sm:$0xff]  ;;  %763 = vmatpush1.msra.mxu0 %v508_v27 }
  0x7a   : > { %v633_v30 = vld [vmem:[#allocation6 + $0x508] sm:$0xff]  ;;  %v632_v32 = vld [vmem:[#allocation6 + $0x500] sm:$0xff]  ;;  %1020 = vmatpush1.msra.mxu1 %v636_v28  ;;  %764 = vmatprep.subr.mxu0 %v505_v29 }
  0x7b   : > { %v501_v33 = vld [vmem:[#allocation6 + $0xe8] sm:$0xff]  ;;  %1021 = vmatprep.subr.mxu1 %v633_v30  ;;  %v500_v35 = vld [vmem:[#allocation6 + $0xe0] sm:$0xff]  ;;  %765 = vmatpush1.msra.mxu0 %v504_v31 }
  0x7c   : > { %v629_v34 = vld [vmem:[#allocation6 + $0x4e8] sm:$0xff]  ;;  %v628_v36 = vld [vmem:[#allocation6 + $0x4e0] sm:$0xff]  ;;  %1022 = vmatpush1.msra.mxu1 %v632_v32  ;;  %766 = vmatprep.subr.mxu0 %v501_v33 }
  0x7d   : > { %v497_v37 = vld [vmem:[#allocation6 + $0xc8] sm:$0xff]  ;;  %1023 = vmatprep.subr.mxu1 %v629_v34  ;;  %v496_v39 = vld [vmem:[#allocation6 + $0xc0] sm:$0xff]  ;;  %767 = vmatpush1.msra.mxu0 %v500_v35 }
  0x7e   : > { %v625_v38 = vld [vmem:[#allocation6 + $0x4c8] sm:$0xff]  ;;  %v624_v40 = vld [vmem:[#allocation6 + $0x4c0] sm:$0xff]  ;;  %1024 = vmatpush1.msra.mxu1 %v628_v36  ;;  %768 = vmatprep.subr.mxu0 %v497_v37 }
  0x7f   : > { %v493_v41 = vld [vmem:[#allocation6 + $0xa8] sm:$0xff]  ;;  %1025 = vmatprep.subr.mxu1 %v625_v38  ;;  %v492_v43 = vld [vmem:[#allocation6 + $0xa0] sm:$0xff]  ;;  %769 = vmatpush1.msra.mxu0 %v496_v39 }
  0x80   : > { %v621_v42 = vld [vmem:[#allocation6 + $0x4a8] sm:$0xff]  ;;  %v620_v44 = vld [vmem:[#allocation6 + $0x4a0] sm:$0xff]  ;;  %1026 = vmatpush1.msra.mxu1 %v624_v40  ;;  %770 = vmatprep.subr.mxu0 %v493_v41 }
  0x81   : > { %v489_v45 = vld [vmem:[#allocation6 + $0x88] sm:$0xff]  ;;  %1027 = vmatprep.subr.mxu1 %v621_v42  ;;  %v488_v47 = vld [vmem:[#allocation6 + $0x80] sm:$0xff]  ;;  %771 = vmatpush1.msra.mxu0 %v492_v43 }
  0x82   : > { %v617_v46 = vld [vmem:[#allocation6 + $0x488] sm:$0xff]  ;;  %v616_v48 = vld [vmem:[#allocation6 + $0x480] sm:$0xff]  ;;  %1028 = vmatpush1.msra.mxu1 %v620_v44  ;;  %772 = vmatprep.subr.mxu0 %v489_v45 }
  0x83   : > { %v485_v49 = vld [vmem:[#allocation6 + $0x68] sm:$0xff]  ;;  %1029 = vmatprep.subr.mxu1 %v617_v46  ;;  %v484_v51 = vld [vmem:[#allocation6 + $0x60] sm:$0xff]  ;;  %773 = vmatpush1.msra.mxu0 %v488_v47 }
  0x84   : > { %v613_v50 = vld [vmem:[#allocation6 + $0x468] sm:$0xff]  ;;  %v612_v52 = vld [vmem:[#allocation6 + $0x460] sm:$0xff]  ;;  %1030 = vmatpush1.msra.mxu1 %v616_v48  ;;  %774 = vmatprep.subr.mxu0 %v485_v49 }
  0x85   : > { %v481_v53 = vld [vmem:[#allocation6 + $0x48] sm:$0xff]  ;;  %1031 = vmatprep.subr.mxu1 %v613_v50  ;;  %v480_v55 = vld [vmem:[#allocation6 + $0x40] sm:$0xff]  ;;  %775 = vmatpush1.msra.mxu0 %v484_v51 }
  0x86   : > { %v609_v54 = vld [vmem:[#allocation6 + $0x448] sm:$0xff]  ;;  %v608_v56 = vld [vmem:[#allocation6 + $0x440] sm:$0xff]  ;;  %1032 = vmatpush1.msra.mxu1 %v612_v52  ;;  %776 = vmatprep.subr.mxu0 %v481_v53 }
  0x87   : > { %v477_v57 = vld [vmem:[#allocation6 + $0x28] sm:$0xff]  ;;  %1033 = vmatprep.subr.mxu1 %v609_v54  ;;  %v476_v59 = vld [vmem:[#allocation6 + $0x20] sm:$0xff]  ;;  %777 = vmatpush1.msra.mxu0 %v480_v55 }
  0x88   : > { %v605_v58 = vld [vmem:[#allocation6 + $0x428] sm:$0xff]  ;;  %v604_v60 = vld [vmem:[#allocation6 + $0x420] sm:$0xff]  ;;  %1034 = vmatpush1.msra.mxu1 %v608_v56  ;;  %778 = vmatprep.subr.mxu0 %v477_v57 }
  0x89   : > { %v473_v61 = vld [vmem:[#allocation6 + $0x8] sm:$0xff]  ;;  %1035 = vmatprep.subr.mxu1 %v605_v58  ;;  %v472_v63 = vld [vmem:[#allocation6] sm:$0xff]  ;;  %779 = vmatpush1.msra.mxu0 %v476_v59 }
  0x8a   : > { %v601_v62 = vld [vmem:[#allocation6 + $0x408] sm:$0xff]  ;;  %v600_v0 = vld [vmem:[#allocation6 + $0x400] sm:$0xff]  ;;  %1036 = vmatpush1.msra.mxu1 %v604_v60  ;;  %780 = vmatprep.subr.mxu0 %v473_v61 }
  0x8b   : > { %v597_v1 = vld [vmem:[#allocation6 + $0x3e8] sm:$0xff]  ;;  %1037 = vmatprep.subr.mxu1 %v601_v62  ;;  %v596_v3 = vld [vmem:[#allocation6 + $0x3e0] sm:$0xff]  ;;  %781 = vmatpush1.msra.mxu0 %v472_v63 }
  0x8c   : > { %v725_v2 = vld [vmem:[#allocation6 + $0x7e8] sm:$0xff]  ;;  %v724_v4 = vld [vmem:[#allocation6 + $0x7e0] sm:$0xff]  ;;  %1038 = vmatpush1.msra.mxu1 %v600_v0  ;;  %782 = vmatprep.subr.mxu0 %v597_v1 }
  0x8d   : > { %v593_v5 = vld [vmem:[#allocation6 + $0x3c8] sm:$0xff]  ;;  %1039 = vmatprep.subr.mxu1 %v725_v2  ;;  %v592_v7 = vld [vmem:[#allocation6 + $0x3c0] sm:$0xff]  ;;  %783 = vmatpush2.msra.mxu0 %v596_v3  ;;  %v347_v2 = vld [vmem:[%s4163_s24 + $0x18] sm:$0xff] }
  0x8e   : > { %v721_v6 = vld [vmem:[#allocation6 + $0x7c8] sm:$0xff]  ;;  %v720_v8 = vld [vmem:[#allocation6 + $0x7c0] sm:$0xff]  ;;  %1040 = vmatpush2.msra.mxu1 %v724_v4  ;;  %784 = vmatprep.subr.mxu0 %v593_v5  ;;  %v346_v4 = vld [vmem:[%s4163_s24 + $0x10] sm:$0xff] }
  0x8f   : > { %v589_v9 = vld [vmem:[#allocation6 + $0x3a8] sm:$0xff]  ;;  %1041 = vmatprep.subr.mxu1 %v721_v6  ;;  %v588_v11 = vld [vmem:[#allocation6 + $0x3a0] sm:$0xff]  ;;  %785 = vmatpush2.msra.mxu0 %v592_v7  ;;  %v535_v5 = vld [vmem:[#allocation6 + $0x1f8] sm:$0xff] }
  0x90   : > { %v717_v10 = vld [vmem:[#allocation6 + $0x7a8] sm:$0xff]  ;;  %v716_v12 = vld [vmem:[#allocation6 + $0x7a0] sm:$0xff]  ;;  %1042 = vmatpush2.msra.mxu1 %v720_v8  ;;  %786 = vmatprep.subr.mxu0 %v589_v9  ;;  %v663_v6 = vld [vmem:[#allocation6 + $0x5f8] sm:$0xff] }
  0x91   : > { %v585_v13 = vld [vmem:[#allocation6 + $0x388] sm:$0xff]  ;;  %1043 = vmatprep.subr.mxu1 %v717_v10  ;;  %v584_v15 = vld [vmem:[#allocation6 + $0x380] sm:$0xff]  ;;  %787 = vmatpush2.msra.mxu0 %v588_v11  ;;  %v534_v7 = vld [vmem:[#allocation6 + $0x1f0] sm:$0xff] }
  0x92   : > { %v713_v14 = vld [vmem:[#allocation6 + $0x788] sm:$0xff]  ;;  %v712_v16 = vld [vmem:[#allocation6 + $0x780] sm:$0xff]  ;;  %1044 = vmatpush2.msra.mxu1 %v716_v12  ;;  %788 = vmatprep.subr.mxu0 %v585_v13  ;;  %v4185_v9 = vld [vmem:[%s4163_s24 + $0x38] sm:$0xff] }
  0x93   : > { %v581_v17 = vld [vmem:[#allocation6 + $0x368] sm:$0xff]  ;;  %1045 = vmatprep.subr.mxu1 %v713_v14  ;;  %v580_v19 = vld [vmem:[#allocation6 + $0x360] sm:$0xff]  ;;  %789 = vmatpush2.msra.mxu0 %v584_v15  ;;  %v662_v10 = vld [vmem:[#allocation6 + $0x5f0] sm:$0xff] }
  0x94   : > { %v709_v18 = vld [vmem:[#allocation6 + $0x768] sm:$0xff]  ;;  %v708_v20 = vld [vmem:[#allocation6 + $0x760] sm:$0xff]  ;;  %1046 = vmatpush2.msra.mxu1 %v712_v16  ;;  %790 = vmatprep.subr.mxu0 %v581_v17  ;;  %v350_v12 = vld [vmem:[%s4163_s24 + $0x30] sm:$0xff] }
  0x95   : > { %v577_v21 = vld [vmem:[#allocation6 + $0x348] sm:$0xff]  ;;  %1047 = vmatprep.subr.mxu1 %v709_v18  ;;  %v576_v23 = vld [vmem:[#allocation6 + $0x340] sm:$0xff]  ;;  %791 = vmatpush2.msra.mxu0 %v580_v19  ;;  %v531_v13 = vld [vmem:[#allocation6 + $0x1d8] sm:$0xff] }
  0x96   : > { %v705_v22 = vld [vmem:[#allocation6 + $0x748] sm:$0xff]  ;;  %v704_v24 = vld [vmem:[#allocation6 + $0x740] sm:$0xff]  ;;  %1048 = vmatpush2.msra.mxu1 %v708_v20  ;;  %792 = vmatprep.subr.mxu0 %v577_v21  ;;  %v659_v14 = vld [vmem:[#allocation6 + $0x5d8] sm:$0xff] }
  0x97   : > { %v573_v25 = vld [vmem:[#allocation6 + $0x328] sm:$0xff]  ;;  %1049 = vmatprep.subr.mxu1 %v705_v22  ;;  %v572_v27 = vld [vmem:[#allocation6 + $0x320] sm:$0xff]  ;;  %793 = vmatpush2.msra.mxu0 %v576_v23  ;;  %v530_v15 = vld [vmem:[#allocation6 + $0x1d0] sm:$0xff] }
  0x98   : > { %v701_v26 = vld [vmem:[#allocation6 + $0x728] sm:$0xff]  ;;  %v700_v28 = vld [vmem:[#allocation6 + $0x720] sm:$0xff]  ;;  %1050 = vmatpush2.msra.mxu1 %v704_v24  ;;  %794 = vmatprep.subr.mxu0 %v573_v25  ;;  %v4195_v17 = vld [vmem:[%s4163_s24 + $0x58] sm:$0xff] }
  0x99   : > { %v569_v29 = vld [vmem:[#allocation6 + $0x308] sm:$0xff]  ;;  %1051 = vmatprep.subr.mxu1 %v701_v26  ;;  %v568_v31 = vld [vmem:[#allocation6 + $0x300] sm:$0xff]  ;;  %795 = vmatpush2.msra.mxu0 %v572_v27  ;;  %v658_v18 = vld [vmem:[#allocation6 + $0x5d0] sm:$0xff] }
  0x9a   : > { %v697_v30 = vld [vmem:[#allocation6 + $0x708] sm:$0xff]  ;;  %v696_v32 = vld [vmem:[#allocation6 + $0x700] sm:$0xff]  ;;  %1052 = vmatpush2.msra.mxu1 %v700_v28  ;;  %796 = vmatprep.subr.mxu0 %v569_v29  ;;  %v4201_v20 = vld [vmem:[%s4163_s24 + $0x50] sm:$0xff] }
  0x9b   : > { %v565_v33 = vld [vmem:[#allocation6 + $0x2e8] sm:$0xff]  ;;  %1053 = vmatprep.subr.mxu1 %v697_v30  ;;  %v564_v35 = vld [vmem:[#allocation6 + $0x2e0] sm:$0xff]  ;;  %797 = vmatpush2.msra.mxu0 %v568_v31  ;;  %v527_v21 = vld [vmem:[#allocation6 + $0x1b8] sm:$0xff] }
  0x9c   : > { %v693_v34 = vld [vmem:[#allocation6 + $0x6e8] sm:$0xff]  ;;  %v692_v36 = vld [vmem:[#allocation6 + $0x6e0] sm:$0xff]  ;;  %1054 = vmatpush2.msra.mxu1 %v696_v32  ;;  %798 = vmatprep.subr.mxu0 %v565_v33  ;;  %v655_v22 = vld [vmem:[#allocation6 + $0x5b8] sm:$0xff] }
  0x9d   : > { %v561_v37 = vld [vmem:[#allocation6 + $0x2c8] sm:$0xff]  ;;  %1055 = vmatprep.subr.mxu1 %v693_v34  ;;  %v560_v39 = vld [vmem:[#allocation6 + $0x2c0] sm:$0xff]  ;;  %799 = vmatpush2.msra.mxu0 %v564_v35  ;;  %v526_v23 = vld [vmem:[#allocation6 + $0x1b0] sm:$0xff] }
  0x9e   : > { %v689_v38 = vld [vmem:[#allocation6 + $0x6c8] sm:$0xff]  ;;  %v688_v40 = vld [vmem:[#allocation6 + $0x6c0] sm:$0xff]  ;;  %1056 = vmatpush2.msra.mxu1 %v692_v36  ;;  %800 = vmatprep.subr.mxu0 %v561_v37  ;;  %v4211_v25 = vld [vmem:[%s4163_s24 + $0x78] sm:$0xff] }
  0x9f   : > { %v557_v41 = vld [vmem:[#allocation6 + $0x2a8] sm:$0xff]  ;;  %1057 = vmatprep.subr.mxu1 %v689_v38  ;;  %v556_v43 = vld [vmem:[#allocation6 + $0x2a0] sm:$0xff]  ;;  %801 = vmatpush2.msra.mxu0 %v560_v39  ;;  %v654_v26 = vld [vmem:[#allocation6 + $0x5b0] sm:$0xff] }
  0xa0   : > { %v685_v42 = vld [vmem:[#allocation6 + $0x6a8] sm:$0xff]  ;;  %v684_v44 = vld [vmem:[#allocation6 + $0x6a0] sm:$0xff]  ;;  %1058 = vmatpush2.msra.mxu1 %v688_v40  ;;  %802 = vmatprep.subr.mxu0 %v557_v41  ;;  %v4217_v28 = vld [vmem:[%s4163_s24 + $0x70] sm:$0xff] }
  0xa1   : > { %v553_v45 = vld [vmem:[#allocation6 + $0x288] sm:$0xff]  ;;  %1059 = vmatprep.subr.mxu1 %v685_v42  ;;  %v552_v47 = vld [vmem:[#allocation6 + $0x280] sm:$0xff]  ;;  %803 = vmatpush2.msra.mxu0 %v556_v43  ;;  %v523_v29 = vld [vmem:[#allocation6 + $0x198] sm:$0xff] }
  0xa2   : > { %v681_v46 = vld [vmem:[#allocation6 + $0x688] sm:$0xff]  ;;  %v680_v48 = vld [vmem:[#allocation6 + $0x680] sm:$0xff]  ;;  %1060 = vmatpush2.msra.mxu1 %v684_v44  ;;  %804 = vmatprep.subr.mxu0 %v553_v45  ;;  %v651_v30 = vld [vmem:[#allocation6 + $0x598] sm:$0xff] }
  0xa3   : > { %v549_v49 = vld [vmem:[#allocation6 + $0x268] sm:$0xff]  ;;  %1061 = vmatprep.subr.mxu1 %v681_v46  ;;  %v548_v51 = vld [vmem:[#allocation6 + $0x260] sm:$0xff]  ;;  %805 = vmatpush2.msra.mxu0 %v552_v47  ;;  %v522_v31 = vld [vmem:[#allocation6 + $0x190] sm:$0xff] }
  0xa4   : > { %v677_v50 = vld [vmem:[#allocation6 + $0x668] sm:$0xff]  ;;  %v676_v52 = vld [vmem:[#allocation6 + $0x660] sm:$0xff]  ;;  %1062 = vmatpush2.msra.mxu1 %v680_v48  ;;  %806 = vmatprep.subr.mxu0 %v549_v49  ;;  %v4227_v33 = vld [vmem:[%s4163_s24 + $0x98] sm:$0xff] }
  0xa5   : > { %v545_v53 = vld [vmem:[#allocation6 + $0x248] sm:$0xff]  ;;  %1063 = vmatprep.subr.mxu1 %v677_v50  ;;  %v544_v55 = vld [vmem:[#allocation6 + $0x240] sm:$0xff]  ;;  %807 = vmatpush2.msra.mxu0 %v548_v51  ;;  %v650_v34 = vld [vmem:[#allocation6 + $0x590] sm:$0xff] }
  0xa6   : > { %v673_v54 = vld [vmem:[#allocation6 + $0x648] sm:$0xff]  ;;  %v672_v56 = vld [vmem:[#allocation6 + $0x640] sm:$0xff]  ;;  %1064 = vmatpush2.msra.mxu1 %v676_v52  ;;  %808 = vmatprep.subr.mxu0 %v545_v53  ;;  %v4233_v36 = vld [vmem:[%s4163_s24 + $0x90] sm:$0xff] }
  0xa7   : > { %v541_v57 = vld [vmem:[#allocation6 + $0x228] sm:$0xff]  ;;  %1065 = vmatprep.subr.mxu1 %v673_v54  ;;  %v540_v59 = vld [vmem:[#allocation6 + $0x220] sm:$0xff]  ;;  %809 = vmatpush2.msra.mxu0 %v544_v55  ;;  %v519_v37 = vld [vmem:[#allocation6 + $0x178] sm:$0xff] }
  0xa8   : > { %v669_v58 = vld [vmem:[#allocation6 + $0x628] sm:$0xff]  ;;  %v668_v60 = vld [vmem:[#allocation6 + $0x620] sm:$0xff]  ;;  %1066 = vmatpush2.msra.mxu1 %v672_v56  ;;  %810 = vmatprep.subr.mxu0 %v541_v57  ;;  %v647_v38 = vld [vmem:[#allocation6 + $0x578] sm:$0xff] }
  0xa9   : > { %v537_v61 = vld [vmem:[#allocation6 + $0x208] sm:$0xff]  ;;  %1067 = vmatprep.subr.mxu1 %v669_v58  ;;  %v536_v63 = vld [vmem:[#allocation6 + $0x200] sm:$0xff]  ;;  %811 = vmatpush2.msra.mxu0 %v540_v59  ;;  %v518_v39 = vld [vmem:[#allocation6 + $0x170] sm:$0xff] }
  0xaa   : > { %v665_v62 = vld [vmem:[#allocation6 + $0x608] sm:$0xff]  ;;  %1068 = vmatpush2.msra.mxu1 %v668_v60  ;;  %v664_v1 = vld [vmem:[#allocation6 + $0x600] sm:$0xff]  ;;  %812 = vmatprep.subr.mxu0 %v537_v61  ;;  %v4243_v41 = vld [vmem:[%s4163_s24 + $0xb8] sm:$0xff] }
  0xab   : > { %v345_v0 = vld [vmem:[%s4163_s24 + $0x8] sm:$0xff]  ;;  %1069 = vmatprep.subr.mxu1 %v665_v62  ;;  %v344_v3 = vld [vmem:[%s4163_s24] sm:$0xff]  ;;  %813 = vmatpush2.msra.mxu0 %v536_v63  ;;  %v646_v42 = vld [vmem:[#allocation6 + $0x570] sm:$0xff] }
  0xac   : > { %814 = vmatprep.mubr.f32.mxu0 %v345_v0  ;;  %1070 = vmatpush2.msra.mxu1 %v664_v1  ;;  %v4182_v8 = vld [vmem:[%s4163_s24 + $0x28] sm:$0xff]  ;;  %v348_v11 = vld [vmem:[%s4163_s24 + $0x20] sm:$0xff]  ;;  %v4249_v44 = vld [vmem:[%s4163_s24 + $0xb0] sm:$0xff] }
  0xad   : > { %1071 = vmatprep.mubr.f32.mxu1 %v347_v2  ;;  %815 = vmatmul.mubr.f32.vlgmr.msra.gmra.mxu0 %v344_v3  ;;  %v4192_v16 = vld [vmem:[%s4163_s24 + $0x48] sm:$0xff]  ;;  %v4198_v19 = vld [vmem:[%s4163_s24 + $0x40] sm:$0xff]  ;;  %v515_v45 = vld [vmem:[#allocation6 + $0x158] sm:$0xff] }
  0xae   : > { %1072 = vmatmul.mubr.f32.vlgmr.msra.gmra.mxu1 %v346_v4  ;;  %1264 = vmatprep.subr.mxu0 %v535_v5  ;;  %v4206_v24 = vld [vmem:[%s4163_s24 + $0x68] sm:$0xff]  ;;  %v4214_v27 = vld [vmem:[%s4163_s24 + $0x60] sm:$0xff]  ;;  %v643_v46 = vld [vmem:[#allocation6 + $0x558] sm:$0xff] }
  0xaf   : > { %1521 = vmatprep.subr.mxu1 %v663_v6  ;;  %1265 = vmatpush1.msra.mxu0 %v534_v7  ;;  %v4222_v32 = vld [vmem:[%s4163_s24 + $0x88] sm:$0xff]  ;;  %v4230_v35 = vld [vmem:[%s4163_s24 + $0x80] sm:$0xff]  ;;  %v514_v47 = vld [vmem:[#allocation6 + $0x150] sm:$0xff] }
  0xb0   : > { %820 = vmatprep.mubr.f32.mxu0 %v4182_v8  ;;  %1077 = vmatprep.mubr.f32.mxu1 %v4185_v9  ;;  %v4238_v40 = vld [vmem:[%s4163_s24 + $0xa8] sm:$0xff]  ;;  %v4246_v43 = vld [vmem:[%s4163_s24 + $0xa0] sm:$0xff]  ;;  %v4259_v49 = vld [vmem:[%s4163_s24 + $0xd8] sm:$0xff] }
  0xb1   : > { %1522 = vmatpush1.msra.mxu1 %v662_v10  ;;  %821 = vmatmul.mubr.f32.gmra.mxu0 %v348_v11  ;;  %v4254_v48 = vld [vmem:[%s4163_s24 + $0xc8] sm:$0xff]  ;;  %v642_v50 = vld [vmem:[#allocation6 + $0x550] sm:$0xff]  ;;  %v4262_v51 = vld [vmem:[%s4163_s24 + $0xc0] sm:$0xff] }
  0xb2   : > { %1078 = vmatmul.mubr.f32.gmra.mxu1 %v350_v12  ;;  %1266 = vmatprep.subr.mxu0 %v531_v13  ;;  %v4265_v52 = vld [vmem:[%s4163_s24 + $0xd0] sm:$0xff]  ;;  %v511_v53 = vld [vmem:[#allocation6 + $0x138] sm:$0xff]  ;;  %v4270_v56 = vld [vmem:[%s4163_s24 + $0xe8] sm:$0xff] }
  0xb3   : > { %1523 = vmatprep.subr.mxu1 %v659_v14  ;;  %1267 = vmatpush1.msra.mxu0 %v530_v15  ;;  %v639_v54 = vld [vmem:[#allocation6 + $0x538] sm:$0xff]  ;;  %v510_v55 = vld [vmem:[#allocation6 + $0x130] sm:$0xff]  ;;  %v4278_v59 = vld [vmem:[%s4163_s24 + $0xe0] sm:$0xff] }
  0xb4   : > { %826 = vmatprep.mubr.f32.mxu0 %v4192_v16  ;;  %1083 = vmatprep.mubr.f32.mxu1 %v4195_v17  ;;  %v4275_v57 = vld [vmem:[%s4163_s24 + $0xf8] sm:$0xff]  ;;  %v638_v58 = vld [vmem:[#allocation6 + $0x530] sm:$0xff]  ;;  %v4286_v0 = vld [vmem:[%s4163_s24 + $0x108] sm:$0xff] }
  0xb5   : > { %1524 = vmatpush1.msra.mxu1 %v658_v18  ;;  %827 = vmatmul.mubr.f32.gmra.mxu0 %v4198_v19  ;;  %v4281_v60 = vld [vmem:[%s4163_s24 + $0xf0] sm:$0xff]  ;;  %v507_v61 = vld [vmem:[#allocation6 + $0x118] sm:$0xff]  ;;  %v4294_v3 = vld [vmem:[%s4163_s24 + $0x100] sm:$0xff] }
  0xb6   : > { %1084 = vmatmul.mubr.f32.gmra.mxu1 %v4201_v20  ;;  %1268 = vmatprep.subr.mxu0 %v527_v21  ;;  %v635_v62 = vld [vmem:[#allocation6 + $0x518] sm:$0xff]  ;;  %v506_v63 = vld [vmem:[#allocation6 + $0x110] sm:$0xff]  ;;  %v4302_v10 = vld [vmem:[%s4163_s24 + $0x128] sm:$0xff] }
  0xb7   : > { %1525 = vmatprep.subr.mxu1 %v655_v22  ;;  %1269 = vmatpush1.msra.mxu0 %v526_v23  ;;  %v4291_v1 = vld [vmem:[%s4163_s24 + $0x118] sm:$0xff]  ;;  %v634_v2 = vld [vmem:[#allocation6 + $0x510] sm:$0xff]  ;;  %v4310_v13 = vld [vmem:[%s4163_s24 + $0x120] sm:$0xff] }
  0xb8   : > { %832 = vmatprep.mubr.f32.mxu0 %v4206_v24  ;;  %1089 = vmatprep.mubr.f32.mxu1 %v4211_v25  ;;  %v4297_v4 = vld [vmem:[%s4163_s24 + $0x110] sm:$0xff]  ;;  %v503_v5 = vld [vmem:[#allocation6 + $0xf8] sm:$0xff]  ;;  %v4318_v22 = vld [vmem:[%s4163_s24 + $0x148] sm:$0xff] }
  0xb9   : > { %1526 = vmatpush1.msra.mxu1 %v654_v26  ;;  %833 = vmatmul.mubr.f32.gmra.mxu0 %v4214_v27  ;;  %v631_v6 = vld [vmem:[#allocation6 + $0x4f8] sm:$0xff]  ;;  %v502_v7 = vld [vmem:[#allocation6 + $0xf0] sm:$0xff] }
  0xba   : > { %1090 = vmatmul.mubr.f32.gmra.mxu1 %v4217_v28  ;;  %1270 = vmatprep.subr.mxu0 %v523_v29  ;;  %v4307_v11 = vld [vmem:[%s4163_s24 + $0x138] sm:$0xff]  ;;  %v630_v12 = vld [vmem:[#allocation6 + $0x4f0] sm:$0xff]  ;;  %v4326_v29 = vld [vmem:[%s4163_s24 + $0x140] sm:$0xff] }
  0xbb   : > { %1527 = vmatprep.subr.mxu1 %v651_v30  ;;  %1271 = vmatpush1.msra.mxu0 %v522_v31  ;;  %v4313_v14 = vld [vmem:[%s4163_s24 + $0x130] sm:$0xff]  ;;  %v499_v15 = vld [vmem:[#allocation6 + $0xd8] sm:$0xff] }
  0xbc   : > { %838 = vmatprep.mubr.f32.mxu0 %v4222_v32  ;;  %1095 = vmatprep.mubr.f32.mxu1 %v4227_v33  ;;  %v627_v18 = vld [vmem:[#allocation6 + $0x4d8] sm:$0xff]  ;;  %v498_v21 = vld [vmem:[#allocation6 + $0xd0] sm:$0xff] }
  0xbd   : > { %1528 = vmatpush1.msra.mxu1 %v650_v34  ;;  %839 = vmatmul.mubr.f32.gmra.mxu0 %v4230_v35  ;;  %v4323_v23 = vld [vmem:[%s4163_s24 + $0x158] sm:$0xff]  ;;  %v626_v26 = vld [vmem:[#allocation6 + $0x4d0] sm:$0xff] }
  0xbe   : > { %1096 = vmatmul.mubr.f32.gmra.mxu1 %v4233_v36  ;;  %1272 = vmatprep.subr.mxu0 %v519_v37  ;;  %v4329_v30 = vld [vmem:[%s4163_s24 + $0x150] sm:$0xff]  ;;  %v495_v31 = vld [vmem:[#allocation6 + $0xb8] sm:$0xff] }
  0xbf   : > { %1529 = vmatprep.subr.mxu1 %v647_v38  ;;  %1273 = vmatpush1.msra.mxu0 %v518_v39  ;;  %v623_v34 = vld [vmem:[#allocation6 + $0x4b8] sm:$0xff]  ;;  %v494_v37 = vld [vmem:[#allocation6 + $0xb0] sm:$0xff]  ;;  %v4334_v38 = vld [vmem:[%s4163_s24 + $0x168] sm:$0xff] }
  0xc0   : > { %844 = vmatprep.mubr.f32.mxu0 %v4238_v40  ;;  %1101 = vmatprep.mubr.f32.mxu1 %v4243_v41  ;;  %v4339_v39 = vld [vmem:[%s4163_s24 + $0x178] sm:$0xff] }
  0xc1   : > { %1530 = vmatpush1.msra.mxu1 %v646_v42  ;;  %845 = vmatmul.mubr.f32.gmra.mxu0 %v4246_v43  ;;  %v622_v42 = vld [vmem:[#allocation6 + $0x4b0] sm:$0xff] }
  0xc2   : > { %1102 = vmatmul.mubr.f32.gmra.mxu1 %v4249_v44  ;;  %1274 = vmatprep.subr.mxu0 %v515_v45  ;;  %v4342_v45 = vld [vmem:[%s4163_s24 + $0x160] sm:$0xff] }
  0xc3   : > { %1531 = vmatprep.subr.mxu1 %v643_v46  ;;  %1275 = vmatpush1.msra.mxu0 %v514_v47  ;;  %v4345_v46 = vld [vmem:[%s4163_s24 + $0x170] sm:$0xff]  ;;  %v491_v47 = vld [vmem:[#allocation6 + $0x98] sm:$0xff] }
  0xc4   : > { %850 = vmatprep.mubr.f32.mxu0 %v4254_v48  ;;  %1107 = vmatprep.mubr.f32.mxu1 %v4259_v49 }
  0xc5   : > { %1532 = vmatpush1.msra.mxu1 %v642_v50  ;;  %851 = vmatmul.mubr.f32.gmra.mxu0 %v4262_v51  ;;  %v619_v50 = vld [vmem:[#allocation6 + $0x498] sm:$0xff] }
  0xc6   : > { %1108 = vmatmul.mubr.f32.gmra.mxu1 %v4265_v52  ;;  %1276 = vmatprep.subr.mxu0 %v511_v53  ;;  %v490_v53 = vld [vmem:[#allocation6 + $0x90] sm:$0xff] }
  0xc7   : > { %1533 = vmatprep.subr.mxu1 %v639_v54  ;;  %1277 = vmatpush1.msra.mxu0 %v510_v55  ;;  %v4350_v54 = vld [vmem:[%s4163_s24 + $0x188] sm:$0xff]  ;;  %v4355_v55 = vld [vmem:[%s4163_s24 + $0x198] sm:$0xff] }
  0xc8   : > { %856 = vmatprep.mubr.f32.mxu0 %v4270_v56  ;;  %1113 = vmatprep.mubr.f32.mxu1 %v4275_v57 }
  0xc9   : > { %1534 = vmatpush1.msra.mxu1 %v638_v58  ;;  %857 = vmatmul.mubr.f32.gmra.mxu0 %v4278_v59  ;;  %v618_v58 = vld [vmem:[#allocation6 + $0x490] sm:$0xff] }
  0xca   : > { %1114 = vmatmul.mubr.f32.gmra.mxu1 %v4281_v60  ;;  %1278 = vmatprep.subr.mxu0 %v507_v61  ;;  %v4358_v61 = vld [vmem:[%s4163_s24 + $0x180] sm:$0xff] }
  0xcb   : > { %1535 = vmatprep.subr.mxu1 %v635_v62  ;;  %1279 = vmatpush1.msra.mxu0 %v506_v63  ;;  %v4361_v62 = vld [vmem:[%s4163_s24 + $0x190] sm:$0xff]  ;;  %v487_v63 = vld [vmem:[#allocation6 + $0x78] sm:$0xff] }
  0xcc   : > { %862 = vmatprep.mubr.f32.mxu0 %v4286_v0  ;;  %1119 = vmatprep.mubr.f32.mxu1 %v4291_v1 }
  0xcd   : > { %1536 = vmatpush1.msra.mxu1 %v634_v2  ;;  %863 = vmatmul.mubr.f32.gmra.mxu0 %v4294_v3  ;;  %v615_v2 = vld [vmem:[#allocation6 + $0x478] sm:$0xff] }
  0xce   : > { %1120 = vmatmul.mubr.f32.gmra.mxu1 %v4297_v4  ;;  %1280 = vmatprep.subr.mxu0 %v503_v5  ;;  %v486_v5 = vld [vmem:[#allocation6 + $0x70] sm:$0xff] }
  0xcf   : > { %1537 = vmatprep.subr.mxu1 %v631_v6  ;;  %1281 = vmatpush1.msra.mxu0 %v502_v7  ;;  %v4366_v6 = vld [vmem:[%s4163_s24 + $0x1a8] sm:$0xff]  ;;  %v4371_v7 = vld [vmem:[%s4163_s24 + $0x1b8] sm:$0xff] }
  0xd0   : > { %868 = vmatprep.mubr.f32.mxu0 %v4302_v10  ;;  %1125 = vmatprep.mubr.f32.mxu1 %v4307_v11 }
  0xd1   : > { %1538 = vmatpush1.msra.mxu1 %v630_v12  ;;  %869 = vmatmul.mubr.f32.gmra.mxu0 %v4310_v13  ;;  %v614_v12 = vld [vmem:[#allocation6 + $0x470] sm:$0xff] }
  0xd2   : > { %1126 = vmatmul.mubr.f32.gmra.mxu1 %v4313_v14  ;;  %1282 = vmatprep.subr.mxu0 %v499_v15  ;;  %v4374_v15 = vld [vmem:[%s4163_s24 + $0x1a0] sm:$0xff] }
  0xd3   : > { %1539 = vmatprep.subr.mxu1 %v627_v18  ;;  %1283 = vmatpush1.msra.mxu0 %v498_v21  ;;  %v4377_v18 = vld [vmem:[%s4163_s24 + $0x1b0] sm:$0xff]  ;;  %v483_v21 = vld [vmem:[#allocation6 + $0x58] sm:$0xff] }
  0xd4   : > { %874 = vmatprep.mubr.f32.mxu0 %v4318_v22  ;;  %1131 = vmatprep.mubr.f32.mxu1 %v4323_v23 }
  0xd5   : > { %1540 = vmatpush1.msra.mxu1 %v626_v26  ;;  %875 = vmatmul.mubr.f32.gmra.mxu0 %v4326_v29  ;;  %v611_v26 = vld [vmem:[#allocation6 + $0x458] sm:$0xff] }
  0xd6   : > { %1132 = vmatmul.mubr.f32.gmra.mxu1 %v4329_v30  ;;  %1284 = vmatprep.subr.mxu0 %v495_v31  ;;  %v482_v31 = vld [vmem:[#allocation6 + $0x50] sm:$0xff] }
  0xd7   : > { %1541 = vmatprep.subr.mxu1 %v623_v34  ;;  %1285 = vmatpush1.msra.mxu0 %v494_v37  ;;  %v4382_v34 = vld [vmem:[%s4163_s24 + $0x1c8] sm:$0xff]  ;;  %v4387_v37 = vld [vmem:[%s4163_s24 + $0x1d8] sm:$0xff] }
  0xd8   : > { %880 = vmatprep.mubr.f32.mxu0 %v4334_v38  ;;  %1137 = vmatprep.mubr.f32.mxu1 %v4339_v39  ;;  %7373 = vst [vmem:[#allocation16_spill] sm:$0xff] %v4387_v37 }
  0xd9   : > { %1542 = vmatpush1.msra.mxu1 %v622_v42  ;;  %881 = vmatmul.mubr.f32.gmra.mxu0 %v4342_v45  ;;  %v610_v42 = vld [vmem:[#allocation6 + $0x450] sm:$0xff] }
  0xda   : > { %1138 = vmatmul.mubr.f32.gmra.mxu1 %v4345_v46  ;;  %1286 = vmatprep.subr.mxu0 %v491_v47  ;;  %v4390_v47 = vld [vmem:[%s4163_s24 + $0x1c0] sm:$0xff] }
  0xdb   : > { %1543 = vmatprep.subr.mxu1 %v619_v50  ;;  %1287 = vmatpush1.msra.mxu0 %v490_v53  ;;  %7374 = vst [vmem:[#allocation17_spill] sm:$0xff] %v4390_v47  ;;  %v4393_v50 = vld [vmem:[%s4163_s24 + $0x1d0] sm:$0xff]  ;;  %v479_v53 = vld [vmem:[#allocation6 + $0x38] sm:$0xff] }
  0xdc   : > { %886 = vmatprep.mubr.f32.mxu0 %v4350_v54  ;;  %1143 = vmatprep.mubr.f32.mxu1 %v4355_v55  ;;  %7375 = vst [vmem:[#allocation18_spill] sm:$0xff] %v4393_v50 }
  0xdd   : > { %1544 = vmatpush1.msra.mxu1 %v618_v58  ;;  %887 = vmatmul.mubr.f32.gmra.mxu0 %v4358_v61  ;;  %v607_v58 = vld [vmem:[#allocation6 + $0x438] sm:$0xff] }
  0xde   : > { %1144 = vmatmul.mubr.f32.gmra.mxu1 %v4361_v62  ;;  %1288 = vmatprep.subr.mxu0 %v487_v63  ;;  %v478_v63 = vld [vmem:[#allocation6 + $0x30] sm:$0xff] }
  0xdf   : > { %1545 = vmatprep.subr.mxu1 %v615_v2  ;;  %1289 = vmatpush1.msra.mxu0 %v486_v5  ;;  %v4398_v2 = vld [vmem:[%s4163_s24 + $0x1e8] sm:$0xff]  ;;  %v4403_v5 = vld [vmem:[%s4163_s24 + $0x1f8] sm:$0xff] }
  0xe0   : > { %892 = vmatprep.mubr.f32.mxu0 %v4366_v6  ;;  %1149 = vmatprep.mubr.f32.mxu1 %v4371_v7  ;;  %7376 = vst [vmem:[#allocation19_spill] sm:$0xff] %v4398_v2  ;;  %7377 = vst [vmem:[#allocation20_spill] sm:$0xff] %v4403_v5 }
  0xe1   : > { %1546 = vmatpush1.msra.mxu1 %v614_v12  ;;  %893 = vmatmul.mubr.f32.gmra.mxu0 %v4374_v15  ;;  %v606_v12 = vld [vmem:[#allocation6 + $0x430] sm:$0xff] }
  0xe2   : > { %1150 = vmatmul.mubr.f32.gmra.mxu1 %v4377_v18  ;;  %1290 = vmatprep.subr.mxu0 %v483_v21  ;;  %v4406_v21 = vld [vmem:[%s4163_s24 + $0x1e0] sm:$0xff] }
  0xe3   : > { %1547 = vmatprep.subr.mxu1 %v611_v26  ;;  %1291 = vmatpush1.msra.mxu0 %v482_v31  ;;  %7378 = vst [vmem:[#allocation21_spill] sm:$0xff] %v4406_v21  ;;  %v4409_v26 = vld [vmem:[%s4163_s24 + $0x1f0] sm:$0xff]  ;;  %v475_v31 = vld [vmem:[#allocation6 + $0x18] sm:$0xff] }
  0xe4   : > { %898 = vmatprep.mubr.f32.mxu0 %v4382_v34  ;;  %1155 = vmatprep.mubr.f32.mxu1 %v4387_v37  ;;  %7379 = vst [vmem:[#allocation22_spill] sm:$0xff] %v4409_v26  ;;  %v2094_v37 = vld [vmem:[#allocation8 + $0x5e0] sm:$0xff] }
  0xe5   : > { %1548 = vmatpush1.msra.mxu1 %v610_v42  ;;  %899 = vmatmul.mubr.f32.gmra.mxu0 %v4390_v47  ;;  %v603_v42 = vld [vmem:[#allocation6 + $0x418] sm:$0xff]  ;;  %v4414_v47 = vld [vmem:[%s4163_s24 + $0x208] sm:$0xff] }
  0xe6   : > { %1156 = vmatmul.mubr.f32.gmra.mxu1 %v4393_v50  ;;  %1292 = vmatprep.subr.mxu0 %v479_v53  ;;  %v474_v50 = vld [vmem:[#allocation6 + $0x10] sm:$0xff]  ;;  %7380 = vst [vmem:[#allocation23_spill] sm:$0xff] %v4414_v47  ;;  %v4419_v53 = vld [vmem:[%s4163_s24 + $0x218] sm:$0xff] }
  0xe7   : > { %1549 = vmatprep.subr.mxu1 %v607_v58  ;;  %1293 = vmatpush1.msra.mxu0 %v478_v63  ;;  %7381 = vst [vmem:[#allocation24_spill] sm:$0xff] %v4419_v53  ;;  %v602_v58 = vld [vmem:[#allocation6 + $0x410] sm:$0xff]  ;;  %v4422_v63 = vld [vmem:[%s4163_s24 + $0x200] sm:$0xff] }
  0xe8   : > { %904 = vmatprep.mubr.f32.mxu0 %v4398_v2  ;;  %1161 = vmatprep.mubr.f32.mxu1 %v4403_v5  ;;  %7382 = vst [vmem:[#allocation25_spill] sm:$0xff] %v4422_v63  ;;  %v4425_v2 = vld [vmem:[%s4163_s24 + $0x210] sm:$0xff]  ;;  %v727_v5 = vld [vmem:[#allocation6 + $0x7f8] sm:$0xff] }
  0xe9   : > { %1550 = vmatpush1.msra.mxu1 %v606_v12  ;;  %905 = vmatmul.mubr.f32.gmra.mxu0 %v4406_v21  ;;  %7383 = vst [vmem:[#allocation26_spill] sm:$0xff] %v4425_v2  ;;  %v599_v12 = vld [vmem:[#allocation6 + $0x3f8] sm:$0xff]  ;;  %v4430_v21 = vld [vmem:[%s4163_s24 + $0x228] sm:$0xff] }
  0xea   : > { %1162 = vmatmul.mubr.f32.gmra.mxu1 %v4409_v26  ;;  %1294 = vmatprep.subr.mxu0 %v475_v31  ;;  %v598_v26 = vld [vmem:[#allocation6 + $0x3f0] sm:$0xff]  ;;  %7384 = vst [vmem:[#allocation27_spill] sm:$0xff] %v4430_v21  ;;  %v4435_v31 = vld [vmem:[%s4163_s24 + $0x238] sm:$0xff] }
  0xeb   : > { %1551 = vmatprep.subr.mxu1 %v603_v42  ;;  %1295 = vmatpush1.msra.mxu0 %v474_v50  ;;  %7385 = vst [vmem:[#allocation28_spill] sm:$0xff] %v4435_v31  ;;  %v726_v42 = vld [vmem:[#allocation6 + $0x7f0] sm:$0xff]  ;;  %v4438_v50 = vld [vmem:[%s4163_s24 + $0x220] sm:$0xff] }
  0xec   : > { %910 = vmatprep.mubr.f32.mxu0 %v4414_v47  ;;  %1167 = vmatprep.mubr.f32.mxu1 %v4419_v53  ;;  %7386 = vst [vmem:[#allocation29_spill] sm:$0xff] %v4438_v50  ;;  %v4441_v47 = vld [vmem:[%s4163_s24 + $0x230] sm:$0xff]  ;;  %v723_v53 = vld [vmem:[#allocation6 + $0x7d8] sm:$0xff] }
  0xed   : > { %1552 = vmatpush1.msra.mxu1 %v602_v58  ;;  %911 = vmatmul.mubr.f32.gmra.mxu0 %v4422_v63  ;;  %7387 = vst [vmem:[#allocation30_spill] sm:$0xff] %v4441_v47  ;;  %v595_v58 = vld [vmem:[#allocation6 + $0x3d8] sm:$0xff]  ;;  %v4446_v63 = vld [vmem:[%s4163_s24 + $0x248] sm:$0xff] }
  0xee   : > { %1168 = vmatmul.mubr.f32.gmra.mxu1 %v4425_v2  ;;  %1296 = vmatprep.subr.mxu0 %v599_v12  ;;  %v594_v2 = vld [vmem:[#allocation6 + $0x3d0] sm:$0xff]  ;;  %7388 = vst [vmem:[#allocation31_spill] sm:$0xff] %v4446_v63 }
  0xef   : > { %1553 = vmatprep.subr.mxu1 %v727_v5  ;;  %1297 = vmatpush2.msra.mxu0 %v598_v26  ;;  %v4451_v5 = vld [vmem:[%s4163_s24 + $0x258] sm:$0xff]  ;;  %v722_v12 = vld [vmem:[#allocation6 + $0x7d0] sm:$0xff]  ;;  %v4454_v26 = vld [vmem:[%s4163_s24 + $0x240] sm:$0xff] }
  0xf0   : > { %916 = vmatprep.mubr.f32.mxu0 %v4430_v21  ;;  %1173 = vmatprep.mubr.f32.mxu1 %v4435_v31  ;;  %7389 = vst [vmem:[#allocation32_spill] sm:$0xff] %v4451_v5  ;;  %7390 = vst [vmem:[#allocation33_spill] sm:$0xff] %v4454_v26  ;;  %v4457_v21 = vld [vmem:[%s4163_s24 + $0x250] sm:$0xff]  ;;  %v719_v31 = vld [vmem:[#allocation6 + $0x7b8] sm:$0xff] }
  0xf1   : > { %1554 = vmatpush2.msra.mxu1 %v726_v42  ;;  %917 = vmatmul.mubr.f32.gmra.mxu0 %v4438_v50  ;;  %7391 = vst [vmem:[#allocation34_spill] sm:$0xff] %v4457_v21  ;;  %v591_v42 = vld [vmem:[#allocation6 + $0x3b8] sm:$0xff]  ;;  %v4462_v50 = vld [vmem:[%s4163_s24 + $0x268] sm:$0xff] }
  0xf2   : > { %1174 = vmatmul.mubr.f32.gmra.mxu1 %v4441_v47  ;;  %1298 = vmatprep.subr.mxu0 %v595_v58  ;;  %v590_v47 = vld [vmem:[#allocation6 + $0x3b0] sm:$0xff]  ;;  %7392 = vst [vmem:[#allocation35_spill] sm:$0xff] %v4462_v50 }
  0xf3   : > { %1555 = vmatprep.subr.mxu1 %v723_v53  ;;  %1299 = vmatpush2.msra.mxu0 %v594_v2  ;;  %v4467_v53 = vld [vmem:[%s4163_s24 + $0x278] sm:$0xff]  ;;  %v718_v58 = vld [vmem:[#allocation6 + $0x7b0] sm:$0xff]  ;;  %v4470_v2 = vld [vmem:[%s4163_s24 + $0x260] sm:$0xff] }
  0xf4   : > { %922 = vmatprep.mubr.f32.mxu0 %v4446_v63  ;;  %1179 = vmatprep.mubr.f32.mxu1 %v4451_v5  ;;  %7393 = vst [vmem:[#allocation36_spill] sm:$0xff] %v4467_v53  ;;  %7394 = vst [vmem:[#allocation37_spill] sm:$0xff] %v4470_v2  ;;  %v4473_v63 = vld [vmem:[%s4163_s24 + $0x270] sm:$0xff]  ;;  %v715_v5 = vld [vmem:[#allocation6 + $0x798] sm:$0xff] }
  0xf5   : > { %1556 = vmatpush2.msra.mxu1 %v722_v12  ;;  %923 = vmatmul.mubr.f32.gmra.mxu0 %v4454_v26  ;;  %7395 = vst [vmem:[#allocation38_spill] sm:$0xff] %v4473_v63  ;;  %v587_v12 = vld [vmem:[#allocation6 + $0x398] sm:$0xff]  ;;  %v4478_v26 = vld [vmem:[%s4163_s24 + $0x288] sm:$0xff] }
  0xf6   : > { %1180 = vmatmul.mubr.f32.gmra.mxu1 %v4457_v21  ;;  %1300 = vmatprep.subr.mxu0 %v591_v42  ;;  %v586_v21 = vld [vmem:[#allocation6 + $0x390] sm:$0xff]  ;;  %7396 = vst [vmem:[#allocation39_spill] sm:$0xff] %v4478_v26 }
  0xf7   : > { %1557 = vmatprep.subr.mxu1 %v719_v31  ;;  %1301 = vmatpush2.msra.mxu0 %v590_v47  ;;  %v4483_v31 = vld [vmem:[%s4163_s24 + $0x298] sm:$0xff]  ;;  %v714_v42 = vld [vmem:[#allocation6 + $0x790] sm:$0xff]  ;;  %v4486_v47 = vld [vmem:[%s4163_s24 + $0x280] sm:$0xff] }
  0xf8   : > { %928 = vmatprep.mubr.f32.mxu0 %v4462_v50  ;;  %1185 = vmatprep.mubr.f32.mxu1 %v4467_v53  ;;  %7397 = vst [vmem:[#allocation40_spill] sm:$0xff] %v4483_v31  ;;  %7398 = vst [vmem:[#allocation41_spill] sm:$0xff] %v4486_v47  ;;  %v4489_v50 = vld [vmem:[%s4163_s24 + $0x290] sm:$0xff]  ;;  %v711_v53 = vld [vmem:[#allocation6 + $0x778] sm:$0xff] }
  0xf9   : > { %1558 = vmatpush2.msra.mxu1 %v718_v58  ;;  %929 = vmatmul.mubr.f32.gmra.mxu0 %v4470_v2  ;;  %7399 = vst [vmem:[#allocation42_spill] sm:$0xff] %v4489_v50  ;;  %v583_v58 = vld [vmem:[#allocation6 + $0x378] sm:$0xff]  ;;  %v4494_v2 = vld [vmem:[%s4163_s24 + $0x2a8] sm:$0xff] }
  0xfa   : > { %1186 = vmatmul.mubr.f32.gmra.mxu1 %v4473_v63  ;;  %1302 = vmatprep.subr.mxu0 %v587_v12  ;;  %v582_v63 = vld [vmem:[#allocation6 + $0x370] sm:$0xff]  ;;  %7400 = vst [vmem:[#allocation43_spill] sm:$0xff] %v4494_v2 }
  0xfb   : > { %1559 = vmatprep.subr.mxu1 %v715_v5  ;;  %1303 = vmatpush2.msra.mxu0 %v586_v21  ;;  %v4499_v5 = vld [vmem:[%s4163_s24 + $0x2b8] sm:$0xff]  ;;  %v710_v12 = vld [vmem:[#allocation6 + $0x770] sm:$0xff]  ;;  %v4502_v21 = vld [vmem:[%s4163_s24 + $0x2a0] sm:$0xff] }
  0xfc   : > { %934 = vmatprep.mubr.f32.mxu0 %v4478_v26  ;;  %1191 = vmatprep.mubr.f32.mxu1 %v4483_v31  ;;  %7401 = vst [vmem:[#allocation44_spill] sm:$0xff] %v4499_v5  ;;  %7402 = vst [vmem:[#allocation45_spill] sm:$0xff] %v4502_v21  ;;  %v4505_v26 = vld [vmem:[%s4163_s24 + $0x2b0] sm:$0xff]  ;;  %v707_v31 = vld [vmem:[#allocation6 + $0x758] sm:$0xff] }
  0xfd   : > { %1560 = vmatpush2.msra.mxu1 %v714_v42  ;;  %935 = vmatmul.mubr.f32.gmra.mxu0 %v4486_v47  ;;  %7403 = vst [vmem:[#allocation46_spill] sm:$0xff] %v4505_v26  ;;  %v579_v42 = vld [vmem:[#allocation6 + $0x358] sm:$0xff]  ;;  %v4510_v47 = vld [vmem:[%s4163_s24 + $0x2c8] sm:$0xff] }
  0xfe   : > { %1192 = vmatmul.mubr.f32.gmra.mxu1 %v4489_v50  ;;  %1304 = vmatprep.subr.mxu0 %v583_v58  ;;  %v578_v50 = vld [vmem:[#allocation6 + $0x350] sm:$0xff]  ;;  %7404 = vst [vmem:[#allocation47_spill] sm:$0xff] %v4510_v47 }
  0xff   : > { %1561 = vmatprep.subr.mxu1 %v711_v53  ;;  %1305 = vmatpush2.msra.mxu0 %v582_v63  ;;  %v4515_v53 = vld [vmem:[%s4163_s24 + $0x2d8] sm:$0xff]  ;;  %v706_v58 = vld [vmem:[#allocation6 + $0x750] sm:$0xff]  ;;  %v4518_v63 = vld [vmem:[%s4163_s24 + $0x2c0] sm:$0xff] }
 0x100   : > { %940 = vmatprep.mubr.f32.mxu0 %v4494_v2  ;;  %1197 = vmatprep.mubr.f32.mxu1 %v4499_v5  ;;  %7405 = vst [vmem:[#allocation48_spill] sm:$0xff] %v4515_v53  ;;  %7406 = vst [vmem:[#allocation49_spill] sm:$0xff] %v4518_v63  ;;  %v4521_v2 = vld [vmem:[%s4163_s24 + $0x2d0] sm:$0xff]  ;;  %v703_v5 = vld [vmem:[#allocation6 + $0x738] sm:$0xff] }
 0x101   : > { %1562 = vmatpush2.msra.mxu1 %v710_v12  ;;  %941 = vmatmul.mubr.f32.gmra.mxu0 %v4502_v21  ;;  %7407 = vst [vmem:[#allocation50_spill] sm:$0xff] %v4521_v2  ;;  %v575_v12 = vld [vmem:[#allocation6 + $0x338] sm:$0xff]  ;;  %v4526_v21 = vld [vmem:[%s4163_s24 + $0x2e8] sm:$0xff] }
 0x102   : > { %1198 = vmatmul.mubr.f32.gmra.mxu1 %v4505_v26  ;;  %1306 = vmatprep.subr.mxu0 %v579_v42  ;;  %v574_v26 = vld [vmem:[#allocation6 + $0x330] sm:$0xff]  ;;  %7408 = vst [vmem:[#allocation51_spill] sm:$0xff] %v4526_v21 }
 0x103   : > { %1563 = vmatprep.subr.mxu1 %v707_v31  ;;  %1307 = vmatpush2.msra.mxu0 %v578_v50  ;;  %v4531_v31 = vld [vmem:[%s4163_s24 + $0x2f8] sm:$0xff]  ;;  %v702_v42 = vld [vmem:[#allocation6 + $0x730] sm:$0xff]  ;;  %v4534_v50 = vld [vmem:[%s4163_s24 + $0x2e0] sm:$0xff] }
 0x104   : > { %946 = vmatprep.mubr.f32.mxu0 %v4510_v47  ;;  %1203 = vmatprep.mubr.f32.mxu1 %v4515_v53  ;;  %7409 = vst [vmem:[#allocation52_spill] sm:$0xff] %v4531_v31  ;;  %7410 = vst [vmem:[#allocation53_spill] sm:$0xff] %v4534_v50  ;;  %v4537_v47 = vld [vmem:[%s4163_s24 + $0x2f0] sm:$0xff]  ;;  %v699_v53 = vld [vmem:[#allocation6 + $0x718] sm:$0xff] }
 0x105   : > { %1564 = vmatpush2.msra.mxu1 %v706_v58  ;;  %947 = vmatmul.mubr.f32.gmra.mxu0 %v4518_v63  ;;  %7411 = vst [vmem:[#allocation54_spill] sm:$0xff] %v4537_v47  ;;  %v571_v58 = vld [vmem:[#allocation6 + $0x318] sm:$0xff]  ;;  %v4542_v63 = vld [vmem:[%s4163_s24 + $0x308] sm:$0xff] }
 0x106   : > { %1204 = vmatmul.mubr.f32.gmra.mxu1 %v4521_v2  ;;  %1308 = vmatprep.subr.mxu0 %v575_v12  ;;  %v570_v2 = vld [vmem:[#allocation6 + $0x310] sm:$0xff]  ;;  %7412 = vst [vmem:[#allocation55_spill] sm:$0xff] %v4542_v63 }
 0x107   : > { %1565 = vmatprep.subr.mxu1 %v703_v5  ;;  %1309 = vmatpush2.msra.mxu0 %v574_v26  ;;  %v4547_v5 = vld [vmem:[%s4163_s24 + $0x318] sm:$0xff]  ;;  %v698_v12 = vld [vmem:[#allocation6 + $0x710] sm:$0xff]  ;;  %v4550_v26 = vld [vmem:[%s4163_s24 + $0x300] sm:$0xff] }
 0x108   : > { %952 = vmatprep.mubr.f32.mxu0 %v4526_v21  ;;  %1209 = vmatprep.mubr.f32.mxu1 %v4531_v31  ;;  %7413 = vst [vmem:[#allocation56_spill] sm:$0xff] %v4547_v5  ;;  %7414 = vst [vmem:[#allocation57_spill] sm:$0xff] %v4550_v26  ;;  %v4553_v21 = vld [vmem:[%s4163_s24 + $0x310] sm:$0xff]  ;;  %v695_v31 = vld [vmem:[#allocation6 + $0x6f8] sm:$0xff] }
 0x109   : > { %1566 = vmatpush2.msra.mxu1 %v702_v42  ;;  %953 = vmatmul.mubr.f32.gmra.mxu0 %v4534_v50  ;;  %7415 = vst [vmem:[#allocation58_spill] sm:$0xff] %v4553_v21  ;;  %v567_v42 = vld [vmem:[#allocation6 + $0x2f8] sm:$0xff]  ;;  %v4558_v50 = vld [vmem:[%s4163_s24 + $0x328] sm:$0xff] }
 0x10a   : > { %1210 = vmatmul.mubr.f32.gmra.mxu1 %v4537_v47  ;;  %1310 = vmatprep.subr.mxu0 %v571_v58  ;;  %v566_v47 = vld [vmem:[#allocation6 + $0x2f0] sm:$0xff]  ;;  %7416 = vst [vmem:[#allocation59_spill] sm:$0xff] %v4558_v50 }
 0x10b   : > { %1567 = vmatprep.subr.mxu1 %v699_v53  ;;  %1311 = vmatpush2.msra.mxu0 %v570_v2  ;;  %v4563_v53 = vld [vmem:[%s4163_s24 + $0x338] sm:$0xff]  ;;  %v694_v58 = vld [vmem:[#allocation6 + $0x6f0] sm:$0xff]  ;;  %v4566_v2 = vld [vmem:[%s4163_s24 + $0x320] sm:$0xff] }
 0x10c   : > { %958 = vmatprep.mubr.f32.mxu0 %v4542_v63  ;;  %1215 = vmatprep.mubr.f32.mxu1 %v4547_v5  ;;  %7417 = vst [vmem:[#allocation60_spill] sm:$0xff] %v4563_v53  ;;  %7418 = vst [vmem:[#allocation61_spill] sm:$0xff] %v4566_v2  ;;  %v4569_v63 = vld [vmem:[%s4163_s24 + $0x330] sm:$0xff]  ;;  %v691_v5 = vld [vmem:[#allocation6 + $0x6d8] sm:$0xff] }
 0x10d   : > { %1568 = vmatpush2.msra.mxu1 %v698_v12  ;;  %959 = vmatmul.mubr.f32.gmra.mxu0 %v4550_v26  ;;  %7419 = vst [vmem:[#allocation62_spill] sm:$0xff] %v4569_v63  ;;  %v563_v12 = vld [vmem:[#allocation6 + $0x2d8] sm:$0xff]  ;;  %v4574_v26 = vld [vmem:[%s4163_s24 + $0x348] sm:$0xff] }
 0x10e   : > { %1216 = vmatmul.mubr.f32.gmra.mxu1 %v4553_v21  ;;  %1312 = vmatprep.subr.mxu0 %v567_v42  ;;  %v562_v21 = vld [vmem:[#allocation6 + $0x2d0] sm:$0xff]  ;;  %7420 = vst [vmem:[#allocation63_spill] sm:$0xff] %v4574_v26 }
 0x10f   : > { %1569 = vmatprep.subr.mxu1 %v695_v31  ;;  %1313 = vmatpush2.msra.mxu0 %v566_v47  ;;  %v4579_v31 = vld [vmem:[%s4163_s24 + $0x358] sm:$0xff]  ;;  %v690_v42 = vld [vmem:[#allocation6 + $0x6d0] sm:$0xff]  ;;  %v4582_v47 = vld [vmem:[%s4163_s24 + $0x340] sm:$0xff] }
 0x110   : > { %964 = vmatprep.mubr.f32.mxu0 %v4558_v50  ;;  %1221 = vmatprep.mubr.f32.mxu1 %v4563_v53  ;;  %7421 = vst [vmem:[#allocation64_spill] sm:$0xff] %v4579_v31  ;;  %7422 = vst [vmem:[#allocation65_spill] sm:$0xff] %v4582_v47  ;;  %v4585_v50 = vld [vmem:[%s4163_s24 + $0x350] sm:$0xff]  ;;  %v687_v53 = vld [vmem:[#allocation6 + $0x6b8] sm:$0xff] }
 0x111   : > { %1570 = vmatpush2.msra.mxu1 %v694_v58  ;;  %965 = vmatmul.mubr.f32.gmra.mxu0 %v4566_v2  ;;  %7423 = vst [vmem:[#allocation66_spill] sm:$0xff] %v4585_v50  ;;  %v559_v58 = vld [vmem:[#allocation6 + $0x2b8] sm:$0xff]  ;;  %v4590_v2 = vld [vmem:[%s4163_s24 + $0x368] sm:$0xff] }
 0x112   : > { %1222 = vmatmul.mubr.f32.gmra.mxu1 %v4569_v63  ;;  %1314 = vmatprep.subr.mxu0 %v563_v12  ;;  %v558_v63 = vld [vmem:[#allocation6 + $0x2b0] sm:$0xff]  ;;  %7424 = vst [vmem:[#allocation67_spill] sm:$0xff] %v4590_v2 }
 0x113   : > { %1571 = vmatprep.subr.mxu1 %v691_v5  ;;  %1315 = vmatpush2.msra.mxu0 %v562_v21  ;;  %v4595_v5 = vld [vmem:[%s4163_s24 + $0x378] sm:$0xff]  ;;  %v686_v12 = vld [vmem:[#allocation6 + $0x6b0] sm:$0xff]  ;;  %v4598_v21 = vld [vmem:[%s4163_s24 + $0x360] sm:$0xff] }
 0x114   : > { %970 = vmatprep.mubr.f32.mxu0 %v4574_v26  ;;  %1227 = vmatprep.mubr.f32.mxu1 %v4579_v31  ;;  %7425 = vst [vmem:[#allocation68_spill] sm:$0xff] %v4595_v5  ;;  %7426 = vst [vmem:[#allocation69_spill] sm:$0xff] %v4598_v21  ;;  %v4601_v26 = vld [vmem:[%s4163_s24 + $0x370] sm:$0xff]  ;;  %v683_v31 = vld [vmem:[#allocation6 + $0x698] sm:$0xff] }
 0x115   : > { %1572 = vmatpush2.msra.mxu1 %v690_v42  ;;  %971 = vmatmul.mubr.f32.gmra.mxu0 %v4582_v47  ;;  %7427 = vst [vmem:[#allocation70_spill] sm:$0xff] %v4601_v26  ;;  %v555_v42 = vld [vmem:[#allocation6 + $0x298] sm:$0xff]  ;;  %v4606_v47 = vld [vmem:[%s4163_s24 + $0x388] sm:$0xff] }
 0x116   : > { %1228 = vmatmul.mubr.f32.gmra.mxu1 %v4585_v50  ;;  %1316 = vmatprep.subr.mxu0 %v559_v58  ;;  %v554_v50 = vld [vmem:[#allocation6 + $0x290] sm:$0xff]  ;;  %7428 = vst [vmem:[#allocation71_spill] sm:$0xff] %v4606_v47 }
 0x117   : > { %1573 = vmatprep.subr.mxu1 %v687_v53  ;;  %1317 = vmatpush2.msra.mxu0 %v558_v63  ;;  %v4611_v53 = vld [vmem:[%s4163_s24 + $0x398] sm:$0xff]  ;;  %v682_v58 = vld [vmem:[#allocation6 + $0x690] sm:$0xff]  ;;  %v4614_v63 = vld [vmem:[%s4163_s24 + $0x380] sm:$0xff] }
 0x118   : > { %976 = vmatprep.mubr.f32.mxu0 %v4590_v2  ;;  %1233 = vmatprep.mubr.f32.mxu1 %v4595_v5  ;;  %7429 = vst [vmem:[#allocation72_spill] sm:$0xff] %v4611_v53  ;;  %7430 = vst [vmem:[#allocation73_spill] sm:$0xff] %v4614_v63  ;;  %v4617_v2 = vld [vmem:[%s4163_s24 + $0x390] sm:$0xff]  ;;  %v679_v5 = vld [vmem:[#allocation6 + $0x678] sm:$0xff] }
 0x119   : > { %1574 = vmatpush2.msra.mxu1 %v686_v12  ;;  %977 = vmatmul.mubr.f32.gmra.mxu0 %v4598_v21  ;;  %7431 = vst [vmem:[#allocation74_spill] sm:$0xff] %v4617_v2  ;;  %v551_v12 = vld [vmem:[#allocation6 + $0x278] sm:$0xff]  ;;  %v4622_v21 = vld [vmem:[%s4163_s24 + $0x3a8] sm:$0xff] }
 0x11a   : > { %1234 = vmatmul.mubr.f32.gmra.mxu1 %v4601_v26  ;;  %1318 = vmatprep.subr.mxu0 %v555_v42  ;;  %v550_v26 = vld [vmem:[#allocation6 + $0x270] sm:$0xff]  ;;  %7432 = vst [vmem:[#allocation75_spill] sm:$0xff] %v4622_v21 }
 0x11b   : > { %1575 = vmatprep.subr.mxu1 %v683_v31  ;;  %1319 = vmatpush2.msra.mxu0 %v554_v50  ;;  %v4627_v31 = vld [vmem:[%s4163_s24 + $0x3b8] sm:$0xff]  ;;  %v678_v42 = vld [vmem:[#allocation6 + $0x670] sm:$0xff]  ;;  %v4630_v50 = vld [vmem:[%s4163_s24 + $0x3a0] sm:$0xff] }
 0x11c   : > { %982 = vmatprep.mubr.f32.mxu0 %v4606_v47  ;;  %1239 = vmatprep.mubr.f32.mxu1 %v4611_v53  ;;  %7433 = vst [vmem:[#allocation76_spill] sm:$0xff] %v4627_v31  ;;  %7434 = vst [vmem:[#allocation77_spill] sm:$0xff] %v4630_v50  ;;  %v4633_v47 = vld [vmem:[%s4163_s24 + $0x3b0] sm:$0xff]  ;;  %v675_v53 = vld [vmem:[#allocation6 + $0x658] sm:$0xff] }
 0x11d   : > { %1576 = vmatpush2.msra.mxu1 %v682_v58  ;;  %983 = vmatmul.mubr.f32.gmra.mxu0 %v4614_v63  ;;  %7435 = vst [vmem:[#allocation78_spill] sm:$0xff] %v4633_v47  ;;  %v547_v58 = vld [vmem:[#allocation6 + $0x258] sm:$0xff]  ;;  %v4638_v63 = vld [vmem:[%s4163_s24 + $0x3c8] sm:$0xff] }
 0x11e   : > { %1240 = vmatmul.mubr.f32.gmra.mxu1 %v4617_v2  ;;  %1320 = vmatprep.subr.mxu0 %v551_v12  ;;  %v546_v2 = vld [vmem:[#allocation6 + $0x250] sm:$0xff]  ;;  %7436 = vst [vmem:[#allocation79_spill] sm:$0xff] %v4638_v63 }
 0x11f   : > { %1577 = vmatprep.subr.mxu1 %v679_v5  ;;  %1321 = vmatpush2.msra.mxu0 %v550_v26  ;;  %v4643_v5 = vld [vmem:[%s4163_s24 + $0x3d8] sm:$0xff]  ;;  %v674_v12 = vld [vmem:[#allocation6 + $0x650] sm:$0xff]  ;;  %v4646_v26 = vld [vmem:[%s4163_s24 + $0x3c0] sm:$0xff] }
 0x120   : > { %988 = vmatprep.mubr.f32.mxu0 %v4622_v21  ;;  %1245 = vmatprep.mubr.f32.mxu1 %v4627_v31  ;;  %7437 = vst [vmem:[#allocation80_spill] sm:$0xff] %v4643_v5  ;;  %7438 = vst [vmem:[#allocation81_spill] sm:$0xff] %v4646_v26  ;;  %v4649_v21 = vld [vmem:[%s4163_s24 + $0x3d0] sm:$0xff]  ;;  %v671_v31 = vld [vmem:[#allocation6 + $0x638] sm:$0xff] }
 0x121   : > { %1578 = vmatpush2.msra.mxu1 %v678_v42  ;;  %989 = vmatmul.mubr.f32.gmra.mxu0 %v4630_v50  ;;  %7439 = vst [vmem:[#allocation82_spill] sm:$0xff] %v4649_v21  ;;  %v543_v42 = vld [vmem:[#allocation6 + $0x238] sm:$0xff]  ;;  %v4654_v50 = vld [vmem:[%s4163_s24 + $0x3e8] sm:$0xff] }
 0x122   : > { %1246 = vmatmul.mubr.f32.gmra.mxu1 %v4633_v47  ;;  %1322 = vmatprep.subr.mxu0 %v547_v58  ;;  %v542_v47 = vld [vmem:[#allocation6 + $0x230] sm:$0xff]  ;;  %7440 = vst [vmem:[#allocation83_spill] sm:$0xff] %v4654_v50 }
 0x123   : > { %1579 = vmatprep.subr.mxu1 %v675_v53  ;;  %1323 = vmatpush2.msra.mxu0 %v546_v2  ;;  %v4659_v53 = vld [vmem:[%s4163_s24 + $0x3f8] sm:$0xff]  ;;  %v670_v58 = vld [vmem:[#allocation6 + $0x630] sm:$0xff]  ;;  %v4662_v2 = vld [vmem:[%s4163_s24 + $0x3e0] sm:$0xff] }
 0x124   : > { %994 = vmatprep.mubr.f32.mxu0 %v4638_v63  ;;  %1251 = vmatprep.mubr.f32.mxu1 %v4643_v5  ;;  %7441 = vst [vmem:[#allocation84_spill] sm:$0xff] %v4659_v53  ;;  %7442 = vst [vmem:[#allocation85_spill] sm:$0xff] %v4662_v2  ;;  %v4665_v63 = vld [vmem:[%s4163_s24 + $0x3f0] sm:$0xff]  ;;  %v667_v5 = vld [vmem:[#allocation6 + $0x618] sm:$0xff] }
 0x125   : > { %1580 = vmatpush2.msra.mxu1 %v674_v12  ;;  %995 = vmatmul.mubr.f32.gmra.mxu0 %v4646_v26  ;;  %v539_v12 = vld [vmem:[#allocation6 + $0x218] sm:$0xff]  ;;  %v3779_v26 = vld [vmem:[%s4163_s24] sm:$0xff] }
 0x126   : > { %1252 = vmatmul.mubr.f32.gmra.mxu1 %v4649_v21  ;;  %1324 = vmatprep.subr.mxu0 %v543_v42  ;;  %v538_v21 = vld [vmem:[#allocation6 + $0x210] sm:$0xff]  ;;  %v3778_v42 = vld [vmem:[%s4163_s24 + $0x18] sm:$0xff] }
 0x127   : > { %1581 = vmatprep.subr.mxu1 %v671_v31  ;;  %1325 = vmatpush2.msra.mxu0 %v542_v47  ;;  %v666_v31 = vld [vmem:[#allocation6 + $0x610] sm:$0xff]  ;;  %v3777_v47 = vld [vmem:[%s4163_s24 + $0x8] sm:$0xff] }
 0x128   : > { %1000 = vmatprep.mubr.f32.mxu0 %v4654_v50  ;;  %1257 = vmatprep.mubr.f32.mxu1 %v4659_v53  ;;  %v1967_v50 = vld [vmem:[#allocation8 + $0x1e8] sm:$0xff] }
 0x129   : > { %1582 = vmatpush2.msra.mxu1 %v670_v58  ;;  %1001 = vmatmul.mubr.f32.gmra.mxu0 %v4662_v2  ;;  %v2095_v53 = vld [vmem:[#allocation8 + $0x5e8] sm:$0xff]  ;;  %v3780_v58 = vld [vmem:[%s4163_s24 + $0x10] sm:$0xff]  ;;  %v1966_v2 = vld [vmem:[#allocation8 + $0x1e0] sm:$0xff] }
 0x12a   : > { %1258 = vmatmul.mubr.f32.gmra.mxu1 %v4665_v63  ;;  %1326 = vmatprep.subr.mxu0 %v539_v12  ;;  %v3781_v12 = vld [vmem:[%s4163_s24 + $0x20] sm:$0xff] }
 0x12b   : > { %1583 = vmatprep.subr.mxu1 %v667_v5  ;;  %1327 = vmatpush2.msra.mxu0 %v538_v21  ;;  %v1963_v21 = vld [vmem:[#allocation8 + $0x1c8] sm:$0xff] }
 0x12c   : > { %1328 = vmatprep.mubr.f32.mxu0 %v3777_v47  ;;  %1584 = vmatpush2.msra.mxu1 %v666_v31  ;;  %v2091_v5 = vld [vmem:[#allocation8 + $0x5c8] sm:$0xff]  ;;  %v3782_v31 = vld [vmem:[%s4163_s24 + $0x30] sm:$0xff]  ;;  %v1962_v47 = vld [vmem:[#allocation8 + $0x1c0] sm:$0xff]  ;;  %s3971_s24 = smov [#allocation11]  }
 0x12d   : > { %1585 = vmatprep.mubr.f32.mxu1 %v3778_v42  ;;  %1329 = vmatmul.mubr.f32.vlgmr.msra.gmra.mxu0 %v3779_v26  ;;  %v2090_v26 = vld [vmem:[#allocation8 + $0x5c0] sm:$0xff]  ;;  %v7445_v42 = vld [vmem:[#allocation18_spill] sm:$0xff]  ;;  %s3893_s6 = sshll.u32 %s3971_s24, 4  ;;  %s3894_s6 = int_to_ptr.vmem [resolvable:$false] %s3893_s6 }
 0x12e   : > { %1586 = vmatmul.mubr.f32.vlgmr.msra.gmra.mxu1 %v3780_v58  ;;  %1334 = vmatprep.mubr.f32.mxu0 %v4182_v8  ;;  %v1959_v8 = vld [vmem:[#allocation8 + $0x1a8] sm:$0xff]  ;;  %v1910_v58 = vld [vmem:[#allocation8 + $0x20] sm:$0xff]  ;;  %s3895_s8 = scalar_lea.vmem %s3894_s6, 64  ;;  %p3896_p13 = scmp.lt.s32.totalorder %s3565_s21, %s3894_s6 }
 0x12f   : > { %1591 = vmatprep.mubr.f32.mxu1 %v4185_v9  ;;  %2184 = vmatprep.subr.mxu0 %v1967_v50  ;;  %v2087_v9 = vld [vmem:[#allocation8 + $0x5a8] sm:$0xff]  ;;  %v2086_v50 = vld [vmem:[#allocation8 + $0x5a0] sm:$0xff]  ;;  %p3897_p0 = scmp.lt.s32.totalorder %s3895_s8, %s3889_s17 }
 0x130   : > { %2441 = vmatprep.subr.mxu1 %v2095_v53  ;;  %2185 = vmatpush1.msra.mxu0 %v1966_v2  ;;  %v1954_v53 = vld [vmem:[#allocation8 + $0x180] sm:$0xff]  ;;  %v7444_v2 = vld [vmem:[#allocation17_spill] sm:$0xff] }
 0x131   : > { %2442 = vmatpush1.msra.mxu1 %v2094_v37  ;;  %1335 = vmatmul.mubr.f32.gmra.mxu0 %v3781_v12  ;;  %v1958_v37 = vld [vmem:[#allocation8 + $0x1a0] sm:$0xff]  ;;  %v7448_v12 = vld [vmem:[#allocation21_spill] sm:$0xff]  ;;  %p3898_p2 = por %p3897_p0, %p3896_p13 }
 0x132   : > { %1592 = vmatmul.mubr.f32.gmra.mxu1 %v3782_v31  ;;  %1340 = vmatprep.mubr.f32.mxu0 %v4192_v16  ;;  %v1955_v16 = vld [vmem:[#allocation8 + $0x188] sm:$0xff]  ;;  %v7449_v31 = vld [vmem:[#allocation22_spill] sm:$0xff] }
 0x133   : > { %1597 = vmatprep.mubr.f32.mxu1 %v4195_v17  ;;  %2186 = vmatprep.subr.mxu0 %v1963_v21  ;;  %v2083_v17 = vld [vmem:[#allocation8 + $0x588] sm:$0xff]  ;;  %v7446_v21 = vld [vmem:[#allocation19_spill] sm:$0xff]  ;;  %p3899_p10 = pnand %p3898_p2, %p3892_p9 }
 0x134   : > { %2443 = vmatprep.subr.mxu1 %v2091_v5  ;;  %2187 = vmatpush1.msra.mxu0 %v1962_v47  ;;  %v2035_v5 = vld [vmem:[#allocation8 + $0x408] sm:$0xff]  ;;  %v1906_v47 = vld [vmem:[#allocation8] sm:$0xff] }
 0x135   : > { %2444 = vmatpush1.msra.mxu1 %v2090_v26  ;;  %1341 = vmatmul.mubr.f32.gmra.mxu0 %v4198_v19  ;;  %v2082_v19 = vld [vmem:[#allocation8 + $0x580] sm:$0xff] }
 0x136   : > { %1598 = vmatmul.mubr.f32.gmra.mxu1 %v4201_v20  ;;  %1346 = vmatprep.mubr.f32.mxu0 %v4206_v24  ;;  %v1951_v20 = vld [vmem:[#allocation8 + $0x168] sm:$0xff]  ;;  %v2034_v26 = vld [vmem:[#allocation8 + $0x400] sm:$0xff] }
 0x137   : > { %1603 = vmatprep.mubr.f32.mxu1 %v4211_v25  ;;  %2188 = vmatprep.subr.mxu0 %v1959_v8  ;;  %v2079_v24 = vld [vmem:[#allocation8 + $0x568] sm:$0xff]  ;;  %v1950_v25 = vld [vmem:[#allocation8 + $0x160] sm:$0xff] }
 0x138   : > { %2445 = vmatprep.subr.mxu1 %v2087_v9  ;;  %2189 = vmatpush1.msra.mxu0 %v1958_v37  ;;  %v7450_v8 = vld [vmem:[#allocation23_spill] sm:$0xff]  ;;  %v7451_v9 = vld [vmem:[#allocation24_spill] sm:$0xff] }
 0x139   : > { %2446 = vmatpush1.msra.mxu1 %v2086_v50  ;;  %1347 = vmatmul.mubr.f32.gmra.mxu0 %v4214_v27  ;;  %v2078_v27 = vld [vmem:[#allocation8 + $0x560] sm:$0xff]  ;;  %v2031_v37 = vld [vmem:[#allocation8 + $0x3e8] sm:$0xff] }
 0x13a   : > { %1604 = vmatmul.mubr.f32.gmra.mxu1 %v4217_v28  ;;  %1352 = vmatprep.mubr.f32.mxu0 %v4222_v32  ;;  %v1947_v28 = vld [vmem:[#allocation8 + $0x148] sm:$0xff] }
 0x13b   : > { %1609 = vmatprep.mubr.f32.mxu1 %v4227_v33  ;;  %2190 = vmatprep.subr.mxu0 %v1955_v16  ;;  %v2075_v32 = vld [vmem:[#allocation8 + $0x548] sm:$0xff]  ;;  %v1946_v33 = vld [vmem:[#allocation8 + $0x140] sm:$0xff] }
 0x13c   : > { %2447 = vmatprep.subr.mxu1 %v2083_v17  ;;  %2191 = vmatpush1.msra.mxu0 %v1954_v53  ;;  %v2159_v50 = vld [vmem:[#allocation8 + $0x7e8] sm:$0xff]  ;;  %v7452_v53 = vld [vmem:[#allocation25_spill] sm:$0xff] }
 0x13d   : > { %2448 = vmatpush1.msra.mxu1 %v2082_v19  ;;  %1353 = vmatmul.mubr.f32.gmra.mxu0 %v4230_v35  ;;  %v2074_v35 = vld [vmem:[#allocation8 + $0x540] sm:$0xff]  ;;  %v7453_v19 = vld [vmem:[#allocation26_spill] sm:$0xff] }
 0x13e   : > { %1610 = vmatmul.mubr.f32.gmra.mxu1 %v4233_v36  ;;  %1358 = vmatprep.mubr.f32.mxu0 %v4238_v40  ;;  %v1943_v36 = vld [vmem:[#allocation8 + $0x128] sm:$0xff] }
 0x13f   : > { %1615 = vmatprep.mubr.f32.mxu1 %v4243_v41  ;;  %2192 = vmatprep.subr.mxu0 %v1951_v20  ;;  %v2071_v40 = vld [vmem:[#allocation8 + $0x528] sm:$0xff]  ;;  %v1942_v41 = vld [vmem:[#allocation8 + $0x120] sm:$0xff] }
 0x140   : > { %2449 = vmatprep.subr.mxu1 %v2079_v24  ;;  %2193 = vmatpush1.msra.mxu0 %v1950_v25  ;;  %v2030_v20 = vld [vmem:[#allocation8 + $0x3e0] sm:$0xff] }
 0x141   : > { %2450 = vmatpush1.msra.mxu1 %v2078_v27  ;;  %1359 = vmatmul.mubr.f32.gmra.mxu0 %v4246_v43  ;;  %v2070_v43 = vld [vmem:[#allocation8 + $0x520] sm:$0xff]  ;;  %v7455_v27 = vld [vmem:[#allocation28_spill] sm:$0xff] }
 0x142   : > { %1616 = vmatmul.mubr.f32.gmra.mxu1 %v4249_v44  ;;  %1364 = vmatprep.mubr.f32.mxu0 %v4254_v48  ;;  %v1939_v44 = vld [vmem:[#allocation8 + $0x108] sm:$0xff]  ;;  %v2158_v24 = vld [vmem:[#allocation8 + $0x7e0] sm:$0xff] }
 0x143   : > { %1621 = vmatprep.mubr.f32.mxu1 %v4259_v49  ;;  %2194 = vmatprep.subr.mxu0 %v1947_v28  ;;  %v2067_v48 = vld [vmem:[#allocation8 + $0x508] sm:$0xff]  ;;  %v1938_v49 = vld [vmem:[#allocation8 + $0x100] sm:$0xff] }
 0x144   : > { %2451 = vmatprep.subr.mxu1 %v2075_v32  ;;  %2195 = vmatpush1.msra.mxu0 %v1946_v33  ;;  %v7454_v25 = vld [vmem:[#allocation27_spill] sm:$0xff]  ;;  %v2027_v33 = vld [vmem:[#allocation8 + $0x3c8] sm:$0xff] }
 0x145   : > { %2452 = vmatpush1.msra.mxu1 %v2074_v35  ;;  %1365 = vmatmul.mubr.f32.gmra.mxu0 %v4262_v51  ;;  %v2066_v51 = vld [vmem:[#allocation8 + $0x500] sm:$0xff]  ;;  %v2155_v35 = vld [vmem:[#allocation8 + $0x7c8] sm:$0xff] }
 0x146   : > { %1622 = vmatmul.mubr.f32.gmra.mxu1 %v4265_v52  ;;  %1370 = vmatprep.mubr.f32.mxu0 %v4270_v56  ;;  %v1935_v52 = vld [vmem:[#allocation8 + $0xe8] sm:$0xff] }
 0x147   : > { %1627 = vmatprep.mubr.f32.mxu1 %v4275_v57  ;;  %2196 = vmatprep.subr.mxu0 %v1943_v36  ;;  %v2063_v56 = vld [vmem:[#allocation8 + $0x4e8] sm:$0xff]  ;;  %v1934_v57 = vld [vmem:[#allocation8 + $0xe0] sm:$0xff] }
 0x148   : > { %2453 = vmatprep.subr.mxu1 %v2071_v40  ;;  %2197 = vmatpush1.msra.mxu0 %v1942_v41  ;;  %v7456_v41 = vld [vmem:[#allocation29_spill] sm:$0xff] }
 0x149   : > { %2454 = vmatpush1.msra.mxu1 %v2070_v43  ;;  %1371 = vmatmul.mubr.f32.gmra.mxu0 %v4278_v59  ;;  %v2062_v59 = vld [vmem:[#allocation8 + $0x4e0] sm:$0xff]  ;;  %v7457_v43 = vld [vmem:[#allocation30_spill] sm:$0xff] }
 0x14a   : > { %1628 = vmatmul.mubr.f32.gmra.mxu1 %v4281_v60  ;;  %1376 = vmatprep.mubr.f32.mxu0 %v4286_v0  ;;  %v1931_v60 = vld [vmem:[#allocation8 + $0xc8] sm:$0xff] }
 0x14b   : > { %1633 = vmatprep.mubr.f32.mxu1 %v4291_v1  ;;  %2198 = vmatprep.subr.mxu0 %v1939_v44  ;;  %v2059_v0 = vld [vmem:[#allocation8 + $0x4c8] sm:$0xff]  ;;  %v1930_v1 = vld [vmem:[#allocation8 + $0xc0] sm:$0xff] }
 0x14c   : > { %2455 = vmatprep.subr.mxu1 %v2067_v48  ;;  %2199 = vmatpush1.msra.mxu0 %v1938_v49  ;;  %v2026_v44 = vld [vmem:[#allocation8 + $0x3c0] sm:$0xff] }
 0x14d   : > { %2456 = vmatpush1.msra.mxu1 %v2066_v51  ;;  %1377 = vmatmul.mubr.f32.gmra.mxu0 %v4294_v3  ;;  %v2058_v3 = vld [vmem:[#allocation8 + $0x4c0] sm:$0xff]  ;;  %v7459_v51 = vld [vmem:[#allocation32_spill] sm:$0xff] }
 0x14e   : > { %1634 = vmatmul.mubr.f32.gmra.mxu1 %v4297_v4  ;;  %1382 = vmatprep.mubr.f32.mxu0 %v4302_v10  ;;  %v1927_v4 = vld [vmem:[#allocation8 + $0xa8] sm:$0xff]  ;;  %v2154_v48 = vld [vmem:[#allocation8 + $0x7c0] sm:$0xff] }
 0x14f   : > { %1639 = vmatprep.mubr.f32.mxu1 %v4307_v11  ;;  %2200 = vmatprep.subr.mxu0 %v1935_v52  ;;  %v2055_v10 = vld [vmem:[#allocation8 + $0x4a8] sm:$0xff]  ;;  %v1926_v11 = vld [vmem:[#allocation8 + $0xa0] sm:$0xff] }
 0x150   : > { %2457 = vmatprep.subr.mxu1 %v2063_v56  ;;  %2201 = vmatpush1.msra.mxu0 %v1934_v57  ;;  %v7458_v49 = vld [vmem:[#allocation31_spill] sm:$0xff]  ;;  %v2023_v57 = vld [vmem:[#allocation8 + $0x3a8] sm:$0xff] }
 0x151   : > { %2458 = vmatpush1.msra.mxu1 %v2062_v59  ;;  %1383 = vmatmul.mubr.f32.gmra.mxu0 %v4310_v13  ;;  %v2054_v13 = vld [vmem:[#allocation8 + $0x4a0] sm:$0xff]  ;;  %v2151_v59 = vld [vmem:[#allocation8 + $0x7a8] sm:$0xff] }
 0x152   : > { %1640 = vmatmul.mubr.f32.gmra.mxu1 %v4313_v14  ;;  %1388 = vmatprep.mubr.f32.mxu0 %v4318_v22  ;;  %v1923_v14 = vld [vmem:[#allocation8 + $0x88] sm:$0xff] }
 0x153   : > { %1645 = vmatprep.mubr.f32.mxu1 %v4323_v23  ;;  %2202 = vmatprep.subr.mxu0 %v1931_v60  ;;  %v2051_v22 = vld [vmem:[#allocation8 + $0x488] sm:$0xff]  ;;  %v1922_v23 = vld [vmem:[#allocation8 + $0x80] sm:$0xff] }
 0x154   : > { %2459 = vmatprep.subr.mxu1 %v2059_v0  ;;  %2203 = vmatpush1.msra.mxu0 %v1930_v1  ;;  %v7460_v1 = vld [vmem:[#allocation33_spill] sm:$0xff] }
 0x155   : > { %2460 = vmatpush1.msra.mxu1 %v2058_v3  ;;  %1389 = vmatmul.mubr.f32.gmra.mxu0 %v4326_v29  ;;  %v2050_v29 = vld [vmem:[#allocation8 + $0x480] sm:$0xff]  ;;  %v7461_v3 = vld [vmem:[#allocation34_spill] sm:$0xff] }
 0x156   : > { %1646 = vmatmul.mubr.f32.gmra.mxu1 %v4329_v30  ;;  %1394 = vmatprep.mubr.f32.mxu0 %v4334_v38  ;;  %v1919_v30 = vld [vmem:[#allocation8 + $0x68] sm:$0xff] }
 0x157   : > { %1651 = vmatprep.mubr.f32.mxu1 %v4339_v39  ;;  %2204 = vmatprep.subr.mxu0 %v1927_v4  ;;  %v2047_v38 = vld [vmem:[#allocation8 + $0x468] sm:$0xff]  ;;  %v1918_v39 = vld [vmem:[#allocation8 + $0x60] sm:$0xff] }
 0x158   : > { %2461 = vmatprep.subr.mxu1 %v2055_v10  ;;  %2205 = vmatpush1.msra.mxu0 %v1926_v11  ;;  %v2022_v4 = vld [vmem:[#allocation8 + $0x3a0] sm:$0xff] }
 0x159   : > { %2462 = vmatpush1.msra.mxu1 %v2054_v13  ;;  %1395 = vmatmul.mubr.f32.gmra.mxu0 %v4342_v45  ;;  %v2046_v45 = vld [vmem:[#allocation8 + $0x460] sm:$0xff]  ;;  %v7463_v13 = vld [vmem:[#allocation36_spill] sm:$0xff] }
 0x15a   : > { %1652 = vmatmul.mubr.f32.gmra.mxu1 %v4345_v46  ;;  %1400 = vmatprep.mubr.f32.mxu0 %v4350_v54  ;;  %v1915_v46 = vld [vmem:[#allocation8 + $0x48] sm:$0xff]  ;;  %v2150_v10 = vld [vmem:[#allocation8 + $0x7a0] sm:$0xff] }
 0x15b   : > { %1657 = vmatprep.mubr.f32.mxu1 %v4355_v55  ;;  %2206 = vmatprep.subr.mxu0 %v1923_v14  ;;  %v2043_v54 = vld [vmem:[#allocation8 + $0x448] sm:$0xff]  ;;  %v1914_v55 = vld [vmem:[#allocation8 + $0x40] sm:$0xff] }
 0x15c   : > { %2463 = vmatprep.subr.mxu1 %v2051_v22  ;;  %2207 = vmatpush1.msra.mxu0 %v1922_v23  ;;  %v7462_v11 = vld [vmem:[#allocation35_spill] sm:$0xff]  ;;  %v2019_v23 = vld [vmem:[#allocation8 + $0x388] sm:$0xff] }
 0x15d   : > { %2464 = vmatpush1.msra.mxu1 %v2050_v29  ;;  %1401 = vmatmul.mubr.f32.gmra.mxu0 %v4358_v61  ;;  %v2042_v61 = vld [vmem:[#allocation8 + $0x440] sm:$0xff]  ;;  %v2147_v29 = vld [vmem:[#allocation8 + $0x788] sm:$0xff] }
 0x15e   : > { %1658 = vmatmul.mubr.f32.gmra.mxu1 %v4361_v62  ;;  %1406 = vmatprep.mubr.f32.mxu0 %v4366_v6  ;;  %v7443_v62 = vld [vmem:[#allocation16_spill] sm:$0xff] }
 0x15f   : > { %1663 = vmatprep.mubr.f32.mxu1 %v4371_v7  ;;  %2208 = vmatprep.subr.mxu0 %v1919_v30  ;;  %v1911_v6 = vld [vmem:[#allocation8 + $0x28] sm:$0xff] }
 0x160   : > { %2465 = vmatprep.subr.mxu1 %v2047_v38  ;;  %2209 = vmatpush1.msra.mxu0 %v1918_v39  ;;  %v2039_v7 = vld [vmem:[#allocation8 + $0x428] sm:$0xff]  ;;  %v7464_v39 = vld [vmem:[#allocation37_spill] sm:$0xff] }
 0x161   : > { %2466 = vmatpush1.msra.mxu1 %v2046_v45  ;;  %1407 = vmatmul.mubr.f32.gmra.mxu0 %v4374_v15  ;;  %v2038_v15 = vld [vmem:[#allocation8 + $0x420] sm:$0xff]  ;;  %v7465_v45 = vld [vmem:[#allocation38_spill] sm:$0xff] }
 0x162   : > { %1664 = vmatmul.mubr.f32.gmra.mxu1 %v4377_v18  ;;  %1412 = vmatprep.mubr.f32.mxu0 %v4382_v34  ;;  %v7447_v18 = vld [vmem:[#allocation20_spill] sm:$0xff] }
 0x163   : > { %1669 = vmatprep.mubr.f32.mxu1 %v7443_v62  ;;  %2210 = vmatprep.subr.mxu0 %v1915_v46  ;;  %v1907_v34 = vld [vmem:[#allocation8 + $0x8] sm:$0xff]  ;;  %v2018_v46 = vld [vmem:[#allocation8 + $0x380] sm:$0xff] }
 0x164   : > { %2467 = vmatprep.subr.mxu1 %v2043_v54  ;;  %2211 = vmatpush1.msra.mxu0 %v1914_v55  ;;  %v2146_v54 = vld [vmem:[#allocation8 + $0x780] sm:$0xff] }
 0x165   : > { %2468 = vmatpush1.msra.mxu1 %v2042_v61  ;;  %1413 = vmatmul.mubr.f32.gmra.mxu0 %v7444_v2  ;;  %v7466_v55 = vld [vmem:[#allocation39_spill] sm:$0xff]  ;;  %v7467_v61 = vld [vmem:[#allocation40_spill] sm:$0xff] }
 0x166   : > { %1670 = vmatmul.mubr.f32.gmra.mxu1 %v7445_v42  ;;  %1418 = vmatprep.mubr.f32.mxu0 %v7446_v21  ;;  %v2143_v2 = vld [vmem:[#allocation8 + $0x768] sm:$0xff]  ;;  %v7469_v21 = vld [vmem:[#allocation42_spill] sm:$0xff] }
 0x167   : > { %1675 = vmatprep.mubr.f32.mxu1 %v7447_v18  ;;  %2212 = vmatprep.subr.mxu0 %v1911_v6  ;;  %v2014_v18 = vld [vmem:[#allocation8 + $0x360] sm:$0xff] }
 0x168   : > { %2469 = vmatprep.subr.mxu1 %v2039_v7  ;;  %2213 = vmatpush1.msra.mxu0 %v1910_v58  ;;  %v2015_v7 = vld [vmem:[#allocation8 + $0x368] sm:$0xff] }
 0x169   : > { %2470 = vmatpush1.msra.mxu1 %v2038_v15  ;;  %1419 = vmatmul.mubr.f32.gmra.mxu0 %v7448_v12  ;;  %v7468_v15 = vld [vmem:[#allocation41_spill] sm:$0xff]  ;;  %v7471_v12 = vld [vmem:[#allocation44_spill] sm:$0xff] }
 0x16a   : > { %1676 = vmatmul.mubr.f32.gmra.mxu1 %v7449_v31  ;;  %1424 = vmatprep.mubr.f32.mxu0 %v7450_v8  ;;  %v2139_v8 = vld [vmem:[#allocation8 + $0x748] sm:$0xff] }
 0x16b   : > { %1681 = vmatprep.mubr.f32.mxu1 %v7451_v9  ;;  %2214 = vmatprep.subr.mxu0 %v1907_v34  ;;  %v2142_v34 = vld [vmem:[#allocation8 + $0x760] sm:$0xff] }
 0x16c   : > { %2471 = vmatprep.subr.mxu1 %v2035_v5  ;;  %2215 = vmatpush1.msra.mxu0 %v1906_v47  ;;  %v7470_v5 = vld [vmem:[#allocation43_spill] sm:$0xff] }
 0x16d   : > { %2472 = vmatpush1.msra.mxu1 %v2034_v26  ;;  %v4737_v16 = vpop.f32.mrf.mxu0  ;;  %1425 = vmatmul.mubr.f32.gmra.mxu0 %v7452_v53  ;;  %v2011_v26 = vld [vmem:[#allocation8 + $0x348] sm:$0xff]  ;;  %v7473_v53 = vld [vmem:[#allocation46_spill] sm:$0xff] }
 0x16e   : > { %v4739_v17 = vpop.f32.mrf.mxu1  ;;  %1682 = vmatmul.mubr.f32.gmra.mxu1 %v7453_v19  ;;  %1430 = vmatprep.mubr.f32.mxu0 %v7454_v25  ;;  %v2010_v19 = vld [vmem:[#allocation8 + $0x340] sm:$0xff]  ;;  %v7475_v25 = vld [vmem:[#allocation48_spill] sm:$0xff] }
 0x16f   : > { %1687 = vmatprep.mubr.f32.mxu1 %v7455_v27  ;;  %v4745_v28 = vpop.f32.mrf.mxu0  ;;  %2216 = vmatprep.subr.mxu0 %v2031_v37 }
 0x170   : > { %v4747_v32 = vpop.f32.mrf.mxu1  ;;  %2473 = vmatprep.subr.mxu1 %v2159_v50  ;;  %2217 = vmatpush2.msra.mxu0 %v2030_v20  ;;  %v7472_v50 = vld [vmem:[#allocation45_spill] sm:$0xff]  ;;  %v2138_v20 = vld [vmem:[#allocation8 + $0x740] sm:$0xff] }
 0x171   : > { %2474 = vmatpush2.msra.mxu1 %v2158_v24  ;;  %v4749_v36 = vpop.f32.mrf.mxu0  ;;  %1431 = vmatmul.mubr.f32.gmra.mxu0 %v7456_v41  ;;  %v7474_v24 = vld [vmem:[#allocation47_spill] sm:$0xff]  ;;  %v2135_v41 = vld [vmem:[#allocation8 + $0x728] sm:$0xff] }
 0x172   : > { %v4751_v40 = vpop.f32.mrf.mxu1  ;;  %1688 = vmatmul.mubr.f32.gmra.mxu1 %v7457_v43  ;;  %1436 = vmatprep.mubr.f32.mxu0 %v7458_v49  ;;  %v7477_v49 = vld [vmem:[#allocation50_spill] sm:$0xff] }
 0x173   : > { %1693 = vmatprep.mubr.f32.mxu1 %v7459_v51  ;;  %v4757_v52 = vpop.f32.mrf.mxu0  ;;  %2218 = vmatprep.subr.mxu0 %v2027_v33  ;;  %v2006_v51 = vld [vmem:[#allocation8 + $0x320] sm:$0xff] }
 0x174   : > { %v4759_v56 = vpop.f32.mrf.mxu1  ;;  %2475 = vmatprep.subr.mxu1 %v2155_v35  ;;  %2219 = vmatpush2.msra.mxu0 %v2026_v44  ;;  %v2007_v35 = vld [vmem:[#allocation8 + $0x328] sm:$0xff] }
 0x175   : > { %2476 = vmatpush2.msra.mxu1 %v2154_v48  ;;  %v4761_v60 = vpop.f32.mrf.mxu0  ;;  %1437 = vmatmul.mubr.f32.gmra.mxu0 %v7460_v1  ;;  %v7476_v48 = vld [vmem:[#allocation49_spill] sm:$0xff]  ;;  %v7479_v1 = vld [vmem:[#allocation52_spill] sm:$0xff] }
 0x176   : > { %v4763_v0 = vpop.f32.mrf.mxu1  ;;  %1694 = vmatmul.mubr.f32.gmra.mxu1 %v7461_v3  ;;  %1442 = vmatprep.mubr.f32.mxu0 %v7462_v11  ;;  %v2131_v11 = vld [vmem:[#allocation8 + $0x708] sm:$0xff] }
 0x177   : > { %1699 = vmatprep.mubr.f32.mxu1 %v7463_v13  ;;  %v4769_v14 = vpop.f32.mrf.mxu0  ;;  %2220 = vmatprep.subr.mxu0 %v2023_v57  ;;  %v2134_v57 = vld [vmem:[#allocation8 + $0x720] sm:$0xff] }
 0x178   : > { %v4771_v22 = vpop.f32.mrf.mxu1  ;;  %2477 = vmatprep.subr.mxu1 %v2151_v59  ;;  %2221 = vmatpush2.msra.mxu0 %v2022_v4  ;;  %v7478_v59 = vld [vmem:[#allocation51_spill] sm:$0xff] }
 0x179   : > { %2478 = vmatpush2.msra.mxu1 %v2150_v10  ;;  %v4773_v30 = vpop.f32.mrf.mxu0  ;;  %1443 = vmatmul.mubr.f32.gmra.mxu0 %v7464_v39  ;;  %v2003_v10 = vld [vmem:[#allocation8 + $0x308] sm:$0xff]  ;;  %v7481_v39 = vld [vmem:[#allocation54_spill] sm:$0xff] }
 0x17a   : > { %v4775_v38 = vpop.f32.mrf.mxu1  ;;  %1700 = vmatmul.mubr.f32.gmra.mxu1 %v7465_v45  ;;  %1448 = vmatprep.mubr.f32.mxu0 %v7466_v55  ;;  %v2002_v45 = vld [vmem:[#allocation8 + $0x300] sm:$0xff]  ;;  %v7483_v55 = vld [vmem:[#allocation56_spill] sm:$0xff] }
 0x17b   : > { %1705 = vmatprep.mubr.f32.mxu1 %v7467_v61  ;;  %v4781_v62 = vpop.f32.mrf.mxu0  ;;  %2222 = vmatprep.subr.mxu0 %v2019_v23 }
 0x17c   : > { %v4783_v6 = vpop.f32.mrf.mxu1  ;;  %2479 = vmatprep.subr.mxu1 %v2147_v29  ;;  %2223 = vmatpush2.msra.mxu0 %v2018_v46  ;;  %v7480_v29 = vld [vmem:[#allocation53_spill] sm:$0xff]  ;;  %v2130_v46 = vld [vmem:[#allocation8 + $0x700] sm:$0xff] }
 0x17d   : > { %2480 = vmatpush2.msra.mxu1 %v2146_v54  ;;  %v4785_v42 = vpop.f32.mrf.mxu0  ;;  %1449 = vmatmul.mubr.f32.gmra.mxu0 %v7468_v15  ;;  %v7482_v54 = vld [vmem:[#allocation55_spill] sm:$0xff]  ;;  %v2127_v15 = vld [vmem:[#allocation8 + $0x6e8] sm:$0xff] }
 0x17e   : > { %v4787_v58 = vpop.f32.mrf.mxu1  ;;  %1706 = vmatmul.mubr.f32.gmra.mxu1 %v7469_v21  ;;  %1454 = vmatprep.mubr.f32.mxu0 %v7470_v5  ;;  %v7485_v5 = vld [vmem:[#allocation58_spill] sm:$0xff] }
 0x17f   : > { %1711 = vmatprep.mubr.f32.mxu1 %v7471_v12  ;;  %v4793_v31 = vpop.f32.mrf.mxu0  ;;  %2224 = vmatprep.subr.mxu0 %v2015_v7  ;;  %v1998_v12 = vld [vmem:[#allocation8 + $0x2e0] sm:$0xff] }
 0x180   : > { %v4795_v47 = vpop.f32.mrf.mxu1  ;;  %2481 = vmatprep.subr.mxu1 %v2143_v2  ;;  %2225 = vmatpush2.msra.mxu0 %v2014_v18  ;;  %v1999_v2 = vld [vmem:[#allocation8 + $0x2e8] sm:$0xff] }
 0x181   : > { %2482 = vmatpush2.msra.mxu1 %v2142_v34  ;;  %v4797_v9 = vpop.f32.mrf.mxu0  ;;  %1455 = vmatmul.mubr.f32.gmra.mxu0 %v7472_v50  ;;  %v7484_v34 = vld [vmem:[#allocation57_spill] sm:$0xff]  ;;  %v7487_v50 = vld [vmem:[#allocation60_spill] sm:$0xff] }
 0x182   : > { %v4799_v37 = vpop.f32.mrf.mxu1  ;;  %1712 = vmatmul.mubr.f32.gmra.mxu1 %v7473_v53  ;;  %1460 = vmatprep.mubr.f32.mxu0 %v7474_v24  ;;  %v2123_v24 = vld [vmem:[#allocation8 + $0x6c8] sm:$0xff] }
 0x183   : > { %1717 = vmatprep.mubr.f32.mxu1 %v7475_v25  ;;  %v4805_v27 = vpop.f32.mrf.mxu0  ;;  %2226 = vmatprep.subr.mxu0 %v2011_v26  ;;  %v2126_v26 = vld [vmem:[#allocation8 + $0x6e0] sm:$0xff] }
 0x184   : > { %v4807_v33 = vpop.f32.mrf.mxu1  ;;  %2483 = vmatprep.subr.mxu1 %v2139_v8  ;;  %2227 = vmatpush2.msra.mxu0 %v2010_v19  ;;  %v7486_v8 = vld [vmem:[#allocation59_spill] sm:$0xff] }
 0x185   : > { %2484 = vmatpush2.msra.mxu1 %v2138_v20  ;;  %v4809_v43 = vpop.f32.mrf.mxu0  ;;  %1461 = vmatmul.mubr.f32.gmra.mxu0 %v7476_v48  ;;  %v1995_v20 = vld [vmem:[#allocation8 + $0x2c8] sm:$0xff]  ;;  %v7489_v48 = vld [vmem:[#allocation62_spill] sm:$0xff] }
 0x186   : > { %v4811_v44 = vpop.f32.mrf.mxu1  ;;  %1718 = vmatmul.mubr.f32.gmra.mxu1 %v7477_v49  ;;  %1466 = vmatprep.mubr.f32.mxu0 %v7478_v59  ;;  %v1994_v49 = vld [vmem:[#allocation8 + $0x2c0] sm:$0xff] }
 0x187   : > { %1723 = vmatprep.mubr.f32.mxu1 %v7479_v1  ;;  %v4817_v3 = vpop.f32.mrf.mxu0  ;;  %2228 = vmatprep.subr.mxu0 %v2007_v35  ;;  %v7490_v59 = vld [vmem:[#allocation63_spill] sm:$0xff]  ;;  %v7491_v1 = vld [vmem:[#allocation64_spill] sm:$0xff] }
 0x188   : > { %v4819_v4 = vpop.f32.mrf.mxu1  ;;  %2485 = vmatprep.subr.mxu1 %v2135_v41  ;;  %2229 = vmatpush2.msra.mxu0 %v2006_v51  ;;  %v7488_v41 = vld [vmem:[#allocation61_spill] sm:$0xff]  ;;  %v2122_v51 = vld [vmem:[#allocation8 + $0x6c0] sm:$0xff] }
 0x189   : > { %2486 = vmatpush2.msra.mxu1 %v2134_v57  ;;  %v4821_v13 = vpop.f32.mrf.mxu0  ;;  %1467 = vmatmul.mubr.f32.gmra.mxu0 %v7480_v29  ;;  %v7188_v57 = vlaneseq  ;;  %v1991_v29 = vld [vmem:[#allocation8 + $0x2a8] sm:$0xff] }
 0x18a   : > { %v4823_v23 = vpop.f32.mrf.mxu1  ;;  %1724 = vmatmul.mubr.f32.gmra.mxu1 %v7481_v39  ;;  %1472 = vmatprep.mubr.f32.mxu0 %v7482_v54  ;;  %v2119_v39 = vld [vmem:[#allocation8 + $0x6a8] sm:$0xff]  ;;  %v7492_v54 = vld [vmem:[#allocation65_spill] sm:$0xff] }
 0x18b   : > { %1729 = vmatprep.mubr.f32.mxu1 %v7483_v55  ;;  %v4829_v61 = vpop.f32.mrf.mxu0  ;;  %2230 = vmatprep.subr.mxu0 %v2003_v10  ;;  %v7493_v55 = vld [vmem:[#allocation66_spill] sm:$0xff] }
 0x18c   : > { %v4831_v7 = vpop.f32.mrf.mxu1  ;;  %2487 = vmatprep.subr.mxu1 %v2131_v11  ;;  %2231 = vmatpush2.msra.mxu0 %v2002_v45 }
 0x18d   : > { %2488 = vmatpush2.msra.mxu1 %v2130_v46  ;;  %v4833_v21 = vpop.f32.mrf.mxu0  ;;  %1473 = vmatmul.mubr.f32.gmra.mxu0 %v7484_v34  ;;  %v4864_v34 = vshrl.u32 %v7188_v57, 7  ;;  %v7508_v57 = vld [vmem:[#allocation74_spill] sm:$0xff] }
 0x18e   : > { %v4835_v18 = vpop.f32.mrf.mxu1  ;;  %1730 = vmatmul.mubr.f32.gmra.mxu1 %v7485_v5  ;;  %1478 = vmatprep.mubr.f32.mxu0 %v7486_v8  ;;  %v7495_v5 = vld [vmem:[#allocation67_spill] sm:$0xff] }
 0x18f   : > { %1735 = vmatprep.mubr.f32.mxu1 %v7487_v50  ;;  %v4841_v53 = vpop.f32.mrf.mxu0  ;;  %2232 = vmatprep.subr.mxu0 %v1999_v2  ;;  %v1990_v2 = vld [vmem:[#allocation8 + $0x2a0] sm:$0xff]  ;;  %7494 = vst [vmem:[#allocation16_spill] sm:$0xff] %v4864_v34  ;;  %v4873_v50 = vsub.s32 1, %v4864_v34 }
 0x190   : > { %v4843_v19 = vpop.f32.mrf.mxu1  ;;  %2489 = vmatprep.subr.mxu1 %v2127_v15  ;;  %2233 = vmatpush2.msra.mxu0 %v1998_v12  ;;  %v2118_v15 = vld [vmem:[#allocation8 + $0x6a0] sm:$0xff]  ;;  %v7496_v12 = vld [vmem:[#allocation68_spill] sm:$0xff] }
 0x191   : > { %2490 = vmatpush2.msra.mxu1 %v2126_v26  ;;  %v4845_v25 = vpop.f32.mrf.mxu0  ;;  %1479 = vmatmul.mubr.f32.gmra.mxu0 %v7488_v41  ;;  %7497 = vst [vmem:[#allocation17_spill] sm:$0xff] %v4873_v50 }
 0x192   : > { %v4847_v35 = vpop.f32.mrf.mxu1  ;;  %1736 = vmatmul.mubr.f32.gmra.mxu1 %v7489_v48  ;;  %1484 = vmatprep.mubr.f32.mxu0 %v7490_v59  ;;  %v1986_v59 = vld [vmem:[#allocation8 + $0x280] sm:$0xff] }
 0x193   : > { %1741 = vmatprep.mubr.f32.mxu1 %v7491_v1  ;;  %v4853_v10 = vpop.f32.mrf.mxu0  ;;  %2234 = vmatprep.subr.mxu0 %v1995_v20  ;;  %v1987_v20 = vld [vmem:[#allocation8 + $0x288] sm:$0xff]  ;;  %v2114_v1 = vld [vmem:[#allocation8 + $0x680] sm:$0xff] }
 0x194   : > { %v4855_v11 = vpop.f32.mrf.mxu1  ;;  %2491 = vmatprep.subr.mxu1 %v2123_v24  ;;  %2235 = vmatpush2.msra.mxu0 %v1994_v49  ;;  %v2115_v24 = vld [vmem:[#allocation8 + $0x688] sm:$0xff]  ;;  %v7499_v49 = vld [vmem:[#allocation69_spill] sm:$0xff] }
 0x195   : > { %2492 = vmatpush2.msra.mxu1 %v2122_v51  ;;  %v4857_v45 = vpop.f32.mrf.mxu0  ;;  %1485 = vmatmul.mubr.f32.gmra.mxu0 %v7492_v54  ;;  %v7500_v51 = vld [vmem:[#allocation70_spill] sm:$0xff]  ;;  %v7501_v54 = vld [vmem:[#allocation71_spill] sm:$0xff] }
 0x196   : > { %v4859_v46 = vpop.f32.mrf.mxu1  ;;  %1742 = vmatmul.mubr.f32.gmra.mxu1 %v7493_v55  ;;  %1490 = vmatprep.mubr.f32.mxu0 %v7495_v5  ;;  %v4889_v55 = vsub.s32 0, %v4864_v34  ;;  %v1982_v34 = vld [vmem:[#allocation8 + $0x260] sm:$0xff] }
 0x197   : > { %1747 = vmatprep.mubr.f32.mxu1 %v7496_v12  ;;  %v4868_v26 = vpop.f32.mrf.mxu0  ;;  %2236 = vmatprep.subr.mxu0 %v1991_v29  ;;  %v7502_v29 = vld [vmem:[#allocation72_spill] sm:$0xff] }
 0x198   : > { %v4870_v8 = vpop.f32.mrf.mxu1  ;;  %2493 = vmatprep.subr.mxu1 %v2119_v39  ;;  %2237 = vmatpush2.msra.mxu0 %v1990_v2  ;;  %v4886_v39 = vld [vmem:[%s7106_s2] sm:$0xf]  ;;  %7504 = vst [vmem:[#allocation20_spill] sm:$0xff] %v4889_v55  ;;  %v1983_v12 = vld [vmem:[#allocation8 + $0x268] sm:$0xff] }
 0x199   : > { %2494 = vmatpush2.msra.mxu1 %v2118_v15  ;;  %v4875_v41 = vpop.f32.mrf.mxu0  ;;  %1491 = vmatmul.mubr.f32.gmra.mxu0 %v7499_v49  ;;  %7503 = vst [vmem:[#allocation19_spill] sm:$0xff] %v4886_v39  ;;  %v4897_v5 = vrot.slane %v4886_v39, %v4873_v50  ;;  %v2111_v49 = vld [vmem:[#allocation8 + $0x668] sm:$0xff] }
 0x19a   : > { %v4877_v48 = vpop.f32.mrf.mxu1  ;;  %1748 = vmatmul.mubr.f32.gmra.mxu1 %v7500_v51  ;;  %1496 = vmatprep.mubr.f32.mxu0 %v7501_v54 }
 0x19b   : > { %7498 = vst [vmem:[#allocation18_spill] sm:$0xff] %v4877_v48  ;;  %1753 = vmatprep.mubr.f32.mxu1 %v7502_v29  ;;  %v4891_v2 = vpop.f32.mrf.mxu0  ;;  %2238 = vmatprep.subr.mxu0 %v1987_v20  ;;  %v7507_v29 = vld [vmem:[#allocation73_spill] sm:$0xff]  ;;  %v2110_v48 = vld [vmem:[#allocation8 + $0x660] sm:$0xff] }
 0x19c   : > { %v4893_v15 = vpop.f32.mrf.mxu1  ;;  %2495 = vmatprep.subr.mxu1 %v2115_v24  ;;  %2239 = vmatpush2.msra.mxu0 %v1986_v59  ;;  %v7509_v20 = vld [vmem:[#allocation75_spill] sm:$0xff]  ;;  %v7510_v24 = vld [vmem:[#allocation76_spill] sm:$0xff]  ;;  %v4909_v59 = vrot.slane %v4886_v39, %v4889_v55  ;;  %v7516_v55 = vld [vmem:[#allocation78_spill] sm:$0xff] }
 0x19d   : > { %2496 = vmatpush2.msra.mxu1 %v2114_v1  ;;  %v4899_v51 = vpop.f32.mrf.mxu0  ;;  %1497 = vmatmul.mubr.f32.gmra.mxu0 %v7507_v29  ;;  %v819_v29 = vadd.f32 %v4745_v28, %v4897_v5  ;;  %v1978_v39 = vld [vmem:[#allocation8 + $0x240] sm:$0xff] }
 0x19e   : > { %7505 = vst [vmem:[#allocation21_spill] sm:$0xff] %v4899_v51  ;;  %v4901_v54 = vpop.f32.mrf.mxu1  ;;  %1754 = vmatmul.mubr.f32.gmra.mxu1 %v7508_v57  ;;  %1502 = vmatprep.mubr.f32.mxu0 %v7509_v20  ;;  %v1979_v57 = vld [vmem:[#allocation8 + $0x248] sm:$0xff]  ;;  %v7515_v51 = vld [vmem:[#allocation77_spill] sm:$0xff]  ;;  %v817_v28 = vadd.f32 %v4737_v16, %v4909_v59 }
 0x19f   : > { %7506 = vst [vmem:[#allocation22_spill] sm:$0xff] %v4901_v54  ;;  %1759 = vmatprep.mubr.f32.mxu1 %v7510_v24  ;;  %v4911_v1 = vpop.f32.mrf.mxu0  ;;  %2240 = vmatprep.subr.mxu0 %v1983_v12  ;;  %v2107_v54 = vld [vmem:[#allocation8 + $0x648] sm:$0xff]  ;;  %v7522_v16 = vld [vmem:[#allocation81_spill] sm:$0xff] }
 0x1a0   : > { %7511 = vst [vmem:[#allocation23_spill] sm:$0xff] %v4911_v1  ;;  %v4913_v50 = vpop.f32.mrf.mxu1  ;;  %2497 = vmatprep.subr.mxu1 %v2111_v49  ;;  %2241 = vmatpush2.msra.mxu0 %v1982_v34  ;;  %v2106_v1 = vld [vmem:[#allocation8 + $0x640] sm:$0xff]  ;;  %v7518_v12 = vld [vmem:[#allocation80_spill] sm:$0xff]  ;;  %v4932_v49 = vadd.f32 %v4747_v32, %v819_v29 }
 0x1a1   : > { %7512 = vst [vmem:[#allocation24_spill] sm:$0xff] %v4913_v50  ;;  %2498 = vmatpush2.msra.mxu1 %v2110_v48  ;;  %v4917_v20 = vpop.f32.mrf.mxu0  ;;  %1503 = vmatmul.mubr.f32.gmra.mxu0 %v7515_v51  ;;  %v7517_v50 = vld [vmem:[#allocation79_spill] sm:$0xff]  ;;  %v1975_v51 = vld [vmem:[#allocation8 + $0x228] sm:$0xff] }
 0x1a2   : > { %7513 = vst [vmem:[#allocation25_spill] sm:$0xff] %v4917_v20  ;;  %v4919_v24 = vpop.f32.mrf.mxu1  ;;  %1760 = vmatmul.mubr.f32.gmra.mxu1 %v7516_v55  ;;  %1508 = vmatprep.mubr.f32.mxu0 %v7517_v50  ;;  %7520 = vst [vmem:[#allocation28_spill] sm:$0xff] %v4932_v49  ;;  %v825_v55 = vadd.f32 %v4757_v52, %v4897_v5  ;;  %v2103_v50 = vld [vmem:[#allocation8 + $0x628] sm:$0xff]  ;;  %v7523_v20 = vld [vmem:[#allocation82_spill] sm:$0xff]  ;;  %v4945_v52 = vadd.f32 %v4739_v17, %v817_v28 }
 0x1a3   : > { %7514 = vst [vmem:[#allocation26_spill] sm:$0xff] %v4919_v24  ;;  %1765 = vmatprep.mubr.f32.mxu1 %v7518_v12  ;;  %v4927_v34 = vpop.f32.mrf.mxu0  ;;  %2242 = vmatprep.subr.mxu0 %v1979_v57  ;;  %v1974_v57 = vld [vmem:[#allocation8 + $0x220] sm:$0xff]  ;;  %v7525_v32 = vld [vmem:[#allocation84_spill] sm:$0xff] }
 0x1a4   : > { %v4929_v48 = vpop.f32.mrf.mxu1  ;;  %2499 = vmatprep.subr.mxu1 %v2107_v54  ;;  %2243 = vmatpush2.msra.mxu0 %v1978_v39  ;;  %v2102_v54 = vld [vmem:[#allocation8 + $0x620] sm:$0xff]  ;;  %7526 = vst [vmem:[#allocation30_spill] sm:$0xff] %v4945_v52  ;;  %v823_v39 = vadd.f32 %v4749_v36, %v4909_v59  ;;  %v2099_v28 = vld [vmem:[#allocation8 + $0x608] sm:$0xff] }
 0x1a5   : > { %7519 = vst [vmem:[#allocation27_spill] sm:$0xff] %v4929_v48  ;;  %2500 = vmatpush2.msra.mxu1 %v2106_v1  ;;  %v4936_v12 = vpop.f32.mrf.mxu0  ;;  %1509 = vmatmul.mubr.f32.gmra.mxu0 %v7522_v16  ;;  %v7524_v48 = vld [vmem:[#allocation83_spill] sm:$0xff]  ;;  %v1971_v16 = vld [vmem:[#allocation8 + $0x208] sm:$0xff] }
 0x1a6   : > { %v4938_v24 = vpop.f32.mrf.mxu1  ;;  %1766 = vmatmul.mubr.f32.gmra.mxu1 %v7523_v20  ;;  %1514 = vmatprep.mubr.f32.mxu0 %v7524_v48  ;;  %v7198_v20 = vmax.f32 %v4932_v49, 0.0  ;;  %v831_v48 = vadd.f32 %v4769_v14, %v4897_v5  ;;  %v1970_v17 = vld [vmem:[#allocation8 + $0x200] sm:$0xff]  ;;  %v7199_v14 = vmax.f32 %v4945_v52, 0.0 }
 0x1a7   : > { %7521 = vst [vmem:[#allocation29_spill] sm:$0xff] %v4938_v24  ;;  %1771 = vmatprep.mubr.f32.mxu1 %v7525_v32  ;;  %v4949_v1 = vpop.f32.mrf.mxu0  ;;  %2244 = vmatprep.subr.mxu0 %v1975_v51  ;;  %v4955_v24 = vadd.f32 %v4759_v56, %v825_v55  ;;  %v1969_v51 = vld [vmem:[#allocation8 + $0x1f8] sm:$0xff]  ;;  %v4969_v55 = vadd.f32 %v4751_v40, %v823_v39 }
 0x1a8   : > { %v4951_v29 = vpop.f32.mrf.mxu1  ;;  %2501 = vmatprep.subr.mxu1 %v2103_v50  ;;  %2245 = vmatpush2.msra.mxu0 %v1974_v57  ;;  %v2098_v50 = vld [vmem:[#allocation8 + $0x600] sm:$0xff]  ;;  %v2097_v56 = vld [vmem:[#allocation8 + $0x5f8] sm:$0xff]  ;;  %v829_v57 = vadd.f32 %v4761_v60, %v4909_v59 }
 0x1a9   : > { %7527 = vst [vmem:[#allocation31_spill] sm:$0xff] %v4951_v29  ;;  %7528 = vst [vmem:[#allocation32_spill] sm:$0xff] %v4955_v24  ;;  %2502 = vmatpush2.msra.mxu1 %v2102_v54  ;;  %v4959_v36 = vpop.f32.mrf.mxu0  ;;  %v7529_v29 = vld [vmem:[#allocation85_spill] sm:$0xff]  ;;  %2246 = vmatprep.subr.mxu0 %v1971_v16  ;;  %v7200_v49 = vmax.f32 %v4955_v24, 0.0  ;;  %v4979_v16 = vadd.f32 %v4771_v22, %v831_v48  ;;  %v1965_v40 = vld [vmem:[#allocation8 + $0x1d8] sm:$0xff] }
 0x1aa   : > { %v4961_v32 = vpop.f32.mrf.mxu1  ;;  %1515 = vmatmul.mubr.f32.gmra.mxu0 %v7529_v29  ;;  %1772 = vmatmul.mubr.f32.gmra.mxu1 %v4665_v63  ;;  %7530 = vst [vmem:[#allocation33_spill] sm:$0xff] %v4969_v55  ;;  %v1968_v63 = vld [vmem:[#allocation8 + $0x1f0] sm:$0xff]  ;;  %v1961_v22 = vld [vmem:[#allocation8 + $0x1b8] sm:$0xff] }
 0x1ab   : > { %2248 = vmatprep.mubr.f32.mxu0 %v7198_v20  ;;  %v4973_v54 = vpop.f32.mrf.mxu0  ;;  %2247 = vmatpush2.msra.mxu0 %v1970_v17  ;;  %7531 = vst [vmem:[#allocation34_spill] sm:$0xff] %v4979_v16  ;;  %v837_v20 = vadd.f32 %v4781_v62, %v4897_v5  ;;  %v1964_v17 = vld [vmem:[#allocation8 + $0x1d0] sm:$0xff]  ;;  %v4993_v62 = vadd.f32 %v4763_v0, %v829_v57  ;;  %v1957_v0 = vld [vmem:[#allocation8 + $0x198] sm:$0xff] }
 0x1ac   : > { %v4975_v29 = vpop.f32.mrf.mxu1  ;;  %2503 = vmatprep.subr.mxu1 %v2099_v28  ;;  %2698 = vmatprep.subr.mxu0 %v1969_v51  ;;  %v835_v28 = vadd.f32 %v4773_v30, %v4909_v59  ;;  %v7534_v30 = vmax.f32 %v4969_v55, 0.0 }
 0x1ad   : > { %2504 = vmatpush2.msra.mxu1 %v2098_v50  ;;  %v4983_v39 = vpop.f32.mrf.mxu0  ;;  %7532 = vst [vmem:[#allocation35_spill] sm:$0xff] %v4993_v62 }
 0x1ae   : > { %v4985_v60 = vpop.f32.mrf.mxu1  ;;  %2249 = vmatmul.mubr.f32.vlgmr.msra.gmra.mxu0 %v7199_v14  ;;  %2955 = vmatprep.subr.mxu1 %v2097_v56  ;;  %v1960_v14 = vld [vmem:[#allocation8 + $0x1b0] sm:$0xff]  ;;  %v7203_v56 = vmax.f32 %v4979_v16, 0.0 }
 0x1af   : > { %2254 = vmatprep.mubr.f32.mxu0 %v7200_v49  ;;  %2699 = vmatpush1.msra.mxu0 %v1968_v63  ;;  %v4997_v51 = vpop.f32.mrf.mxu0  ;;  %v5003_v49 = vadd.f32 %v4783_v6, %v837_v20  ;;  %v843_v63 = vadd.f32 %v4793_v31, %v4897_v5  ;;  %v1953_v6 = vld [vmem:[#allocation8 + $0x178] sm:$0xff]  ;;  %v5017_v31 = vadd.f32 %v4775_v38, %v835_v28 }
 0x1b0   : > { %v4999_v50 = vpop.f32.mrf.mxu1  ;;  %2700 = vmatprep.subr.mxu0 %v1965_v40  ;;  %v1956_v40 = vld [vmem:[#allocation8 + $0x190] sm:$0xff]  ;;  %v1949_v38 = vld [vmem:[#allocation8 + $0x158] sm:$0xff] }
 0x1b1   : > { %7533 = vst [vmem:[#allocation36_spill] sm:$0xff] %v5003_v49  ;;  %2701 = vmatpush1.msra.mxu0 %v1964_v17  ;;  %v5007_v57 = vpop.f32.mrf.mxu0  ;;  %7535 = vst [vmem:[#allocation37_spill] sm:$0xff] %v5017_v31  ;;  %v841_v17 = vadd.f32 %v4785_v42, %v4909_v59  ;;  %v7537_v42 = vmax.f32 %v4993_v62, 0.0 }
 0x1b2   : > { %v5009_v48 = vpop.f32.mrf.mxu1  ;;  %2255 = vmatmul.mubr.f32.gmra.mxu0 %v7534_v30  ;;  %2702 = vmatprep.subr.mxu0 %v1961_v22  ;;  %v1952_v22 = vld [vmem:[#allocation8 + $0x170] sm:$0xff]  ;;  %v7206_v30 = vmax.f32 %v5003_v49, 0.0 }
 0x1b3   : > { %2260 = vmatprep.mubr.f32.mxu0 %v7203_v56  ;;  %2703 = vmatpush1.msra.mxu0 %v1960_v14  ;;  %v5021_v24 = vpop.f32.mrf.mxu0  ;;  %v5027_v56 = vadd.f32 %v4795_v47, %v843_v63  ;;  %v849_v14 = vadd.f32 %v4805_v27, %v4897_v5  ;;  %v1945_v47 = vld [vmem:[#allocation8 + $0x138] sm:$0xff]  ;;  %v5041_v27 = vadd.f32 %v4787_v58, %v841_v17 }
 0x1b4   : > { %v5023_v52 = vpop.f32.mrf.mxu1  ;;  %2704 = vmatprep.subr.mxu0 %v1957_v0  ;;  %v1948_v0 = vld [vmem:[#allocation8 + $0x150] sm:$0xff]  ;;  %v1941_v58 = vld [vmem:[#allocation8 + $0x118] sm:$0xff] }
 0x1b5   : > { %7536 = vst [vmem:[#allocation38_spill] sm:$0xff] %v5027_v56  ;;  %2705 = vmatpush1.msra.mxu0 %v1956_v40  ;;  %v5031_v28 = vpop.f32.mrf.mxu0  ;;  %7538 = vst [vmem:[#allocation39_spill] sm:$0xff] %v5041_v27  ;;  %v847_v40 = vadd.f32 %v4797_v9, %v4909_v59  ;;  %v7540_v9 = vmax.f32 %v5017_v31, 0.0 }
 0x1b6   : > { %v5033_v20 = vpop.f32.mrf.mxu1  ;;  %2261 = vmatmul.mubr.f32.gmra.mxu0 %v7537_v42  ;;  %2706 = vmatprep.subr.mxu0 %v1953_v6  ;;  %v1944_v6 = vld [vmem:[#allocation8 + $0x130] sm:$0xff]  ;;  %v7209_v42 = vmax.f32 %v5027_v56, 0.0 }
 0x1b7   : > { %2266 = vmatprep.mubr.f32.mxu0 %v7206_v30  ;;  %2707 = vmatpush1.msra.mxu0 %v1952_v22  ;;  %v5045_v16 = vpop.f32.mrf.mxu0  ;;  %v5051_v30 = vadd.f32 %v4807_v33, %v849_v14  ;;  %v855_v22 = vadd.f32 %v4817_v3, %v4897_v5  ;;  %v1937_v33 = vld [vmem:[#allocation8 + $0xf8] sm:$0xff]  ;;  %v5065_v3 = vadd.f32 %v4799_v37, %v847_v40 }
 0x1b8   : > { %v5047_v55 = vpop.f32.mrf.mxu1  ;;  %2708 = vmatprep.subr.mxu0 %v1949_v38  ;;  %v1940_v38 = vld [vmem:[#allocation8 + $0x110] sm:$0xff]  ;;  %v1933_v37 = vld [vmem:[#allocation8 + $0xd8] sm:$0xff] }
 0x1b9   : > { %7539 = vst [vmem:[#allocation40_spill] sm:$0xff] %v5051_v30  ;;  %2709 = vmatpush1.msra.mxu0 %v1948_v0  ;;  %v5055_v17 = vpop.f32.mrf.mxu0  ;;  %7541 = vst [vmem:[#allocation41_spill] sm:$0xff] %v5065_v3  ;;  %v853_v0 = vadd.f32 %v4809_v43, %v4909_v59  ;;  %v7543_v43 = vmax.f32 %v5041_v27, 0.0 }
 0x1ba   : > { %v5057_v63 = vpop.f32.mrf.mxu1  ;;  %2267 = vmatmul.mubr.f32.gmra.mxu0 %v7540_v9  ;;  %2710 = vmatprep.subr.mxu0 %v1945_v47  ;;  %v1936_v47 = vld [vmem:[#allocation8 + $0xf0] sm:$0xff]  ;;  %v7212_v9 = vmax.f32 %v5051_v30, 0.0 }
 0x1bb   : > { %2272 = vmatprep.mubr.f32.mxu0 %v7209_v42  ;;  %2711 = vmatpush1.msra.mxu0 %v1944_v6  ;;  %v5069_v49 = vpop.f32.mrf.mxu0  ;;  %v5075_v42 = vadd.f32 %v4819_v4, %v855_v22  ;;  %v861_v6 = vadd.f32 %v4829_v61, %v4897_v5  ;;  %v1929_v4 = vld [vmem:[#allocation8 + $0xb8] sm:$0xff]  ;;  %v5089_v61 = vadd.f32 %v4811_v44, %v853_v0 }
 0x1bc   : > { %v5071_v62 = vpop.f32.mrf.mxu1  ;;  %2712 = vmatprep.subr.mxu0 %v1941_v58  ;;  %v1932_v58 = vld [vmem:[#allocation8 + $0xd0] sm:$0xff]  ;;  %v1925_v44 = vld [vmem:[#allocation8 + $0x98] sm:$0xff] }
 0x1bd   : > { %7542 = vst [vmem:[#allocation42_spill] sm:$0xff] %v5075_v42  ;;  %2713 = vmatpush1.msra.mxu0 %v1940_v38  ;;  %v5079_v40 = vpop.f32.mrf.mxu0  ;;  %7544 = vst [vmem:[#allocation43_spill] sm:$0xff] %v5089_v61  ;;  %v859_v38 = vadd.f32 %v4821_v13, %v4909_v59  ;;  %v7546_v13 = vmax.f32 %v5065_v3, 0.0 }
 0x1be   : > { %v5081_v14 = vpop.f32.mrf.mxu1  ;;  %2273 = vmatmul.mubr.f32.gmra.mxu0 %v7543_v43  ;;  %2714 = vmatprep.subr.mxu0 %v1937_v33  ;;  %v1928_v33 = vld [vmem:[#allocation8 + $0xb0] sm:$0xff]  ;;  %v7215_v43 = vmax.f32 %v5075_v42, 0.0 }
 0x1bf   : > { %2278 = vmatprep.mubr.f32.mxu0 %v7212_v9  ;;  %2715 = vmatpush1.msra.mxu0 %v1936_v47  ;;  %v5093_v56 = vpop.f32.mrf.mxu0  ;;  %v5099_v9 = vadd.f32 %v4831_v7, %v861_v6  ;;  %v867_v47 = vadd.f32 %v4841_v53, %v4897_v5  ;;  %v1921_v7 = vld [vmem:[#allocation8 + $0x78] sm:$0xff]  ;;  %v5113_v53 = vadd.f32 %v4823_v23, %v859_v38 }
 0x1c0   : > { %v5095_v31 = vpop.f32.mrf.mxu1  ;;  %2716 = vmatprep.subr.mxu0 %v1933_v37  ;;  %v1924_v37 = vld [vmem:[#allocation8 + $0x90] sm:$0xff]  ;;  %v1917_v23 = vld [vmem:[#allocation8 + $0x58] sm:$0xff] }
 0x1c1   : > { %7545 = vst [vmem:[#allocation44_spill] sm:$0xff] %v5099_v9  ;;  %2717 = vmatpush1.msra.mxu0 %v1932_v58  ;;  %v5103_v0 = vpop.f32.mrf.mxu0  ;;  %7547 = vst [vmem:[#allocation45_spill] sm:$0xff] %v5113_v53  ;;  %v865_v58 = vadd.f32 %v4833_v21, %v4909_v59  ;;  %v7549_v21 = vmax.f32 %v5089_v61, 0.0 }
 0x1c2   : > { %v5105_v22 = vpop.f32.mrf.mxu1  ;;  %2279 = vmatmul.mubr.f32.gmra.mxu0 %v7546_v13  ;;  %2718 = vmatprep.subr.mxu0 %v1929_v4  ;;  %v1920_v4 = vld [vmem:[#allocation8 + $0x70] sm:$0xff]  ;;  %v7218_v13 = vmax.f32 %v5099_v9, 0.0 }
 0x1c3   : > { %2284 = vmatprep.mubr.f32.mxu0 %v7215_v43  ;;  %2719 = vmatpush1.msra.mxu0 %v1928_v33  ;;  %v5117_v30 = vpop.f32.mrf.mxu0  ;;  %v5123_v43 = vadd.f32 %v4843_v19, %v867_v47  ;;  %v873_v33 = vadd.f32 %v4853_v10, %v4897_v5  ;;  %v1913_v19 = vld [vmem:[#allocation8 + $0x38] sm:$0xff]  ;;  %v5137_v10 = vadd.f32 %v4835_v18, %v865_v58 }
 0x1c4   : > { %v5119_v27 = vpop.f32.mrf.mxu1  ;;  %2720 = vmatprep.subr.mxu0 %v1925_v44  ;;  %v1916_v44 = vld [vmem:[#allocation8 + $0x50] sm:$0xff]  ;;  %v1909_v18 = vld [vmem:[#allocation8 + $0x18] sm:$0xff] }
 0x1c5   : > { %7548 = vst [vmem:[#allocation46_spill] sm:$0xff] %v5123_v43  ;;  %2721 = vmatpush1.msra.mxu0 %v1924_v37  ;;  %v5127_v38 = vpop.f32.mrf.mxu0  ;;  %7550 = vst [vmem:[#allocation47_spill] sm:$0xff] %v5137_v10  ;;  %v871_v37 = vadd.f32 %v4845_v25, %v4909_v59  ;;  %v7552_v25 = vmax.f32 %v5113_v53, 0.0 }
 0x1c6   : > { %v5129_v6 = vpop.f32.mrf.mxu1  ;;  %2285 = vmatmul.mubr.f32.gmra.mxu0 %v7549_v21  ;;  %2722 = vmatprep.subr.mxu0 %v1921_v7  ;;  %v1912_v7 = vld [vmem:[#allocation8 + $0x30] sm:$0xff]  ;;  %v7221_v21 = vmax.f32 %v5123_v43, 0.0 }
 0x1c7   : > { %2290 = vmatprep.mubr.f32.mxu0 %v7218_v13  ;;  %2723 = vmatpush1.msra.mxu0 %v1920_v4  ;;  %v5141_v42 = vpop.f32.mrf.mxu0  ;;  %v5147_v13 = vadd.f32 %v4855_v11, %v873_v33  ;;  %v879_v4 = vadd.f32 %v4868_v26, %v4897_v5  ;;  %v2033_v11 = vld [vmem:[#allocation8 + $0x3f8] sm:$0xff]  ;;  %v5161_v26 = vadd.f32 %v4847_v35, %v871_v37 }
 0x1c8   : > { %v5143_v3 = vpop.f32.mrf.mxu1  ;;  %2724 = vmatprep.subr.mxu0 %v1917_v23  ;;  %v1908_v23 = vld [vmem:[#allocation8 + $0x10] sm:$0xff]  ;;  %v2029_v35 = vld [vmem:[#allocation8 + $0x3d8] sm:$0xff] }
 0x1c9   : > { %7551 = vst [vmem:[#allocation48_spill] sm:$0xff] %v5147_v13  ;;  %2725 = vmatpush1.msra.mxu0 %v1916_v44  ;;  %v5151_v58 = vpop.f32.mrf.mxu0  ;;  %7553 = vst [vmem:[#allocation49_spill] sm:$0xff] %v5161_v26  ;;  %v877_v44 = vadd.f32 %v4857_v45, %v4909_v59  ;;  %v7556_v45 = vmax.f32 %v5137_v10, 0.0  ;;  %v7563_v10 = vld [vmem:[#allocation18_spill] sm:$0xff] }
 0x1ca   : > { %v5153_v47 = vpop.f32.mrf.mxu1  ;;  %2291 = vmatmul.mubr.f32.gmra.mxu0 %v7552_v25  ;;  %2726 = vmatprep.subr.mxu0 %v1913_v19  ;;  %v2032_v19 = vld [vmem:[#allocation8 + $0x3f0] sm:$0xff]  ;;  %v7224_v25 = vmax.f32 %v5147_v13, 0.0 }
 0x1cb   : > { %2296 = vmatprep.mubr.f32.mxu0 %v7221_v21  ;;  %2727 = vmatpush1.msra.mxu0 %v1912_v7  ;;  %v5165_v9 = vpop.f32.mrf.mxu0  ;;  %v5171_v21 = vadd.f32 %v4870_v8, %v879_v4  ;;  %v885_v7 = vadd.f32 %v4891_v2, %v4897_v5  ;;  %v2025_v8 = vld [vmem:[#allocation8 + $0x3b8] sm:$0xff]  ;;  %v5185_v2 = vadd.f32 %v4859_v46, %v877_v44 }
 0x1cc   : > { %v5167_v61 = vpop.f32.mrf.mxu1  ;;  %2728 = vmatprep.subr.mxu0 %v1909_v18  ;;  %v2028_v18 = vld [vmem:[#allocation8 + $0x3d0] sm:$0xff]  ;;  %v2021_v46 = vld [vmem:[#allocation8 + $0x398] sm:$0xff] }
 0x1cd   : > { %7554 = vst [vmem:[#allocation50_spill] sm:$0xff] %v5171_v21  ;;  %2729 = vmatpush1.msra.mxu0 %v1908_v23  ;;  %v5175_v37 = vpop.f32.mrf.mxu0  ;;  %7557 = vst [vmem:[#allocation52_spill] sm:$0xff] %v5185_v2  ;;  %v883_v23 = vadd.f32 %v4875_v41, %v4909_v59  ;;  %v7562_v41 = vmax.f32 %v5161_v26, 0.0  ;;  %v7572_v26 = vld [vmem:[#allocation22_spill] sm:$0xff] }
 0x1ce   : > { %v5177_v33 = vpop.f32.mrf.mxu1  ;;  %2297 = vmatmul.mubr.f32.gmra.mxu0 %v7556_v45  ;;  %2730 = vmatprep.subr.mxu0 %v2033_v11  ;;  %v2024_v11 = vld [vmem:[#allocation8 + $0x3b0] sm:$0xff]  ;;  %v7228_v45 = vmax.f32 %v5171_v21, 0.0  ;;  %v7567_v21 = vld [vmem:[#allocation24_spill] sm:$0xff] }
 0x1cf   : > { %7555 = vst [vmem:[#allocation51_spill] sm:$0xff] %v5177_v33  ;;  %2302 = vmatprep.mubr.f32.mxu0 %v7224_v25  ;;  %2731 = vmatpush2.msra.mxu0 %v2032_v19  ;;  %v5189_v43 = vpop.f32.mrf.mxu0  ;;  %v5195_v25 = vadd.f32 %v4893_v15, %v885_v7  ;;  %v7559_v19 = vld [vmem:[#allocation23_spill] sm:$0xff]  ;;  %v2017_v15 = vld [vmem:[#allocation8 + $0x378] sm:$0xff] }
 0x1d0   : > { %v5191_v53 = vpop.f32.mrf.mxu1  ;;  %2732 = vmatprep.subr.mxu0 %v2029_v35  ;;  %v891_v4 = vadd.f32 %v7559_v19, %v4897_v5  ;;  %v2020_v35 = vld [vmem:[#allocation8 + $0x390] sm:$0xff]  ;;  %v5209_v19 = vadd.f32 %v7563_v10, %v883_v23  ;;  %v2013_v10 = vld [vmem:[#allocation8 + $0x358] sm:$0xff] }
 0x1d1   : > { %7558 = vst [vmem:[#allocation53_spill] sm:$0xff] %v5195_v25  ;;  %2733 = vmatpush2.msra.mxu0 %v2028_v18  ;;  %v5199_v44 = vpop.f32.mrf.mxu0  ;;  %v7565_v18 = vld [vmem:[#allocation21_spill] sm:$0xff] }
 0x1d2   : > { %7560 = vst [vmem:[#allocation54_spill] sm:$0xff] %v5199_v44  ;;  %v5201_v13 = vpop.f32.mrf.mxu1  ;;  %2303 = vmatmul.mubr.f32.gmra.mxu0 %v7562_v41  ;;  %2734 = vmatprep.subr.mxu0 %v2025_v8  ;;  %7564 = vst [vmem:[#allocation56_spill] sm:$0xff] %v5209_v19  ;;  %v889_v44 = vadd.f32 %v7565_v18, %v4909_v59  ;;  %v2016_v8 = vld [vmem:[#allocation8 + $0x370] sm:$0xff]  ;;  %v7231_v41 = vmax.f32 %v5195_v25, 0.0  ;;  %v7571_v18 = vmax.f32 %v5185_v2, 0.0  ;;  %v7575_v25 = vld [vmem:[#allocation27_spill] sm:$0xff] }
 0x1d3   : > { %7561 = vst [vmem:[#allocation55_spill] sm:$0xff] %v5201_v13  ;;  %2308 = vmatprep.mubr.f32.mxu0 %v7228_v45  ;;  %2735 = vmatpush2.msra.mxu0 %v2024_v11  ;;  %v5213_v33 = vpop.f32.mrf.mxu0  ;;  %v5219_v45 = vadd.f32 %v7567_v21, %v891_v4  ;;  %v897_v11 = vadd.f32 %v4927_v34, %v4897_v5  ;;  %v2009_v21 = vld [vmem:[#allocation8 + $0x338] sm:$0xff] }
 0x1d4   : > { %v5215_v13 = vpop.f32.mrf.mxu1  ;;  %2736 = vmatprep.subr.mxu0 %v2021_v46  ;;  %v2012_v46 = vld [vmem:[#allocation8 + $0x350] sm:$0xff]  ;;  %v5233_v34 = vadd.f32 %v7572_v26, %v889_v44  ;;  %v2005_v26 = vld [vmem:[#allocation8 + $0x318] sm:$0xff] }
 0x1d5   : > { %7566 = vst [vmem:[#allocation57_spill] sm:$0xff] %v5215_v13  ;;  %7568 = vst [vmem:[#allocation58_spill] sm:$0xff] %v5219_v45  ;;  %2737 = vmatpush2.msra.mxu0 %v2020_v35  ;;  %v5223_v23 = vpop.f32.mrf.mxu0  ;;  %v7574_v35 = vld [vmem:[#allocation25_spill] sm:$0xff]  ;;  %v7580_v2 = vld [vmem:[#allocation26_spill] sm:$0xff] }
 0x1d6   : > { %7569 = vst [vmem:[#allocation59_spill] sm:$0xff] %v5223_v23  ;;  %v5225_v7 = vpop.f32.mrf.mxu1  ;;  %2309 = vmatmul.mubr.f32.gmra.mxu0 %v7571_v18  ;;  %2738 = vmatprep.subr.mxu0 %v2017_v15  ;;  %7573 = vst [vmem:[#allocation61_spill] sm:$0xff] %v5233_v34  ;;  %v895_v23 = vadd.f32 %v7574_v35, %v4909_v59  ;;  %v2008_v15 = vld [vmem:[#allocation8 + $0x330] sm:$0xff]  ;;  %v7234_v18 = vmax.f32 %v5219_v45, 0.0  ;;  %v7579_v35 = vmax.f32 %v5209_v19, 0.0  ;;  %v7582_v45 = vld [vmem:[#allocation31_spill] sm:$0xff] }
 0x1d7   : > { %7570 = vst [vmem:[#allocation60_spill] sm:$0xff] %v5225_v7  ;;  %2314 = vmatprep.mubr.f32.mxu0 %v7231_v41  ;;  %2739 = vmatpush2.msra.mxu0 %v2016_v8  ;;  %v5237_v13 = vpop.f32.mrf.mxu0  ;;  %v5243_v41 = vadd.f32 %v7575_v25, %v897_v11  ;;  %v903_v8 = vadd.f32 %v4949_v1, %v4897_v5  ;;  %v2001_v25 = vld [vmem:[#allocation8 + $0x2f8] sm:$0xff]  ;;  %v7587_v19 = vld [vmem:[#allocation29_spill] sm:$0xff] }
 0x1d8   : > { %v5239_v7 = vpop.f32.mrf.mxu1  ;;  %2740 = vmatprep.subr.mxu0 %v2013_v10  ;;  %v2004_v10 = vld [vmem:[#allocation8 + $0x310] sm:$0xff]  ;;  %v5257_v1 = vadd.f32 %v7580_v2, %v895_v23  ;;  %v1997_v2 = vld [vmem:[#allocation8 + $0x2d8] sm:$0xff] }
 0x1d9   : > { %7576 = vst [vmem:[#allocation62_spill] sm:$0xff] %v5243_v41  ;;  %2741 = vmatpush2.msra.mxu0 %v2012_v46  ;;  %v5247_v44 = vpop.f32.mrf.mxu0  ;;  %v901_v46 = vadd.f32 %v4936_v12, %v4909_v59  ;;  %v7586_v12 = vmax.f32 %v5233_v34, 0.0 }
 0x1da   : > { %7577 = vst [vmem:[#allocation63_spill] sm:$0xff] %v5247_v44  ;;  %v5249_v4 = vpop.f32.mrf.mxu1  ;;  %2315 = vmatmul.mubr.f32.gmra.mxu0 %v7579_v35  ;;  %2742 = vmatprep.subr.mxu0 %v2009_v21  ;;  %7581 = vst [vmem:[#allocation65_spill] sm:$0xff] %v5257_v1  ;;  %v2000_v21 = vld [vmem:[#allocation8 + $0x2f0] sm:$0xff]  ;;  %v7236_v35 = vmax.f32 %v5243_v41, 0.0 }
 0x1db   : > { %7578 = vst [vmem:[#allocation64_spill] sm:$0xff] %v5249_v4  ;;  %2320 = vmatprep.mubr.f32.mxu0 %v7234_v18  ;;  %2743 = vmatpush2.msra.mxu0 %v2008_v15  ;;  %v5261_v44 = vpop.f32.mrf.mxu0  ;;  %v5267_v18 = vadd.f32 %v7582_v45, %v903_v8  ;;  %v909_v15 = vadd.f32 %v4973_v54, %v4897_v5  ;;  %v1993_v45 = vld [vmem:[#allocation8 + $0x2b8] sm:$0xff] }
 0x1dc   : > { %v5263_v4 = vpop.f32.mrf.mxu1  ;;  %2744 = vmatprep.subr.mxu0 %v2005_v26  ;;  %v1996_v26 = vld [vmem:[#allocation8 + $0x2d0] sm:$0xff]  ;;  %v5281_v54 = vadd.f32 %v7587_v19, %v901_v46  ;;  %v1989_v19 = vld [vmem:[#allocation8 + $0x298] sm:$0xff] }
 0x1dd   : > { %7583 = vst [vmem:[#allocation66_spill] sm:$0xff] %v5267_v18  ;;  %2745 = vmatpush2.msra.mxu0 %v2004_v10  ;;  %v5271_v23 = vpop.f32.mrf.mxu0  ;;  %v907_v10 = vadd.f32 %v4959_v36, %v4909_v59  ;;  %v7590_v36 = vmax.f32 %v5257_v1, 0.0  ;;  %v919_v1 = vadd.f32 %v5007_v57, %v4909_v59 }
 0x1de   : > { %7584 = vst [vmem:[#allocation67_spill] sm:$0xff] %v5271_v23  ;;  %v5273_v11 = vpop.f32.mrf.mxu1  ;;  %2321 = vmatmul.mubr.f32.gmra.mxu0 %v7586_v12  ;;  %2746 = vmatprep.subr.mxu0 %v2001_v25  ;;  %7588 = vst [vmem:[#allocation69_spill] sm:$0xff] %v5281_v54  ;;  %v1992_v25 = vld [vmem:[#allocation8 + $0x2b0] sm:$0xff]  ;;  %v7239_v12 = vmax.f32 %v5267_v18, 0.0  ;;  %v7593_v18 = vld [vmem:[#allocation16_spill] sm:$0xff] }
 0x1df   : > { %7585 = vst [vmem:[#allocation68_spill] sm:$0xff] %v5273_v11  ;;  %2326 = vmatprep.mubr.f32.mxu0 %v7236_v35  ;;  %2747 = vmatpush2.msra.mxu0 %v2000_v21  ;;  %v5285_v23 = vpop.f32.mrf.mxu0  ;;  %v5291_v35 = vadd.f32 %v4975_v29, %v909_v15  ;;  %v915_v21 = vadd.f32 %v4997_v51, %v4897_v5  ;;  %v1985_v29 = vld [vmem:[#allocation8 + $0x278] sm:$0xff] }
 0x1e0   : > { %v5287_v11 = vpop.f32.mrf.mxu1  ;;  %2748 = vmatprep.subr.mxu0 %v1997_v2  ;;  %v1988_v2 = vld [vmem:[#allocation8 + $0x290] sm:$0xff]  ;;  %v5305_v51 = vadd.f32 %v4961_v32, %v907_v10  ;;  %v1981_v32 = vld [vmem:[#allocation8 + $0x258] sm:$0xff] }
 0x1e1   : > { %7589 = vst [vmem:[#allocation70_spill] sm:$0xff] %v5291_v35  ;;  %2749 = vmatpush2.msra.mxu0 %v1996_v26  ;;  %v5295_v46 = vpop.f32.mrf.mxu0  ;;  %v913_v26 = vadd.f32 %v4983_v39, %v4909_v59  ;;  %v7592_v39 = vmax.f32 %v5281_v54, 0.0 }
 0x1e2   : > { %v5297_v8 = vpop.f32.mrf.mxu1  ;;  %2327 = vmatmul.mubr.f32.gmra.mxu0 %v7590_v36  ;;  %2750 = vmatprep.subr.mxu0 %v1993_v45  ;;  %7591 = vst [vmem:[#allocation71_spill] sm:$0xff] %v5305_v51  ;;  %v1984_v45 = vld [vmem:[#allocation8 + $0x270] sm:$0xff]  ;;  %v7243_v36 = vmax.f32 %v5291_v35, 0.0 }
 0x1e3   : > { %2332 = vmatprep.mubr.f32.mxu0 %v7239_v12  ;;  %2751 = vmatpush2.msra.mxu0 %v1992_v25  ;;  %v5309_v41 = vpop.f32.mrf.mxu0  ;;  %v5315_v12 = vadd.f32 %v4999_v50, %v915_v21  ;;  %v921_v25 = vadd.f32 %v5021_v24, %v4897_v5  ;;  %v5328_v50 = vsub.s32 2, %v7593_v18  ;;  %v1977_v21 = vld [vmem:[#allocation8 + $0x238] sm:$0xff] }
 0x1e4   : > { %v5311_v34 = vpop.f32.mrf.mxu1  ;;  %2752 = vmatprep.subr.mxu0 %v1989_v19  ;;  %v1980_v19 = vld [vmem:[#allocation8 + $0x250] sm:$0xff] }
 0x1e5   : > { %2753 = vmatpush2.msra.mxu0 %v1988_v2  ;;  %v5319_v10 = vpop.f32.mrf.mxu0  ;;  %7594 = vst [vmem:[#allocation72_spill] sm:$0xff] %v5328_v50  ;;  %v5332_v2 = vadd.f32 %v4985_v60, %v913_v26  ;;  %v5342_v35 = vadd.f32 %v5023_v52, %v921_v25  ;;  %v5347_v60 = vsub.s32 3, %v7593_v18  ;;  %v1973_v26 = vld [vmem:[#allocation8 + $0x218] sm:$0xff]  ;;  %v7599_v52 = vmax.f32 %v5315_v12, 0.0  ;;  %v7600_v25 = vld [vmem:[#allocation19_spill] sm:$0xff] }
 0x1e6   : > { %v5321_v15 = vpop.f32.mrf.mxu1  ;;  %2333 = vmatmul.mubr.f32.gmra.mxu0 %v7592_v39  ;;  %2754 = vmatprep.subr.mxu0 %v1985_v29  ;;  %v1976_v39 = vld [vmem:[#allocation8 + $0x230] sm:$0xff]  ;;  %v5363_v18 = vadd.f32 %v5009_v48, %v919_v1 }
 0x1e7   : > { %2338 = vmatprep.mubr.f32.mxu0 %v7243_v36  ;;  %2755 = vmatpush2.msra.mxu0 %v1984_v45  ;;  %v5336_v54 = vpop.f32.mrf.mxu0  ;;  %7595 = vst [vmem:[#allocation73_spill] sm:$0xff] %v5342_v35  ;;  %v927_v45 = vadd.f32 %v5045_v16, %v4897_v5  ;;  %7596 = vst [vmem:[#allocation74_spill] sm:$0xff] %v5347_v60  ;;  %v1972_v36 = vld [vmem:[#allocation8 + $0x210] sm:$0xff]  ;;  %v5359_v16 = vrot.slane %v7600_v25, %v5328_v50 }
 0x1e8   : > { %v5338_v29 = vpop.f32.mrf.mxu1  ;;  %2756 = vmatprep.subr.mxu0 %v1981_v32  ;;  %v7598_v32 = vmax.f32 %v5305_v51, 0.0  ;;  %v5379_v48 = vrot.slane %v7600_v25, %v5347_v60 }
 0x1e9   : > { %2757 = vmatpush2.msra.mxu0 %v1980_v19  ;;  %v5349_v57 = vpop.f32.mrf.mxu0  ;;  %v7249_v19 = vmax.f32 %v5332_v2, 0.0 }
 0x1ea   : > { %v5351_v24 = vpop.f32.mrf.mxu1  ;;  %2339 = vmatmul.mubr.f32.gmra.mxu0 %v7598_v32  ;;  %2758 = vmatprep.subr.mxu0 %v1977_v21  ;;  %v7250_v32 = vmax.f32 %v5342_v35, 0.0 }
 0x1eb   : > { %7597 = vst [vmem:[#allocation75_spill] sm:$0xff] %v5351_v24  ;;  %2344 = vmatprep.mubr.f32.mxu0 %v7599_v52  ;;  %2759 = vmatpush2.msra.mxu0 %v1976_v39  ;;  %v925_v24 = vadd.f32 %v5031_v28, %v4909_v59  ;;  %v5367_v51 = vpop.f32.mrf.mxu0  ;;  %v5373_v52 = vadd.f32 %v5047_v55, %v927_v45 }
 0x1ec   : > { %v5369_v21 = vpop.f32.mrf.mxu1  ;;  %2760 = vmatprep.subr.mxu0 %v1973_v26  ;;  %v933_v39 = vadd.f32 %v5069_v49, %v4897_v5  ;;  %v931_v49 = vadd.f32 %v5055_v17, %v4909_v59 }
 0x1ed   : > { %2761 = vmatpush2.msra.mxu0 %v1972_v36  ;;  %v1330_v1 = vpop.f32.mrf.mxu0  ;;  %v5388_v45 = vadd.f32 %v5033_v20, %v925_v24  ;;  %v939_v36 = vadd.f32 %v5093_v56, %v4897_v5  ;;  %v7603_v24 = vmax.f32 %v5363_v18, 0.0 }
 0x1ee   : > { %v1587_v28 = vpop.f32.mrf.mxu1  ;;  %2345 = vmatmul.mubr.f32.gmra.mxu0 %v7249_v19  ;;  %v1331_v26 = vadd.f32 %v1330_v1, %v5359_v16  ;;  %v7254_v19 = vmax.f32 %v5373_v52, 0.0  ;;  %v5396_v1 = vadd.f32 %v5071_v62, %v933_v39  ;;  %v5410_v62 = vadd.f32 %v5057_v63, %v931_v49 }
 0x1ef   : > { %2350 = vmatprep.mubr.f32.mxu0 %v7250_v32  ;;  %v1332_v25 = vpop.f32.mrf.mxu0  ;;  %v7255_v35 = vmax.f32 %v5388_v45, 0.0  ;;  %v937_v39 = vadd.f32 %v5079_v40, %v4909_v59 }
 0x1f0   : > { %v1589_v60 = vpop.f32.mrf.mxu1  ;;  %7601 = vst [vmem:[#allocation76_spill] sm:$0xff] %v5396_v1  ;;  %v1333_v32 = vadd.f32 %v1332_v25, %v5379_v48  ;;  %v5399_v50 = vadd.f32 %v1587_v28, %v1331_v26  ;;  %v5415_v28 = vadd.f32 %v5095_v31, %v939_v36  ;;  %v2096_v31 = vld [vmem:[#allocation8 + $0x5f0] sm:$0xff] }
 0x1f1   : > { %v1336_v55 = vpop.f32.mrf.mxu0 }
 0x1f2   : > { %7602 = vst [vmem:[#allocation77_spill] sm:$0xff] %v5399_v50  ;;  %v1593_v20 = vpop.f32.mrf.mxu1  ;;  %2351 = vmatmul.mubr.f32.gmra.mxu0 %v7603_v24  ;;  %v5403_v17 = vadd.f32 %v1589_v60, %v1333_v32  ;;  %v1337_v56 = vadd.f32 %v1336_v55, %v5359_v16  ;;  %v945_v32 = vadd.f32 %v5117_v30, %v4897_v5  ;;  %v7604_v30 = vmax.f32 %v5396_v1, 0.0 }
 0x1f3   : > { %2356 = vmatprep.mubr.f32.mxu0 %v7254_v19  ;;  %v1338_v26 = vpop.f32.mrf.mxu0 }
 0x1f4   : > { %v1595_v25 = vpop.f32.mrf.mxu1  ;;  %v7256_v55 = vmax.f32 %v5403_v17, 0.0  ;;  %v1339_v24 = vadd.f32 %v1338_v26, %v5379_v48  ;;  %v5423_v49 = vadd.f32 %v1593_v20, %v1337_v56  ;;  %v2093_v26 = vld [vmem:[#allocation8 + $0x5d8] sm:$0xff]  ;;  %v5436_v56 = vadd.f32 %v5081_v14, %v937_v39 }
 0x1f5   : > { %v1342_v19 = vpop.f32.mrf.mxu0 }
 0x1f6   : > { %v1599_v40 = vpop.f32.mrf.mxu1  ;;  %2357 = vmatmul.mubr.f32.gmra.mxu0 %v7255_v35  ;;  %v5427_v36 = vadd.f32 %v1595_v25, %v1339_v24  ;;  %v1343_v60 = vadd.f32 %v1342_v19, %v5359_v16  ;;  %2505 = vmatprep.mubr.f32.mxu1 %v7256_v55  ;;  %v943_v25 = vadd.f32 %v5103_v0, %v4909_v59  ;;  %v7605_v19 = vmax.f32 %v5399_v50, 0.0 }
 0x1f7   : > { %2362 = vmatprep.mubr.f32.mxu0 %v7604_v30  ;;  %v1344_v24 = vpop.f32.mrf.mxu0  ;;  %v5444_v30 = vadd.f32 %v5119_v27, %v945_v32  ;;  %v951_v55 = vadd.f32 %v5141_v42, %v4897_v5  ;;  %v7260_v39 = vmax.f32 %v5423_v49, 0.0  ;;  %v7606_v50 = vmax.f32 %v5410_v62, 0.0  ;;  %v2092_v27 = vld [vmem:[#allocation8 + $0x5d0] sm:$0xff] }
 0x1f8   : > { %v1601_v35 = vpop.f32.mrf.mxu1  ;;  %2506 = vmatmul.mubr.f32.vlgmr.msra.gmra.mxu1 %v7605_v19  ;;  %v7259_v20 = vmax.f32 %v5427_v36, 0.0  ;;  %v1345_v14 = vadd.f32 %v1344_v24, %v5379_v48  ;;  %v5451_v63 = vadd.f32 %v1599_v40, %v1343_v60  ;;  %v7607_v19 = vmax.f32 %v5415_v28, 0.0 }
 0x1f9   : > { %2956 = vmatpush1.msra.mxu1 %v2096_v31  ;;  %v1348_v0 = vpop.f32.mrf.mxu0  ;;  %v2089_v31 = vld [vmem:[#allocation8 + $0x5b8] sm:$0xff]  ;;  %v7261_v60 = vmax.f32 %v5436_v56, 0.0  ;;  %v5464_v40 = vadd.f32 %v5105_v22, %v943_v25 }
 0x1fa   : > { %v1605_v1 = vpop.f32.mrf.mxu1  ;;  %2363 = vmatmul.mubr.f32.gmra.mxu0 %v7606_v50  ;;  %2957 = vmatprep.subr.mxu1 %v2093_v26  ;;  %v5455_v32 = vadd.f32 %v1601_v35, %v1345_v14  ;;  %v1349_v42 = vadd.f32 %v1348_v0, %v5359_v16  ;;  %v949_v50 = vadd.f32 %v5127_v38, %v4909_v59  ;;  %v7262_v38 = vmax.f32 %v5451_v63, 0.0 }
 0x1fb   : > { %2368 = vmatprep.mubr.f32.mxu0 %v7607_v19  ;;  %2511 = vmatprep.mubr.f32.mxu1 %v7259_v20  ;;  %v957_v35 = vadd.f32 %v5165_v9, %v4897_v5  ;;  %v1350_v26 = vpop.f32.mrf.mxu0  ;;  %v5474_v0 = vadd.f32 %v5143_v3, %v951_v55  ;;  %v7608_v55 = vmax.f32 %v5444_v30, 0.0 }
 0x1fc   : > { %v1607_v24 = vpop.f32.mrf.mxu1  ;;  %2512 = vmatmul.mubr.f32.gmra.mxu1 %v7260_v39  ;;  %v7263_v19 = vmax.f32 %v5455_v32, 0.0  ;;  %v1351_v22 = vadd.f32 %v1350_v26, %v5379_v48  ;;  %v5479_v25 = vadd.f32 %v1605_v1, %v1349_v42  ;;  %v2088_v39 = vld [vmem:[#allocation8 + $0x5b0] sm:$0xff]  ;;  %v7265_v1 = vmax.f32 %v5464_v40, 0.0 }
 0x1fd   : > { %2958 = vmatpush1.msra.mxu1 %v2092_v27  ;;  %v1354_v9 = vpop.f32.mrf.mxu0  ;;  %v2085_v27 = vld [vmem:[#allocation8 + $0x598] sm:$0xff]  ;;  %v5492_v42 = vadd.f32 %v5129_v6, %v949_v50  ;;  %v5497_v26 = vadd.f32 %v5167_v61, %v957_v35 }
 0x1fe   : > { %v1611_v20 = vpop.f32.mrf.mxu1  ;;  %2369 = vmatmul.mubr.f32.gmra.mxu0 %v7261_v60  ;;  %2959 = vmatprep.subr.mxu1 %v2089_v31  ;;  %v5483_v14 = vadd.f32 %v1607_v24, %v1351_v22  ;;  %v1355_v3 = vadd.f32 %v1354_v9, %v5359_v16  ;;  %v955_v31 = vadd.f32 %v5151_v58, %v4909_v59  ;;  %v7264_v9 = vmax.f32 %v5474_v0, 0.0 }
 0x1ff   : > { %2374 = vmatprep.mubr.f32.mxu0 %v7608_v55  ;;  %2517 = vmatprep.mubr.f32.mxu1 %v7263_v19  ;;  %7609 = vst [vmem:[#allocation78_spill] sm:$0xff] %v5492_v42  ;;  %7610 = vst [vmem:[#allocation79_spill] sm:$0xff] %v5497_v26  ;;  %v1356_v24 = vpop.f32.mrf.mxu0  ;;  %v963_v55 = vadd.f32 %v5189_v43, %v4897_v5  ;;  %v7267_v58 = vmax.f32 %v5479_v25, 0.0 }
 0x200   : > { %v1613_v22 = vpop.f32.mrf.mxu1  ;;  %2518 = vmatmul.mubr.f32.gmra.mxu1 %v7262_v38  ;;  %v7266_v60 = vmax.f32 %v5483_v14, 0.0  ;;  %v1357_v6 = vadd.f32 %v1356_v24, %v5379_v48  ;;  %v5507_v50 = vadd.f32 %v1611_v20, %v1355_v3  ;;  %v2084_v38 = vld [vmem:[#allocation8 + $0x590] sm:$0xff]  ;;  %v7268_v20 = vmax.f32 %v5492_v42, 0.0 }
 0x201   : > { %2960 = vmatpush1.msra.mxu1 %v2088_v39  ;;  %v1360_v61 = vpop.f32.mrf.mxu0  ;;  %v2081_v39 = vld [vmem:[#allocation8 + $0x578] sm:$0xff]  ;;  %v5520_v3 = vadd.f32 %v5153_v47, %v955_v31 }
 0x202   : > { %v1617_v35 = vpop.f32.mrf.mxu1  ;;  %2375 = vmatmul.mubr.f32.gmra.mxu0 %v7265_v1  ;;  %2961 = vmatprep.subr.mxu1 %v2085_v27  ;;  %v5511_v19 = vadd.f32 %v1613_v22, %v1357_v6  ;;  %v1361_v43 = vadd.f32 %v1360_v61, %v5359_v16  ;;  %v961_v27 = vadd.f32 %v5175_v37, %v4909_v59  ;;  %v7273_v31 = vmax.f32 %v5507_v50, 0.0 }
 0x203   : > { %2380 = vmatprep.mubr.f32.mxu0 %v7264_v9  ;;  %2523 = vmatprep.mubr.f32.mxu1 %v7266_v60  ;;  %v1362_v22 = vpop.f32.mrf.mxu0  ;;  %v5528_v61 = vadd.f32 %v5191_v53, %v963_v55  ;;  %v969_v9 = vadd.f32 %v5213_v33, %v4897_v5  ;;  %v2080_v53 = vld [vmem:[#allocation8 + $0x570] sm:$0xff] }
 0x204   : > { %7611 = vst [vmem:[#allocation80_spill] sm:$0xff] %v5511_v19  ;;  %v1619_v6 = vpop.f32.mrf.mxu1  ;;  %2524 = vmatmul.mubr.f32.gmra.mxu1 %v7267_v58  ;;  %v7269_v1 = vmax.f32 %v5511_v19, 0.0  ;;  %v1363_v47 = vadd.f32 %v1362_v22, %v5379_v48  ;;  %v5535_v60 = vadd.f32 %v1617_v35, %v1361_v43  ;;  %v7613_v58 = vmax.f32 %v5497_v26, 0.0  ;;  %v7614_v43 = vld [vmem:[#allocation51_spill] sm:$0xff] }
 0x205   : > { %7612 = vst [vmem:[#allocation81_spill] sm:$0xff] %v5528_v61  ;;  %2962 = vmatpush1.msra.mxu1 %v2084_v38  ;;  %v1366_v37 = vpop.f32.mrf.mxu0  ;;  %v2077_v38 = vld [vmem:[#allocation8 + $0x558] sm:$0xff]  ;;  %v5548_v22 = vadd.f32 %v7614_v43, %v961_v27  ;;  %v7620_v19 = vmax.f32 %v5520_v3, 0.0 }
 0x206   : > { %v1623_v24 = vpop.f32.mrf.mxu1  ;;  %2381 = vmatmul.mubr.f32.gmra.mxu0 %v7268_v20  ;;  %2963 = vmatprep.subr.mxu1 %v2081_v39  ;;  %v5539_v55 = vadd.f32 %v1619_v6, %v1363_v47  ;;  %v1367_v33 = vadd.f32 %v1366_v37, %v5359_v16  ;;  %v7616_v20 = vld [vmem:[#allocation54_spill] sm:$0xff]  ;;  %v975_v6 = vadd.f32 %v5237_v13, %v4897_v5 }
 0x207   : > { %2386 = vmatprep.mubr.f32.mxu0 %v7613_v58  ;;  %2529 = vmatprep.mubr.f32.mxu1 %v7269_v1  ;;  %7615 = vst [vmem:[#allocation82_spill] sm:$0xff] %v5548_v22  ;;  %v967_v39 = vadd.f32 %v7616_v20, %v4909_v59  ;;  %v1368_v47 = vpop.f32.mrf.mxu0  ;;  %v7617_v1 = vld [vmem:[#allocation57_spill] sm:$0xff]  ;;  %v7276_v20 = vmax.f32 %v5535_v60, 0.0 }
 0x208   : > { %v1625_v37 = vpop.f32.mrf.mxu1  ;;  %2530 = vmatmul.mubr.f32.gmra.mxu1 %v7273_v31  ;;  %v5558_v26 = vadd.f32 %v7617_v1, %v969_v9  ;;  %v7274_v35 = vmax.f32 %v5539_v55, 0.0  ;;  %v1369_v27 = vadd.f32 %v1368_v47, %v5379_v48  ;;  %v5563_v43 = vadd.f32 %v1623_v24, %v1367_v33  ;;  %v2076_v31 = vld [vmem:[#allocation8 + $0x550] sm:$0xff]  ;;  %v7622_v33 = vld [vmem:[#allocation55_spill] sm:$0xff] }
 0x209   : > { %2964 = vmatpush1.msra.mxu1 %v2080_v53  ;;  %v1372_v13 = vpop.f32.mrf.mxu0  ;;  %v7621_v9 = vmax.f32 %v5528_v61, 0.0  ;;  %v2073_v53 = vld [vmem:[#allocation8 + $0x538] sm:$0xff]  ;;  %v5576_v47 = vadd.f32 %v7622_v33, %v967_v39  ;;  %v7626_v61 = vmax.f32 %v5548_v22, 0.0 }
 0x20a   : > { %7618 = vst [vmem:[#allocation83_spill] sm:$0xff] %v5558_v26  ;;  %7619 = vst [vmem:[#allocation84_spill] sm:$0xff] %v5563_v43  ;;  %v1629_v42 = vpop.f32.mrf.mxu1  ;;  %2387 = vmatmul.mubr.f32.gmra.mxu0 %v7620_v19  ;;  %2965 = vmatprep.subr.mxu1 %v2077_v38  ;;  %v5567_v58 = vadd.f32 %v1625_v37, %v1369_v27  ;;  %v1373_v1 = vadd.f32 %v1372_v13, %v5359_v16  ;;  %v7624_v19 = vld [vmem:[#allocation59_spill] sm:$0xff]  ;;  %v7627_v24 = vmax.f32 %v5558_v26, 0.0 }
 0x20b   : > { %2392 = vmatprep.mubr.f32.mxu0 %v7621_v9  ;;  %2535 = vmatprep.mubr.f32.mxu1 %v7274_v35  ;;  %7623 = vst [vmem:[#allocation85_spill] sm:$0xff] %v5576_v47  ;;  %v973_v38 = vadd.f32 %v7624_v19, %v4909_v59  ;;  %v5581_v37 = vadd.f32 %v5239_v7, %v975_v6  ;;  %v1374_v27 = vpop.f32.mrf.mxu0 }
 0x20c   : > { %v1631_v13 = vpop.f32.mrf.mxu1  ;;  %2536 = vmatmul.mubr.f32.gmra.mxu1 %v7276_v20  ;;  %v981_v35 = vadd.f32 %v5261_v44, %v4897_v5  ;;  %v1375_v39 = vadd.f32 %v1374_v27, %v5379_v48  ;;  %v5591_v19 = vadd.f32 %v1629_v42, %v1373_v1  ;;  %v2072_v20 = vld [vmem:[#allocation8 + $0x530] sm:$0xff]  ;;  %v2069_v27 = vld [vmem:[#allocation8 + $0x518] sm:$0xff]  ;;  %v7629_v1 = vld [vmem:[#allocation60_spill] sm:$0xff] }
 0x20d   : > { %7625 = vst [vmem:[#allocation23_spill] sm:$0xff] %v5581_v37  ;;  %2966 = vmatpush1.msra.mxu1 %v2076_v31  ;;  %v1378_v7 = vpop.f32.mrf.mxu0  ;;  %v7628_v31 = vmax.f32 %v5567_v58, 0.0  ;;  %v5604_v33 = vadd.f32 %v7629_v1, %v973_v38 }
 0x20e   : > { %v1635_v6 = vpop.f32.mrf.mxu1  ;;  %2393 = vmatmul.mubr.f32.gmra.mxu0 %v7626_v61  ;;  %2967 = vmatprep.subr.mxu1 %v2073_v53  ;;  %v5595_v9 = vadd.f32 %v1631_v13, %v1375_v39  ;;  %v1379_v44 = vadd.f32 %v1378_v7, %v5359_v16  ;;  %v7630_v53 = vld [vmem:[#allocation63_spill] sm:$0xff]  ;;  %v7631_v7 = vmax.f32 %v5563_v43, 0.0  ;;  %v7283_v1 = vmax.f32 %v5591_v19, 0.0 }
 0x20f   : > { %2398 = vmatprep.mubr.f32.mxu0 %v7627_v24  ;;  %2541 = vmatprep.mubr.f32.mxu1 %v7628_v31  ;;  %v979_v13 = vadd.f32 %v7630_v53, %v4909_v59  ;;  %v1380_v39 = vpop.f32.mrf.mxu0  ;;  %v5612_v24 = vadd.f32 %v5263_v4, %v981_v35  ;;  %v987_v31 = vadd.f32 %v5285_v23, %v4897_v5  ;;  %v7632_v43 = vmax.f32 %v5576_v47, 0.0  ;;  %v2068_v4 = vld [vmem:[#allocation8 + $0x510] sm:$0xff] }
 0x210   : > { %v1637_v22 = vpop.f32.mrf.mxu1  ;;  %2542 = vmatmul.mubr.f32.gmra.mxu1 %v7631_v7  ;;  %v7280_v42 = vmax.f32 %v5595_v9, 0.0  ;;  %v1381_v38 = vadd.f32 %v1380_v39, %v5379_v48  ;;  %v5619_v61 = vadd.f32 %v1635_v6, %v1379_v44  ;;  %v7633_v7 = vmax.f32 %v5581_v37, 0.0  ;;  %v7634_v44 = vld [vmem:[#allocation64_spill] sm:$0xff] }
 0x211   : > { %2968 = vmatpush1.msra.mxu1 %v2072_v20  ;;  %v1384_v53 = vpop.f32.mrf.mxu0  ;;  %v2065_v20 = vld [vmem:[#allocation8 + $0x4f8] sm:$0xff]  ;;  %v5632_v39 = vadd.f32 %v7634_v44, %v979_v13  ;;  %v7637_v47 = vmax.f32 %v5604_v33, 0.0 }
 0x212   : > { %v1641_v26 = vpop.f32.mrf.mxu1  ;;  %2399 = vmatmul.mubr.f32.gmra.mxu0 %v7632_v43  ;;  %2969 = vmatprep.subr.mxu1 %v2069_v27  ;;  %v5623_v35 = vadd.f32 %v1637_v22, %v1381_v38  ;;  %v1385_v23 = vadd.f32 %v1384_v53, %v5359_v16  ;;  %v7635_v43 = vld [vmem:[#allocation67_spill] sm:$0xff]  ;;  %v993_v22 = vadd.f32 %v5309_v41, %v4897_v5  ;;  %v7285_v44 = vmax.f32 %v5619_v61, 0.0 }
 0x213   : > { %2404 = vmatprep.mubr.f32.mxu0 %v7633_v7  ;;  %2547 = vmatprep.mubr.f32.mxu1 %v7280_v42  ;;  %v985_v27 = vadd.f32 %v7635_v43, %v4909_v59  ;;  %v1386_v38 = vpop.f32.mrf.mxu0  ;;  %v5642_v42 = vadd.f32 %v5287_v11, %v987_v31  ;;  %v7638_v31 = vmax.f32 %v5612_v24, 0.0 }
 0x214   : > { %v1643_v53 = vpop.f32.mrf.mxu1  ;;  %2548 = vmatmul.mubr.f32.gmra.mxu1 %v7283_v1  ;;  %v7284_v6 = vmax.f32 %v5623_v35, 0.0  ;;  %v1387_v13 = vadd.f32 %v1386_v38, %v5379_v48  ;;  %v5647_v43 = vadd.f32 %v1641_v26, %v1385_v23  ;;  %v2064_v1 = vld [vmem:[#allocation8 + $0x4f0] sm:$0xff]  ;;  %v7286_v26 = vmax.f32 %v5632_v39, 0.0  ;;  %v7639_v23 = vld [vmem:[#allocation68_spill] sm:$0xff] }
 0x215   : > { %2970 = vmatpush1.msra.mxu1 %v2068_v4  ;;  %v1390_v41 = vpop.f32.mrf.mxu0  ;;  %v2061_v4 = vld [vmem:[#allocation8 + $0x4d8] sm:$0xff]  ;;  %v5660_v38 = vadd.f32 %v7639_v23, %v985_v27 }
 0x216   : > { %7636 = vst [vmem:[#allocation18_spill] sm:$0xff] %v5647_v43  ;;  %v1647_v37 = vpop.f32.mrf.mxu1  ;;  %2405 = vmatmul.mubr.f32.gmra.mxu0 %v7637_v47  ;;  %2971 = vmatprep.subr.mxu1 %v2065_v20  ;;  %v5651_v7 = vadd.f32 %v1643_v53, %v1387_v13  ;;  %v1391_v11 = vadd.f32 %v1390_v41, %v5359_v16 }
 0x217   : > { %2410 = vmatprep.mubr.f32.mxu0 %v7638_v31  ;;  %2553 = vmatprep.mubr.f32.mxu1 %v7284_v6  ;;  %v991_v47 = vadd.f32 %v5295_v46, %v4909_v59  ;;  %v5665_v20 = vadd.f32 %v5311_v34, %v993_v22  ;;  %v1392_v53 = vpop.f32.mrf.mxu0  ;;  %v999_v31 = vadd.f32 %v5336_v54, %v4897_v5  ;;  %v7293_v46 = vmax.f32 %v5647_v43, 0.0 }
 0x218   : > { %v1649_v13 = vpop.f32.mrf.mxu1  ;;  %2554 = vmatmul.mubr.f32.gmra.mxu1 %v7285_v44  ;;  %v1393_v27 = vadd.f32 %v1392_v53, %v5379_v48  ;;  %v5675_v23 = vadd.f32 %v1647_v37, %v1391_v11  ;;  %v2060_v44 = vld [vmem:[#allocation8 + $0x4d0] sm:$0xff]  ;;  %v7640_v6 = vmax.f32 %v5642_v42, 0.0  ;;  %v2057_v53 = vld [vmem:[#allocation8 + $0x4b8] sm:$0xff]  ;;  %v7642_v43 = vmax.f32 %v5660_v38, 0.0 }
 0x219   : > { %2972 = vmatpush1.msra.mxu1 %v2064_v1  ;;  %v1396_v34 = vpop.f32.mrf.mxu0  ;;  %v7641_v1 = vmax.f32 %v5651_v7, 0.0  ;;  %v5688_v11 = vadd.f32 %v5297_v8, %v991_v47 }
 0x21a   : > { %v1653_v22 = vpop.f32.mrf.mxu1  ;;  %2411 = vmatmul.mubr.f32.gmra.mxu0 %v7286_v26  ;;  %2973 = vmatprep.subr.mxu1 %v2061_v4  ;;  %v5679_v41 = vadd.f32 %v1649_v13, %v1393_v27  ;;  %v1397_v54 = vadd.f32 %v1396_v34, %v5359_v16  ;;  %v997_v4 = vadd.f32 %v5319_v10, %v4909_v59  ;;  %v7288_v47 = vmax.f32 %v5675_v23, 0.0 }
 0x21b   : > { %2416 = vmatprep.mubr.f32.mxu0 %v7640_v6  ;;  %2559 = vmatprep.mubr.f32.mxu1 %v7641_v1  ;;  %v1398_v13 = vpop.f32.mrf.mxu0  ;;  %v5696_v6 = vadd.f32 %v5338_v29, %v999_v31  ;;  %v1005_v34 = vadd.f32 %v5367_v51, %v4897_v5  ;;  %v2056_v29 = vld [vmem:[#allocation8 + $0x4b0] sm:$0xff]  ;;  %v7643_v51 = vmax.f32 %v5665_v20, 0.0 }
 0x21c   : > { %v1655_v27 = vpop.f32.mrf.mxu1  ;;  %2560 = vmatmul.mubr.f32.gmra.mxu1 %v7293_v46  ;;  %v7289_v1 = vmax.f32 %v5679_v41, 0.0  ;;  %v1399_v8 = vadd.f32 %v1398_v13, %v5379_v48  ;;  %v5703_v26 = vadd.f32 %v1653_v22, %v1397_v54  ;;  %v7290_v22 = vmax.f32 %v5688_v11, 0.0 }
 0x21d   : > { %2974 = vmatpush1.msra.mxu1 %v2060_v44  ;;  %v1402_v10 = vpop.f32.mrf.mxu0  ;;  %v2053_v44 = vld [vmem:[#allocation8 + $0x498] sm:$0xff]  ;;  %v5716_v54 = vadd.f32 %v5321_v15, %v997_v4 }
 0x21e   : > { %v1659_v37 = vpop.f32.mrf.mxu1  ;;  %2417 = vmatmul.mubr.f32.gmra.mxu0 %v7642_v43  ;;  %2975 = vmatprep.subr.mxu1 %v2057_v53  ;;  %v5707_v31 = vadd.f32 %v1655_v27, %v1399_v8  ;;  %v1403_v5 = vadd.f32 %v1402_v10, %v5359_v16  ;;  %v1003_v43 = vadd.f32 %v5349_v57, %v4909_v59  ;;  %v7291_v27 = vmax.f32 %v5696_v6, 0.0 }
 0x21f   : > { %2422 = vmatprep.mubr.f32.mxu0 %v7643_v51  ;;  %2565 = vmatprep.mubr.f32.mxu1 %v7289_v1  ;;  %v1404_v53 = vpop.f32.mrf.mxu0  ;;  %v5724_v8 = vadd.f32 %v5369_v21, %v1005_v34  ;;  %v7294_v15 = vmax.f32 %v5703_v26, 0.0  ;;  %v2049_v34 = vld [vmem:[#allocation8 + $0x478] sm:$0xff] }
 0x220   : > { %v1661_v13 = vpop.f32.mrf.mxu1  ;;  %2566 = vmatmul.mubr.f32.gmra.mxu1 %v7288_v47  ;;  %v7292_v10 = vmax.f32 %v5707_v31, 0.0  ;;  %v1405_v51 = vadd.f32 %v1404_v53, %v5379_v48  ;;  %v5729_v4 = vadd.f32 %v1659_v37, %v1403_v5  ;;  %v2052_v47 = vld [vmem:[#allocation8 + $0x490] sm:$0xff]  ;;  %v7296_v37 = vmax.f32 %v5716_v54, 0.0 }
 0x221   : > { %7644 = vst [vmem:[#allocation21_spill] sm:$0xff] %v5724_v8  ;;  %2976 = vmatpush1.msra.mxu1 %v2056_v29  ;;  %v1408_v59 = vpop.f32.mrf.mxu0  ;;  %v7646_v29 = vld [vmem:[#allocation75_spill] sm:$0xff] }
 0x222   : > { %7645 = vst [vmem:[#allocation24_spill] sm:$0xff] %v5729_v4  ;;  %v1665_v57 = vpop.f32.mrf.mxu1  ;;  %2423 = vmatmul.mubr.f32.gmra.mxu0 %v7290_v22  ;;  %2977 = vmatprep.subr.mxu1 %v2053_v44  ;;  %v5733_v1 = vadd.f32 %v1661_v13, %v1405_v51  ;;  %v1409_v21 = vadd.f32 %v1408_v59, %v5359_v16  ;;  %v7295_v44 = vmax.f32 %v5724_v8, 0.0  ;;  %v7299_v59 = vmax.f32 %v5729_v4, 0.0 }
 0x223   : > { %2428 = vmatprep.mubr.f32.mxu0 %v7291_v27  ;;  %2571 = vmatprep.mubr.f32.mxu1 %v7292_v10  ;;  %v5742_v5 = vadd.f32 %v7646_v29, %v1003_v43  ;;  %v1410_v53 = vpop.f32.mrf.mxu0  ;;  %v2048_v43 = vld [vmem:[#allocation8 + $0x470] sm:$0xff] }
 0x224   : > { %v1667_v22 = vpop.f32.mrf.mxu1  ;;  %2572 = vmatmul.mubr.f32.gmra.mxu1 %v7294_v15  ;;  %v7297_v13 = vmax.f32 %v5733_v1, 0.0  ;;  %v1411_v51 = vadd.f32 %v1410_v53, %v5379_v48  ;;  %v5750_v27 = vadd.f32 %v1665_v57, %v1409_v21 }
 0x225   : > { %7647 = vst [vmem:[#allocation22_spill] sm:$0xff] %v5742_v5  ;;  %2978 = vmatpush1.msra.mxu1 %v2052_v47  ;;  %v1414_v10 = vpop.f32.mrf.mxu0  ;;  %v2045_v47 = vld [vmem:[#allocation8 + $0x458] sm:$0xff]  ;;  %v7301_v57 = vmax.f32 %v5742_v5, 0.0 }
 0x226   : > { %7648 = vst [vmem:[#allocation25_spill] sm:$0xff] %v5750_v27  ;;  %v1671_v46 = vpop.f32.mrf.mxu1  ;;  %2429 = vmatmul.mubr.f32.gmra.mxu0 %v7296_v37  ;;  %2979 = vmatprep.subr.mxu1 %v2049_v34  ;;  %v5754_v29 = vadd.f32 %v1667_v22, %v1411_v51  ;;  %v1415_v15 = vadd.f32 %v1414_v10, %v5359_v16  ;;  %v2041_v10 = vld [vmem:[#allocation8 + $0x438] sm:$0xff]  ;;  %v7654_v4 = vmax.f32 %v5750_v27, 0.0 }
 0x227   : > { %2434 = vmatprep.mubr.f32.mxu0 %v7295_v44  ;;  %2577 = vmatprep.mubr.f32.mxu1 %v7297_v13  ;;  %v1416_v21 = vpop.f32.mrf.mxu0  ;;  %v2044_v13 = vld [vmem:[#allocation8 + $0x450] sm:$0xff]  ;;  %v7656_v5 = vld [vmem:[#allocation30_spill] sm:$0xff] }
 0x228   : > { %7649 = vst [vmem:[#allocation27_spill] sm:$0xff] %v5754_v29  ;;  %v1673_v53 = vpop.f32.mrf.mxu1  ;;  %2578 = vmatmul.mubr.f32.gmra.mxu1 %v7299_v59  ;;  %v7302_v34 = vmax.f32 %v5754_v29, 0.0  ;;  %v1417_v22 = vadd.f32 %v1416_v21, %v5379_v48  ;;  %v5767_v51 = vadd.f32 %v1671_v46, %v1415_v15  ;;  %v7652_v21 = vld [vmem:[#allocation28_spill] sm:$0xff] }
 0x229   : > { %2980 = vmatpush1.msra.mxu1 %v2048_v43  ;;  %v1420_v44 = vpop.f32.mrf.mxu0  ;;  %v7653_v43 = vmax.f32 %v7652_v21, 0.0  ;;  %v7657_v21 = vmax.f32 %v7656_v5, 0.0 }
 0x22a   : > { %7650 = vst [vmem:[#allocation26_spill] sm:$0xff] %v5767_v51  ;;  %v1677_v37 = vpop.f32.mrf.mxu1  ;;  %2435 = vmatmul.mubr.f32.gmra.mxu0 %v7301_v57  ;;  %2981 = vmatprep.subr.mxu1 %v2045_v47  ;;  %v5771_v8 = vadd.f32 %v1673_v53, %v1417_v22  ;;  %v1421_v59 = vadd.f32 %v1420_v44, %v5359_v16  ;;  %v2037_v53 = vld [vmem:[#allocation8 + $0x418] sm:$0xff]  ;;  %v7661_v27 = vmax.f32 %v5767_v51, 0.0 }
 0x22b   : > { %2583 = vmatprep.mubr.f32.mxu1 %v7302_v34  ;;  %2762 = vmatprep.mubr.f32.mxu0 %v7653_v43  ;;  %v1422_v46 = vpop.f32.mrf.mxu0  ;;  %v2040_v43 = vld [vmem:[#allocation8 + $0x430] sm:$0xff] }
 0x22c   : > { %7651 = vst [vmem:[#allocation31_spill] sm:$0xff] %v5771_v8  ;;  %v1679_v15 = vpop.f32.mrf.mxu1  ;;  %2584 = vmatmul.mubr.f32.gmra.mxu1 %v7654_v4  ;;  %v7306_v57 = vmax.f32 %v5771_v8, 0.0  ;;  %v1423_v47 = vadd.f32 %v1422_v46, %v5379_v48  ;;  %v5783_v44 = vadd.f32 %v1677_v37, %v1421_v59  ;;  %v7659_v46 = vld [vmem:[#allocation32_spill] sm:$0xff] }
 0x22d   : > { %2982 = vmatpush1.msra.mxu1 %v2044_v13  ;;  %v1426_v22 = vpop.f32.mrf.mxu0  ;;  %v7660_v13 = vmax.f32 %v7659_v46, 0.0 }
 0x22e   : > { %7655 = vst [vmem:[#allocation29_spill] sm:$0xff] %v5783_v44  ;;  %v1683_v34 = vpop.f32.mrf.mxu1  ;;  %2763 = vmatmul.mubr.f32.vlgmr.msra.gmra.mxu0 %v7657_v21  ;;  %2983 = vmatprep.subr.mxu1 %v2041_v10  ;;  %v5787_v29 = vadd.f32 %v1679_v15, %v1423_v47  ;;  %v1427_v4 = vadd.f32 %v1426_v22, %v5359_v16  ;;  %v2161_v15 = vld [vmem:[#allocation8 + $0x7f8] sm:$0xff]  ;;  %v7668_v51 = vmax.f32 %v5783_v44, 0.0 }
 0x22f   : > { %2589 = vmatprep.mubr.f32.mxu1 %v7306_v57  ;;  %2768 = vmatprep.mubr.f32.mxu0 %v7660_v13  ;;  %v1428_v37 = vpop.f32.mrf.mxu0  ;;  %v7663_v57 = vld [vmem:[#allocation33_spill] sm:$0xff] }
 0x230   : > { %7658 = vst [vmem:[#allocation19_spill] sm:$0xff] %v5787_v29  ;;  %v1685_v59 = vpop.f32.mrf.mxu1  ;;  %2590 = vmatmul.mubr.f32.gmra.mxu1 %v7661_v27  ;;  %v7309_v5 = vmax.f32 %v5787_v29, 0.0  ;;  %v1429_v10 = vadd.f32 %v1428_v37, %v5379_v48  ;;  %v5799_v47 = vadd.f32 %v1683_v34, %v1427_v4  ;;  %v7664_v46 = vmax.f32 %v7663_v57, 0.0  ;;  %v2036_v13 = vld [vmem:[#allocation8 + $0x410] sm:$0xff]  ;;  %v7666_v37 = vld [vmem:[#allocation34_spill] sm:$0xff] }
 0x231   : > { %2984 = vmatpush1.msra.mxu1 %v2040_v43  ;;  %v1432_v22 = vpop.f32.mrf.mxu0  ;;  %v7667_v43 = vmax.f32 %v7666_v37, 0.0 }
 0x232   : > { %7662 = vst [vmem:[#allocation51_spill] sm:$0xff] %v5799_v47  ;;  %v1689_v21 = vpop.f32.mrf.mxu1  ;;  %2769 = vmatmul.mubr.f32.gmra.mxu0 %v7664_v46  ;;  %2985 = vmatprep.subr.mxu1 %v2037_v53  ;;  %v5803_v8 = vadd.f32 %v1685_v59, %v1429_v10  ;;  %v1433_v27 = vadd.f32 %v1432_v22, %v5359_v16  ;;  %v2157_v59 = vld [vmem:[#allocation8 + $0x7d8] sm:$0xff]  ;;  %v7675_v44 = vmax.f32 %v5799_v47, 0.0 }
 0x233   : > { %2595 = vmatprep.mubr.f32.mxu1 %v7309_v5  ;;  %2774 = vmatprep.mubr.f32.mxu0 %v7667_v43  ;;  %v1434_v34 = vpop.f32.mrf.mxu0  ;;  %v7670_v5 = vld [vmem:[#allocation35_spill] sm:$0xff]  ;;  %v2160_v43 = vld [vmem:[#allocation8 + $0x7f0] sm:$0xff] }
 0x234   : > { %7665 = vst [vmem:[#allocation54_spill] sm:$0xff] %v5803_v8  ;;  %v1691_v4 = vpop.f32.mrf.mxu1  ;;  %2596 = vmatmul.mubr.f32.gmra.mxu1 %v7668_v51  ;;  %v7312_v57 = vmax.f32 %v5803_v8, 0.0  ;;  %v1435_v53 = vadd.f32 %v1434_v34, %v5379_v48  ;;  %v5815_v10 = vadd.f32 %v1689_v21, %v1433_v27  ;;  %v7671_v37 = vmax.f32 %v7670_v5, 0.0  ;;  %v7673_v34 = vld [vmem:[#allocation36_spill] sm:$0xff] }
 0x235   : > { %2986 = vmatpush1.msra.mxu1 %v2036_v13  ;;  %v1438_v22 = vpop.f32.mrf.mxu0  ;;  %v7674_v13 = vmax.f32 %v7673_v34, 0.0 }
 0x236   : > { %7669 = vst [vmem:[#allocation57_spill] sm:$0xff] %v5815_v10  ;;  %v1695_v46 = vpop.f32.mrf.mxu1  ;;  %2775 = vmatmul.mubr.f32.gmra.mxu0 %v7671_v37  ;;  %2987 = vmatprep.subr.mxu1 %v2161_v15  ;;  %v5819_v29 = vadd.f32 %v1691_v4, %v1435_v53  ;;  %v1439_v51 = vadd.f32 %v1438_v22, %v5359_v16  ;;  %v2153_v4 = vld [vmem:[#allocation8 + $0x7b8] sm:$0xff]  ;;  %v7682_v47 = vmax.f32 %v5815_v10, 0.0 }
 0x237   : > { %2601 = vmatprep.mubr.f32.mxu1 %v7312_v57  ;;  %2780 = vmatprep.mubr.f32.mxu0 %v7674_v13  ;;  %v1440_v21 = vpop.f32.mrf.mxu0  ;;  %v7677_v57 = vld [vmem:[#allocation37_spill] sm:$0xff] }
 0x238   : > { %7672 = vst [vmem:[#allocation55_spill] sm:$0xff] %v5819_v29  ;;  %v1697_v27 = vpop.f32.mrf.mxu1  ;;  %2602 = vmatmul.mubr.f32.gmra.mxu1 %v7675_v44  ;;  %v7315_v5 = vmax.f32 %v5819_v29, 0.0  ;;  %v1441_v15 = vadd.f32 %v1440_v21, %v5379_v48  ;;  %v5831_v53 = vadd.f32 %v1695_v46, %v1439_v51  ;;  %v7678_v34 = vmax.f32 %v7677_v57, 0.0  ;;  %v2156_v13 = vld [vmem:[#allocation8 + $0x7d0] sm:$0xff]  ;;  %v7680_v21 = vld [vmem:[#allocation38_spill] sm:$0xff] }
 0x239   : > { %2988 = vmatpush2.msra.mxu1 %v2160_v43  ;;  %v1444_v22 = vpop.f32.mrf.mxu0  ;;  %v7681_v43 = vmax.f32 %v7680_v21, 0.0 }
 0x23a   : > { %7676 = vst [vmem:[#allocation59_spill] sm:$0xff] %v5831_v53  ;;  %v1701_v37 = vpop.f32.mrf.mxu1  ;;  %2781 = vmatmul.mubr.f32.gmra.mxu0 %v7678_v34  ;;  %2989 = vmatprep.subr.mxu1 %v2157_v59  ;;  %v5835_v8 = vadd.f32 %v1697_v27, %v1441_v15  ;;  %v1445_v44 = vadd.f32 %v1444_v22, %v5359_v16  ;;  %v2149_v27 = vld [vmem:[#allocation8 + $0x798] sm:$0xff]  ;;  %v7689_v10 = vmax.f32 %v5831_v53, 0.0 }
 0x23b   : > { %2607 = vmatprep.mubr.f32.mxu1 %v7315_v5  ;;  %2786 = vmatprep.mubr.f32.mxu0 %v7681_v43  ;;  %v1446_v46 = vpop.f32.mrf.mxu0  ;;  %v7684_v5 = vld [vmem:[#allocation39_spill] sm:$0xff]  ;;  %v2152_v43 = vld [vmem:[#allocation8 + $0x7b0] sm:$0xff] }
 0x23c   : > { %7679 = vst [vmem:[#allocation60_spill] sm:$0xff] %v5835_v8  ;;  %v1703_v51 = vpop.f32.mrf.mxu1  ;;  %2608 = vmatmul.mubr.f32.gmra.mxu1 %v7682_v47  ;;  %v7318_v57 = vmax.f32 %v5835_v8, 0.0  ;;  %v1447_v59 = vadd.f32 %v1446_v46, %v5379_v48  ;;  %v5847_v15 = vadd.f32 %v1701_v37, %v1445_v44  ;;  %v7685_v21 = vmax.f32 %v7684_v5, 0.0  ;;  %v7687_v46 = vld [vmem:[#allocation40_spill] sm:$0xff] }
 0x23d   : > { %2990 = vmatpush2.msra.mxu1 %v2156_v13  ;;  %v1450_v22 = vpop.f32.mrf.mxu0  ;;  %v7688_v13 = vmax.f32 %v7687_v46, 0.0 }
 0x23e   : > { %7683 = vst [vmem:[#allocation63_spill] sm:$0xff] %v5847_v15  ;;  %v1707_v34 = vpop.f32.mrf.mxu1  ;;  %2787 = vmatmul.mubr.f32.gmra.mxu0 %v7685_v21  ;;  %2991 = vmatprep.subr.mxu1 %v2153_v4  ;;  %v5851_v29 = vadd.f32 %v1703_v51, %v1447_v59  ;;  %v1451_v47 = vadd.f32 %v1450_v22, %v5359_v16  ;;  %v2145_v51 = vld [vmem:[#allocation8 + $0x778] sm:$0xff]  ;;  %v7696_v53 = vmax.f32 %v5847_v15, 0.0 }
 0x23f   : > { %2613 = vmatprep.mubr.f32.mxu1 %v7318_v57  ;;  %2792 = vmatprep.mubr.f32.mxu0 %v7688_v13  ;;  %v1452_v37 = vpop.f32.mrf.mxu0  ;;  %v7691_v57 = vld [vmem:[#allocation41_spill] sm:$0xff] }
 0x240   : > { %7686 = vst [vmem:[#allocation64_spill] sm:$0xff] %v5851_v29  ;;  %v1709_v44 = vpop.f32.mrf.mxu1  ;;  %2614 = vmatmul.mubr.f32.gmra.mxu1 %v7689_v10  ;;  %v7321_v5 = vmax.f32 %v5851_v29, 0.0  ;;  %v1453_v4 = vadd.f32 %v1452_v37, %v5379_v48  ;;  %v5863_v59 = vadd.f32 %v1707_v34, %v1451_v47  ;;  %v7692_v46 = vmax.f32 %v7691_v57, 0.0  ;;  %v2148_v13 = vld [vmem:[#allocation8 + $0x790] sm:$0xff]  ;;  %v7694_v37 = vld [vmem:[#allocation42_spill] sm:$0xff] }
 0x241   : > { %2992 = vmatpush2.msra.mxu1 %v2152_v43  ;;  %v1456_v22 = vpop.f32.mrf.mxu0  ;;  %v7695_v43 = vmax.f32 %v7694_v37, 0.0 }
 0x242   : > { %7690 = vst [vmem:[#allocation67_spill] sm:$0xff] %v5863_v59  ;;  %v1713_v21 = vpop.f32.mrf.mxu1  ;;  %2793 = vmatmul.mubr.f32.gmra.mxu0 %v7692_v46  ;;  %2993 = vmatprep.subr.mxu1 %v2149_v27  ;;  %v5867_v8 = vadd.f32 %v1709_v44, %v1453_v4  ;;  %v1457_v10 = vadd.f32 %v1456_v22, %v5359_v16  ;;  %v2141_v44 = vld [vmem:[#allocation8 + $0x758] sm:$0xff]  ;;  %v7703_v15 = vmax.f32 %v5863_v59, 0.0 }
 0x243   : > { %2619 = vmatprep.mubr.f32.mxu1 %v7321_v5  ;;  %2798 = vmatprep.mubr.f32.mxu0 %v7695_v43  ;;  %v1458_v34 = vpop.f32.mrf.mxu0  ;;  %v7698_v5 = vld [vmem:[#allocation43_spill] sm:$0xff]  ;;  %v2144_v43 = vld [vmem:[#allocation8 + $0x770] sm:$0xff] }
 0x244   : > { %7693 = vst [vmem:[#allocation68_spill] sm:$0xff] %v5867_v8  ;;  %v1715_v47 = vpop.f32.mrf.mxu1  ;;  %2620 = vmatmul.mubr.f32.gmra.mxu1 %v7696_v53  ;;  %v7324_v57 = vmax.f32 %v5867_v8, 0.0  ;;  %v1459_v27 = vadd.f32 %v1458_v34, %v5379_v48  ;;  %v5879_v4 = vadd.f32 %v1713_v21, %v1457_v10  ;;  %v7699_v37 = vmax.f32 %v7698_v5, 0.0  ;;  %v7701_v34 = vld [vmem:[#allocation44_spill] sm:$0xff] }
 0x245   : > { %2994 = vmatpush2.msra.mxu1 %v2148_v13  ;;  %v1462_v22 = vpop.f32.mrf.mxu0  ;;  %v7702_v13 = vmax.f32 %v7701_v34, 0.0 }
 0x246   : > { %7697 = vst [vmem:[#allocation75_spill] sm:$0xff] %v5879_v4  ;;  %v1719_v46 = vpop.f32.mrf.mxu1  ;;  %2799 = vmatmul.mubr.f32.gmra.mxu0 %v7699_v37  ;;  %2995 = vmatprep.subr.mxu1 %v2145_v51  ;;  %v5883_v29 = vadd.f32 %v1715_v47, %v1459_v27  ;;  %v1463_v53 = vadd.f32 %v1462_v22, %v5359_v16  ;;  %v2137_v47 = vld [vmem:[#allocation8 + $0x738] sm:$0xff]  ;;  %v7710_v59 = vmax.f32 %v5879_v4, 0.0 }
 0x247   : > { %2625 = vmatprep.mubr.f32.mxu1 %v7324_v57  ;;  %2804 = vmatprep.mubr.f32.mxu0 %v7702_v13  ;;  %v1464_v21 = vpop.f32.mrf.mxu0  ;;  %v7705_v57 = vld [vmem:[#allocation45_spill] sm:$0xff] }
 0x248   : > { %7700 = vst [vmem:[#allocation28_spill] sm:$0xff] %v5883_v29  ;;  %v1721_v10 = vpop.f32.mrf.mxu1  ;;  %2626 = vmatmul.mubr.f32.gmra.mxu1 %v7703_v15  ;;  %v7327_v5 = vmax.f32 %v5883_v29, 0.0  ;;  %v1465_v51 = vadd.f32 %v1464_v21, %v5379_v48  ;;  %v5895_v27 = vadd.f32 %v1719_v46, %v1463_v53  ;;  %v7706_v34 = vmax.f32 %v7705_v57, 0.0  ;;  %v2140_v13 = vld [vmem:[#allocation8 + $0x750] sm:$0xff]  ;;  %v7708_v21 = vld [vmem:[#allocation46_spill] sm:$0xff] }
 0x249   : > { %2996 = vmatpush2.msra.mxu1 %v2144_v43  ;;  %v1468_v22 = vpop.f32.mrf.mxu0  ;;  %v7709_v43 = vmax.f32 %v7708_v21, 0.0 }
 0x24a   : > { %7704 = vst [vmem:[#allocation30_spill] sm:$0xff] %v5895_v27  ;;  %v1725_v37 = vpop.f32.mrf.mxu1  ;;  %2805 = vmatmul.mubr.f32.gmra.mxu0 %v7706_v34  ;;  %2997 = vmatprep.subr.mxu1 %v2141_v44  ;;  %v5899_v8 = vadd.f32 %v1721_v10, %v1465_v51  ;;  %v1469_v15 = vadd.f32 %v1468_v22, %v5359_v16  ;;  %v2133_v10 = vld [vmem:[#allocation8 + $0x718] sm:$0xff]  ;;  %v7717_v4 = vmax.f32 %v5895_v27, 0.0 }
 0x24b   : > { %2631 = vmatprep.mubr.f32.mxu1 %v7327_v5  ;;  %2810 = vmatprep.mubr.f32.mxu0 %v7709_v43  ;;  %v1470_v46 = vpop.f32.mrf.mxu0  ;;  %v7712_v5 = vld [vmem:[#allocation47_spill] sm:$0xff]  ;;  %v2136_v43 = vld [vmem:[#allocation8 + $0x730] sm:$0xff] }
 0x24c   : > { %7707 = vst [vmem:[#allocation32_spill] sm:$0xff] %v5899_v8  ;;  %v1727_v53 = vpop.f32.mrf.mxu1  ;;  %2632 = vmatmul.mubr.f32.gmra.mxu1 %v7710_v59  ;;  %v7330_v57 = vmax.f32 %v5899_v8, 0.0  ;;  %v1471_v44 = vadd.f32 %v1470_v46, %v5379_v48  ;;  %v5911_v51 = vadd.f32 %v1725_v37, %v1469_v15  ;;  %v7713_v21 = vmax.f32 %v7712_v5, 0.0  ;;  %v7715_v46 = vld [vmem:[#allocation48_spill] sm:$0xff] }
 0x24d   : > { %2998 = vmatpush2.msra.mxu1 %v2140_v13  ;;  %v1474_v22 = vpop.f32.mrf.mxu0  ;;  %v7716_v13 = vmax.f32 %v7715_v46, 0.0 }
 0x24e   : > { %7711 = vst [vmem:[#allocation33_spill] sm:$0xff] %v5911_v51  ;;  %v1731_v34 = vpop.f32.mrf.mxu1  ;;  %2811 = vmatmul.mubr.f32.gmra.mxu0 %v7713_v21  ;;  %2999 = vmatprep.subr.mxu1 %v2137_v47  ;;  %v5915_v29 = vadd.f32 %v1727_v53, %v1471_v44  ;;  %v1475_v59 = vadd.f32 %v1474_v22, %v5359_v16  ;;  %v2129_v53 = vld [vmem:[#allocation8 + $0x6f8] sm:$0xff]  ;;  %v7724_v27 = vmax.f32 %v5911_v51, 0.0 }
 0x24f   : > { %2637 = vmatprep.mubr.f32.mxu1 %v7330_v57  ;;  %2816 = vmatprep.mubr.f32.mxu0 %v7716_v13  ;;  %v1476_v37 = vpop.f32.mrf.mxu0  ;;  %v7719_v57 = vld [vmem:[#allocation49_spill] sm:$0xff] }
 0x250   : > { %7714 = vst [vmem:[#allocation34_spill] sm:$0xff] %v5915_v29  ;;  %v1733_v15 = vpop.f32.mrf.mxu1  ;;  %2638 = vmatmul.mubr.f32.gmra.mxu1 %v7717_v4  ;;  %v7333_v5 = vmax.f32 %v5915_v29, 0.0  ;;  %v1477_v47 = vadd.f32 %v1476_v37, %v5379_v48  ;;  %v5927_v44 = vadd.f32 %v1731_v34, %v1475_v59  ;;  %v7720_v46 = vmax.f32 %v7719_v57, 0.0  ;;  %v2132_v13 = vld [vmem:[#allocation8 + $0x710] sm:$0xff]  ;;  %v7722_v37 = vld [vmem:[#allocation50_spill] sm:$0xff] }
 0x251   : > { %3000 = vmatpush2.msra.mxu1 %v2136_v43  ;;  %v1480_v22 = vpop.f32.mrf.mxu0  ;;  %v7723_v43 = vmax.f32 %v7722_v37, 0.0 }
 0x252   : > { %7718 = vst [vmem:[#allocation35_spill] sm:$0xff] %v5927_v44  ;;  %v1737_v21 = vpop.f32.mrf.mxu1  ;;  %2817 = vmatmul.mubr.f32.gmra.mxu0 %v7720_v46  ;;  %3001 = vmatprep.subr.mxu1 %v2133_v10  ;;  %v5931_v8 = vadd.f32 %v1733_v15, %v1477_v47  ;;  %v1481_v4 = vadd.f32 %v1480_v22, %v5359_v16  ;;  %v2125_v15 = vld [vmem:[#allocation8 + $0x6d8] sm:$0xff]  ;;  %v7731_v51 = vmax.f32 %v5927_v44, 0.0 }
 0x253   : > { %2643 = vmatprep.mubr.f32.mxu1 %v7333_v5  ;;  %2822 = vmatprep.mubr.f32.mxu0 %v7723_v43  ;;  %v1482_v34 = vpop.f32.mrf.mxu0  ;;  %v7726_v5 = vld [vmem:[#allocation52_spill] sm:$0xff]  ;;  %v2128_v43 = vld [vmem:[#allocation8 + $0x6f0] sm:$0xff] }
 0x254   : > { %7721 = vst [vmem:[#allocation36_spill] sm:$0xff] %v5931_v8  ;;  %v1739_v59 = vpop.f32.mrf.mxu1  ;;  %2644 = vmatmul.mubr.f32.gmra.mxu1 %v7724_v27  ;;  %v7336_v57 = vmax.f32 %v5931_v8, 0.0  ;;  %v1483_v10 = vadd.f32 %v1482_v34, %v5379_v48  ;;  %v5943_v47 = vadd.f32 %v1737_v21, %v1481_v4  ;;  %v7727_v37 = vmax.f32 %v7726_v5, 0.0  ;;  %v7729_v34 = vld [vmem:[#allocation53_spill] sm:$0xff] }
 0x255   : > { %3002 = vmatpush2.msra.mxu1 %v2132_v13  ;;  %v1486_v22 = vpop.f32.mrf.mxu0  ;;  %v7730_v13 = vmax.f32 %v7729_v34, 0.0 }
 0x256   : > { %7725 = vst [vmem:[#allocation37_spill] sm:$0xff] %v5943_v47  ;;  %v1743_v46 = vpop.f32.mrf.mxu1  ;;  %2823 = vmatmul.mubr.f32.gmra.mxu0 %v7727_v37  ;;  %3003 = vmatprep.subr.mxu1 %v2129_v53  ;;  %v5947_v29 = vadd.f32 %v1739_v59, %v1483_v10  ;;  %v1487_v27 = vadd.f32 %v1486_v22, %v5359_v16  ;;  %v2121_v59 = vld [vmem:[#allocation8 + $0x6b8] sm:$0xff]  ;;  %v7738_v44 = vmax.f32 %v5943_v47, 0.0 }
 0x257   : > { %2649 = vmatprep.mubr.f32.mxu1 %v7336_v57  ;;  %2828 = vmatprep.mubr.f32.mxu0 %v7730_v13  ;;  %v1488_v21 = vpop.f32.mrf.mxu0  ;;  %v7733_v57 = vld [vmem:[#allocation56_spill] sm:$0xff]  ;;  %v2124_v13 = vld [vmem:[#allocation8 + $0x6d0] sm:$0xff] }
 0x258   : > { %7728 = vst [vmem:[#allocation38_spill] sm:$0xff] %v5947_v29  ;;  %v1745_v4 = vpop.f32.mrf.mxu1  ;;  %2650 = vmatmul.mubr.f32.gmra.mxu1 %v7731_v51  ;;  %v7339_v5 = vmax.f32 %v5947_v29, 0.0  ;;  %v1489_v53 = vadd.f32 %v1488_v21, %v5379_v48  ;;  %v5959_v10 = vadd.f32 %v1743_v46, %v1487_v27  ;;  %v7734_v34 = vmax.f32 %v7733_v57, 0.0  ;;  %v7736_v21 = vld [vmem:[#allocation58_spill] sm:$0xff] }
 0x259   : > { %3004 = vmatpush2.msra.mxu1 %v2128_v43  ;;  %v1492_v22 = vpop.f32.mrf.mxu0  ;;  %v7737_v43 = vmax.f32 %v7736_v21, 0.0 }
 0x25a   : > { %7732 = vst [vmem:[#allocation39_spill] sm:$0xff] %v5959_v10  ;;  %v1749_v37 = vpop.f32.mrf.mxu1  ;;  %2829 = vmatmul.mubr.f32.gmra.mxu0 %v7734_v34  ;;  %3005 = vmatprep.subr.mxu1 %v2125_v15  ;;  %v5963_v8 = vadd.f32 %v1745_v4, %v1489_v53  ;;  %v1493_v51 = vadd.f32 %v1492_v22, %v5359_v16  ;;  %v2117_v4 = vld [vmem:[#allocation8 + $0x698] sm:$0xff]  ;;  %v7745_v47 = vmax.f32 %v5959_v10, 0.0 }
 0x25b   : > { %2655 = vmatprep.mubr.f32.mxu1 %v7339_v5  ;;  %2834 = vmatprep.mubr.f32.mxu0 %v7737_v43  ;;  %v1494_v46 = vpop.f32.mrf.mxu0  ;;  %v7740_v5 = vld [vmem:[#allocation61_spill] sm:$0xff] }
 0x25c   : > { %7735 = vst [vmem:[#allocation40_spill] sm:$0xff] %v5963_v8  ;;  %v1751_v27 = vpop.f32.mrf.mxu1  ;;  %2656 = vmatmul.mubr.f32.gmra.mxu1 %v7738_v44  ;;  %v7342_v57 = vmax.f32 %v5963_v8, 0.0  ;;  %v1495_v15 = vadd.f32 %v1494_v46, %v5379_v48  ;;  %v5975_v53 = vadd.f32 %v1749_v37, %v1493_v51  ;;  %v7741_v21 = vmax.f32 %v7740_v5, 0.0  ;;  %v2120_v43 = vld [vmem:[#allocation8 + $0x6b0] sm:$0xff]  ;;  %v7743_v46 = vld [vmem:[#allocation62_spill] sm:$0xff] }
 0x25d   : > { %3006 = vmatpush2.msra.mxu1 %v2124_v13  ;;  %v1498_v22 = vpop.f32.mrf.mxu0  ;;  %v7744_v13 = vmax.f32 %v7743_v46, 0.0 }
 0x25e   : > { %7739 = vst [vmem:[#allocation41_spill] sm:$0xff] %v5975_v53  ;;  %v1755_v34 = vpop.f32.mrf.mxu1  ;;  %2835 = vmatmul.mubr.f32.gmra.mxu0 %v7741_v21  ;;  %3007 = vmatprep.subr.mxu1 %v2121_v59  ;;  %v5979_v29 = vadd.f32 %v1751_v27, %v1495_v15  ;;  %v1499_v44 = vadd.f32 %v1498_v22, %v5359_v16  ;;  %v2113_v27 = vld [vmem:[#allocation8 + $0x678] sm:$0xff]  ;;  %v7751_v10 = vmax.f32 %v5975_v53, 0.0 }
 0x25f   : > { %2661 = vmatprep.mubr.f32.mxu1 %v7342_v57  ;;  %2840 = vmatprep.mubr.f32.mxu0 %v7744_v13  ;;  %v1500_v37 = vpop.f32.mrf.mxu0  ;;  %v7746_v57 = vld [vmem:[#allocation65_spill] sm:$0xff] }
 0x260   : > { %7742 = vst [vmem:[#allocation42_spill] sm:$0xff] %v5979_v29  ;;  %v1757_v51 = vpop.f32.mrf.mxu1  ;;  %2662 = vmatmul.mubr.f32.gmra.mxu1 %v7745_v47  ;;  %v7345_v5 = vmax.f32 %v5979_v29, 0.0  ;;  %v1501_v59 = vadd.f32 %v1500_v37, %v5379_v48  ;;  %v5991_v15 = vadd.f32 %v1755_v34, %v1499_v44  ;;  %v7747_v46 = vmax.f32 %v7746_v57, 0.0  ;;  %v2116_v13 = vld [vmem:[#allocation8 + $0x690] sm:$0xff]  ;;  %v7749_v37 = vld [vmem:[#allocation66_spill] sm:$0xff] }
 0x261   : > { %3008 = vmatpush2.msra.mxu1 %v2120_v43  ;;  %v1504_v22 = vpop.f32.mrf.mxu0  ;;  %v7750_v43 = vmax.f32 %v7749_v37, 0.0 }
 0x262   : > { %v1761_v21 = vpop.f32.mrf.mxu1  ;;  %2841 = vmatmul.mubr.f32.gmra.mxu0 %v7747_v46  ;;  %3009 = vmatprep.subr.mxu1 %v2117_v4  ;;  %v5995_v8 = vadd.f32 %v1757_v51, %v1501_v59  ;;  %v1505_v47 = vadd.f32 %v1504_v22, %v5359_v16  ;;  %v2109_v51 = vld [vmem:[#allocation8 + $0x658] sm:$0xff]  ;;  %v7756_v53 = vmax.f32 %v5991_v15, 0.0 }
 0x263   : > { %2667 = vmatprep.mubr.f32.mxu1 %v7345_v5  ;;  %2846 = vmatprep.mubr.f32.mxu0 %v7750_v43  ;;  %v1506_v34 = vpop.f32.mrf.mxu0  ;;  %v7752_v5 = vld [vmem:[#allocation69_spill] sm:$0xff] }
 0x264   : > { %7748 = vst [vmem:[#allocation43_spill] sm:$0xff] %v5995_v8  ;;  %v1763_v44 = vpop.f32.mrf.mxu1  ;;  %2668 = vmatmul.mubr.f32.gmra.mxu1 %v7751_v10  ;;  %v7348_v57 = vmax.f32 %v5995_v8, 0.0  ;;  %v1507_v4 = vadd.f32 %v1506_v34, %v5379_v48  ;;  %v6007_v59 = vadd.f32 %v1761_v21, %v1505_v47  ;;  %v7753_v37 = vmax.f32 %v7752_v5, 0.0  ;;  %v2112_v43 = vld [vmem:[#allocation8 + $0x670] sm:$0xff]  ;;  %v7754_v34 = vld [vmem:[#allocation70_spill] sm:$0xff] }
 0x265   : > { %3010 = vmatpush2.msra.mxu1 %v2116_v13  ;;  %v1510_v22 = vpop.f32.mrf.mxu0  ;;  %v7755_v13 = vmax.f32 %v7754_v34, 0.0 }
 0x266   : > { %v1767_v46 = vpop.f32.mrf.mxu1  ;;  %2847 = vmatmul.mubr.f32.gmra.mxu0 %v7753_v37  ;;  %3011 = vmatprep.subr.mxu1 %v2113_v27  ;;  %v6011_v29 = vadd.f32 %v1763_v44, %v1507_v4  ;;  %v1511_v10 = vadd.f32 %v1510_v22, %v5359_v16  ;;  %v7354_v44 = vmax.f32 %v6007_v59, 0.0 }
 0x267   : > { %2673 = vmatprep.mubr.f32.mxu1 %v7348_v57  ;;  %2852 = vmatprep.mubr.f32.mxu0 %v7755_v13  ;;  %v1512_v21 = vpop.f32.mrf.mxu0  ;;  %v7757_v57 = vld [vmem:[#allocation71_spill] sm:$0xff]  ;;  %v2108_v13 = vld [vmem:[#allocation8 + $0x650] sm:$0xff] }
 0x268   : > { %v1769_v47 = vpop.f32.mrf.mxu1  ;;  %2674 = vmatmul.mubr.f32.gmra.mxu1 %v7756_v53  ;;  %v7355_v5 = vmax.f32 %v6011_v29, 0.0  ;;  %v1513_v27 = vadd.f32 %v1512_v21, %v5379_v48  ;;  %v6023_v4 = vadd.f32 %v1767_v46, %v1511_v10  ;;  %v7758_v34 = vmax.f32 %v7757_v57, 0.0  ;;  %v2105_v21 = vld [vmem:[#allocation8 + $0x638] sm:$0xff] }
 0x269   : > { %3012 = vmatpush2.msra.mxu1 %v2112_v43  ;;  %v7759_v43 = vmax.f32 %v5315_v12, 0.0  ;;  %v7760_v12 = vmax.f32 %v5332_v2, 0.0 }
 0x26a   : > { %v1516_v22 = vpop.f32.mrf.mxu0  ;;  %v1773_v37 = vpop.f32.mrf.mxu1  ;;  %2853 = vmatmul.mubr.f32.gmra.mxu0 %v7758_v34  ;;  %3013 = vmatprep.subr.mxu1 %v2109_v51  ;;  %v6027_v8 = vadd.f32 %v1769_v47, %v1513_v27  ;;  %v7352_v10 = vmax.f32 %v6023_v4, 0.0 }
 0x26b   : > { %v1517_v53 = vadd.f32 %v1516_v22, %v5359_v16  ;;  %2679 = vmatprep.mubr.f32.mxu1 %v7355_v5  ;;  %2858 = vmatprep.mubr.f32.mxu0 %v7759_v43  ;;  %v2104_v22 = vld [vmem:[#allocation8 + $0x630] sm:$0xff] }
 0x26c   : > { %v1518_v46 = vpop.f32.mrf.mxu0  ;;  %2680 = vmatmul.mubr.f32.gmra.mxu1 %v7354_v44  ;;  %v7353_v57 = vmax.f32 %v6027_v8, 0.0  ;;  %v1775_v16 = vpop.f32.mrf.mxu1  ;;  %v7761_v43 = vld [vmem:[#allocation73_spill] sm:$0xff] }
 0x26d   : > { %v1519_v51 = vadd.f32 %v1518_v46, %v5379_v48  ;;  %3014 = vmatpush2.msra.mxu1 %v2108_v13  ;;  %v6039_v47 = vadd.f32 %v1773_v37, %v1517_v53  ;;  %v7762_v48 = vmax.f32 %v7761_v43, 0.0  ;;  %v2101_v13 = vld [vmem:[#allocation8 + $0x618] sm:$0xff] }
 0x26e   : > { %v6041_v27 = vpop.f32.mrf.mxu0  ;;  %2859 = vmatmul.mubr.f32.gmra.mxu0 %v7760_v12  ;;  %3015 = vmatprep.subr.mxu1 %v2105_v21  ;;  %v7763_v21 = vmax.f32 %v5363_v18, 0.0  ;;  %v7766_v18 = vmax.f32 %v5388_v45, 0.0 }
 0x26f   : > { %v6045_v34 = vadd.f32 %v1775_v16, %v1519_v51  ;;  %2685 = vmatprep.mubr.f32.mxu1 %v7353_v57  ;;  %2864 = vmatprep.mubr.f32.mxu0 %v7762_v48  ;;  %v7351_v2 = vmax.f32 %v6039_v47, 0.0  ;;  %v2100_v51 = vld [vmem:[#allocation8 + $0x610] sm:$0xff]  ;;  %v7764_v16 = vmax.f32 %v5373_v52, 0.0  ;;  %v7767_v48 = vld [vmem:[#allocation76_spill] sm:$0xff] }
 0x270   : > { %v6051_v46 = vpop.f32.mrf.mxu0  ;;  %2686 = vmatmul.mubr.f32.gmra.mxu1 %v7352_v10  ;;  %v7769_v52 = vld [vmem:[#allocation77_spill] sm:$0xff] }
 0x271   : > { %v7350_v37 = vmax.f32 %v6045_v34, 0.0  ;;  %3016 = vmatpush2.msra.mxu1 %v2104_v22  ;;  %v7765_v22 = vmax.f32 %v5403_v17, 0.0  ;;  %v7772_v17 = vmax.f32 %v5410_v62, 0.0 }
 0x272   : > { %v6057_v53 = vpop.f32.mrf.mxu0  ;;  %2865 = vmatmul.mubr.f32.gmra.mxu0 %v7763_v21  ;;  %3017 = vmatprep.subr.mxu1 %v2101_v13  ;;  %v7768_v13 = vmax.f32 %v7767_v48, 0.0  ;;  %v7775_v48 = vmax.f32 %v5455_v32, 0.0  ;;  %v7780_v32 = vmax.f32 %v5464_v40, 0.0 }
 0x273   : > { %2691 = vmatprep.mubr.f32.mxu1 %v7350_v37  ;;  %2870 = vmatprep.mubr.f32.mxu0 %v7764_v16  ;;  %v7770_v16 = vmax.f32 %v7769_v52, 0.0  ;;  %v7771_v37 = vmax.f32 %v5427_v36, 0.0  ;;  %v7776_v36 = vmax.f32 %v5436_v56, 0.0  ;;  %v7779_v52 = vmax.f32 %v5483_v14, 0.0  ;;  %v7785_v14 = vld [vmem:[#allocation78_spill] sm:$0xff] }
 0x274   : > { %v6065_v12 = vpop.f32.mrf.mxu0  ;;  %2692 = vmatmul.mubr.f32.gmra.mxu1 %v7351_v2 }
 0x275   : > { %3018 = vmatpush2.msra.mxu1 %v2100_v51  ;;  %3019 = vmatprep.mubr.f32.mxu1 %v7765_v22  ;;  %v7773_v22 = vmax.f32 %v5415_v28, 0.0  ;;  %v7778_v28 = vmax.f32 %v5451_v63, 0.0 }
 0x276   : > { %v6071_v43 = vpop.f32.mrf.mxu0  ;;  %2871 = vmatmul.mubr.f32.gmra.mxu0 %v7766_v18  ;;  %v7774_v18 = vmax.f32 %v5423_v49, 0.0 }
 0x277   : > { %2876 = vmatprep.mubr.f32.mxu0 %v7768_v13 }
 0x278   : > { %v6077_v21 = vpop.f32.mrf.mxu0  ;;  %3020 = vmatmul.mubr.f32.vlgmr.msra.gmra.mxu1 %v7770_v16  ;;  %v7781_v16 = vmax.f32 %v5474_v0, 0.0  ;;  %v7789_v0 = vmax.f32 %v5507_v50, 0.0 }
 0x279   : > { %3025 = vmatprep.mubr.f32.mxu1 %v7771_v37  ;;  %v7777_v37 = vmax.f32 %v5444_v30, 0.0  ;;  %v7782_v30 = vmax.f32 %v5479_v25, 0.0 }
 0x27a   : > { %v6083_v51 = vpop.f32.mrf.mxu0  ;;  %2877 = vmatmul.mubr.f32.gmra.mxu0 %v7772_v17  ;;  %v7783_v17 = vld [vmem:[#allocation80_spill] sm:$0xff] }
 0x27b   : > { %2882 = vmatprep.mubr.f32.mxu0 %v7773_v22  ;;  %v7784_v22 = vmax.f32 %v7783_v17, 0.0  ;;  %v7795_v17 = vmax.f32 %v5567_v58, 0.0  ;;  %v7803_v58 = vld [vmem:[#allocation85_spill] sm:$0xff] }
 0x27c   : > { %v6089_v45 = vpop.f32.mrf.mxu0  ;;  %3026 = vmatmul.mubr.f32.gmra.mxu1 %v7774_v18  ;;  %v7786_v18 = vmax.f32 %v7785_v14, 0.0  ;;  %v7798_v14 = vld [vmem:[#allocation83_spill] sm:$0xff] }
 0x27d   : > { %3031 = vmatprep.mubr.f32.mxu1 %v7775_v48  ;;  %v7787_v48 = vld [vmem:[#allocation79_spill] sm:$0xff] }
 0x27e   : > { %v6095_v13 = vpop.f32.mrf.mxu0  ;;  %2883 = vmatmul.mubr.f32.gmra.mxu0 %v7776_v36  ;;  %v7788_v36 = vmax.f32 %v7787_v48, 0.0  ;;  %v7800_v48 = vld [vmem:[#allocation84_spill] sm:$0xff] }
 0x27f   : > { %2888 = vmatprep.mubr.f32.mxu0 %v7777_v37  ;;  %v7790_v37 = vmax.f32 %v5539_v55, 0.0  ;;  %v7796_v55 = vld [vmem:[#allocation82_spill] sm:$0xff] }
 0x280   : > { %v6101_v62 = vpop.f32.mrf.mxu0  ;;  %3032 = vmatmul.mubr.f32.gmra.mxu1 %v7778_v28  ;;  %v7791_v28 = vmax.f32 %v5520_v3, 0.0 }
 0x281   : > { %3037 = vmatprep.mubr.f32.mxu1 %v7779_v52  ;;  %v7792_v52 = vld [vmem:[#allocation81_spill] sm:$0xff] }
 0x282   : > { %v6107_v49 = vpop.f32.mrf.mxu0  ;;  %2889 = vmatmul.mubr.f32.gmra.mxu0 %v7780_v32  ;;  %v7793_v32 = vmax.f32 %v7792_v52, 0.0 }
 0x283   : > { %2894 = vmatprep.mubr.f32.mxu0 %v7781_v16 }
 0x284   : > { %v6113_v56 = vpop.f32.mrf.mxu0  ;;  %3038 = vmatmul.mubr.f32.gmra.mxu1 %v7782_v30  ;;  %v7794_v30 = vmax.f32 %v5535_v60, 0.0 }
 0x285   : > { %3043 = vmatprep.mubr.f32.mxu1 %v7784_v22  ;;  %v7797_v22 = vmax.f32 %v7796_v55, 0.0 }
 0x286   : > { %v6119_v63 = vpop.f32.mrf.mxu0  ;;  %2895 = vmatmul.mubr.f32.gmra.mxu0 %v7786_v18  ;;  %v7799_v18 = vmax.f32 %v7798_v14, 0.0 }
 0x287   : > { %2900 = vmatprep.mubr.f32.mxu0 %v7788_v36  ;;  %v7801_v36 = vmax.f32 %v7800_v48, 0.0  ;;  %v7812_v48 = vmax.f32 %v5651_v7, 0.0  ;;  %v7818_v7 = vmax.f32 %v5660_v38, 0.0 }
 0x288   : > { %v6125_v40 = vpop.f32.mrf.mxu0  ;;  %3044 = vmatmul.mubr.f32.gmra.mxu1 %v7789_v0  ;;  %v7802_v0 = vmax.f32 %v5595_v9, 0.0  ;;  %v7809_v9 = vmax.f32 %v5604_v33, 0.0 }
 0x289   : > { %3049 = vmatprep.mubr.f32.mxu1 %v7790_v37  ;;  %v7804_v37 = vmax.f32 %v7803_v58, 0.0  ;;  %v7817_v58 = vmax.f32 %v5679_v41, 0.0  ;;  %v7822_v41 = vmax.f32 %v5688_v11, 0.0 }
 0x28a   : > { %v6131_v25 = vpop.f32.mrf.mxu0  ;;  %2901 = vmatmul.mubr.f32.gmra.mxu0 %v7791_v28  ;;  %v7805_v28 = vld [vmem:[#allocation23_spill] sm:$0xff] }
 0x28b   : > { %2906 = vmatprep.mubr.f32.mxu0 %v7793_v32  ;;  %v7806_v52 = vmax.f32 %v7805_v28, 0.0  ;;  %v7821_v28 = vmax.f32 %v5707_v31, 0.0  ;;  %v7826_v31 = vmax.f32 %v5716_v54, 0.0  ;;  %v7835_v54 = vld [vmem:[#allocation25_spill] sm:$0xff] }
 0x28c   : > { %v6137_v16 = vpop.f32.mrf.mxu0  ;;  %3050 = vmatmul.mubr.f32.gmra.mxu1 %v7794_v30  ;;  %v7807_v30 = vmax.f32 %v5591_v19, 0.0 }
 0x28d   : > { %3055 = vmatprep.mubr.f32.mxu1 %v7795_v17  ;;  %v7808_v17 = vmax.f32 %v5623_v35, 0.0  ;;  %v7813_v35 = vmax.f32 %v5632_v39, 0.0 }
 0x28e   : > { %v6143_v50 = vpop.f32.mrf.mxu0  ;;  %2907 = vmatmul.mubr.f32.gmra.mxu0 %v7797_v22  ;;  %v7810_v22 = vmax.f32 %v5612_v24, 0.0  ;;  %v7815_v24 = vld [vmem:[#allocation18_spill] sm:$0xff] }
 0x28f   : > { %2912 = vmatprep.mubr.f32.mxu0 %v7799_v18  ;;  %v7811_v18 = vmax.f32 %v5619_v61, 0.0 }
 0x290   : > { %v6149_v3 = vpop.f32.mrf.mxu0  ;;  %3056 = vmatmul.mubr.f32.gmra.mxu1 %v7801_v36  ;;  %v7814_v36 = vmax.f32 %v5642_v42, 0.0  ;;  %v7820_v42 = vmax.f32 %v5675_v23, 0.0 }
 0x291   : > { %3061 = vmatprep.mubr.f32.mxu1 %v7802_v0  ;;  %v7816_v0 = vmax.f32 %v7815_v24, 0.0 }
 0x292   : > { %v6155_v60 = vpop.f32.mrf.mxu0  ;;  %2913 = vmatmul.mubr.f32.gmra.mxu0 %v7804_v37  ;;  %v7819_v37 = vmax.f32 %v5665_v20, 0.0  ;;  %v7824_v20 = vmax.f32 %v5703_v26, 0.0 }
 0x293   : > { %2918 = vmatprep.mubr.f32.mxu0 %v7806_v52 }
 0x294   : > { %v6161_v32 = vpop.f32.mrf.mxu0  ;;  %3062 = vmatmul.mubr.f32.gmra.mxu1 %v7807_v30  ;;  %v7823_v30 = vmax.f32 %v5696_v6, 0.0  ;;  %v7829_v6 = vld [vmem:[#allocation24_spill] sm:$0xff] }
 0x295   : > { %3067 = vmatprep.mubr.f32.mxu1 %v7808_v17  ;;  %v7825_v17 = vmax.f32 %v5733_v1, 0.0  ;;  %v7833_v1 = vld [vmem:[#allocation22_spill] sm:$0xff] }
 0x296   : > { %v6167_v55 = vpop.f32.mrf.mxu0  ;;  %2919 = vmatmul.mubr.f32.gmra.mxu0 %v7809_v9  ;;  %v7827_v9 = vld [vmem:[#allocation21_spill] sm:$0xff] }
 0x297   : > { %2924 = vmatprep.mubr.f32.mxu0 %v7810_v22  ;;  %v7828_v22 = vmax.f32 %v7827_v9, 0.0  ;;  %v7844_v9 = vld [vmem:[#allocation20_spill] sm:$0xff] }
 0x298   : > { %v6173_v14 = vpop.f32.mrf.mxu0  ;;  %3068 = vmatmul.mubr.f32.gmra.mxu1 %v7811_v18  ;;  %v7830_v18 = vmax.f32 %v7829_v6, 0.0 }
 0x299   : > { %3073 = vmatprep.mubr.f32.mxu1 %v7812_v48  ;;  %v7831_v48 = vld [vmem:[#allocation27_spill] sm:$0xff] }
 0x29a   : > { %v6179_v19 = vpop.f32.mrf.mxu0  ;;  %2925 = vmatmul.mubr.f32.gmra.mxu0 %v7813_v35  ;;  %v7832_v35 = vmax.f32 %v7831_v48, 0.0 }
 0x29b   : > { %2930 = vmatprep.mubr.f32.mxu0 %v7814_v36  ;;  %v7834_v36 = vmax.f32 %v7833_v1, 0.0 }
 0x29c   : > { %v6185_v33 = vpop.f32.mrf.mxu0  ;;  %3074 = vmatmul.mubr.f32.gmra.mxu1 %v7816_v0  ;;  %v7836_v0 = vmax.f32 %v7835_v54, 0.0 }
 0x29d   : > { %3079 = vmatprep.mubr.f32.mxu1 %v7817_v58  ;;  %v7837_v58 = vld [vmem:[#allocation31_spill] sm:$0xff] }
 0x29e   : > { %v6191_v61 = vpop.f32.mrf.mxu0  ;;  %2931 = vmatmul.mubr.f32.gmra.mxu0 %v7818_v7  ;;  %v7838_v7 = vmax.f32 %v7837_v58, 0.0 }
 0x29f   : > { %2936 = vmatprep.mubr.f32.mxu0 %v7819_v37 }
 0x2a0   : > { %v6197_v39 = vpop.f32.mrf.mxu0  ;;  %3080 = vmatmul.mubr.f32.gmra.mxu1 %v7820_v42  ;;  %v6242_v42 = vld [vmem:[%s7108_s4] sm:$0xf] }
 0x2a1   : > { %3085 = vmatprep.mubr.f32.mxu1 %v7821_v28  ;;  %7839 = vst [vmem:[#allocation44_spill] sm:$0xff] %v6242_v42 }
 0x2a2   : > { %v6203_v52 = vpop.f32.mrf.mxu0  ;;  %2937 = vmatmul.mubr.f32.gmra.mxu0 %v7822_v41  ;;  %v7840_v41 = vld [vmem:[#allocation26_spill] sm:$0xff] }
 0x2a3   : > { %2942 = vmatprep.mubr.f32.mxu0 %v7823_v30  ;;  %v7841_v30 = vmax.f32 %v7840_v41, 0.0 }
 0x2a4   : > { %v6209_v38 = vpop.f32.mrf.mxu0  ;;  %3086 = vmatmul.mubr.f32.gmra.mxu1 %v7824_v20  ;;  %v7842_v20 = vld [vmem:[#allocation19_spill] sm:$0xff] }
 0x2a5   : > { %3091 = vmatprep.mubr.f32.mxu1 %v7825_v17  ;;  %v7843_v17 = vmax.f32 %v7842_v20, 0.0 }
 0x2a6   : > { %v6215_v23 = vpop.f32.mrf.mxu0  ;;  %2943 = vmatmul.mubr.f32.gmra.mxu0 %v7826_v31 }
 0x2a7   : > { %2948 = vmatprep.mubr.f32.mxu0 %v7828_v22  ;;  %v6254_v22 = vrot.slane %v6242_v42, %v7844_v9 }
 0x2a8   : > { %v6221_v11 = vpop.f32.mrf.mxu0  ;;  %3092 = vmatmul.mubr.f32.gmra.mxu1 %v7830_v18  ;;  %v7845_v18 = vld [vmem:[#allocation29_spill] sm:$0xff] }
 0x2a9   : > { %3097 = vmatprep.mubr.f32.mxu1 %v7832_v35  ;;  %v7846_v48 = vmax.f32 %v7845_v18, 0.0  ;;  %v7847_v35 = vld [vmem:[#allocation17_spill] sm:$0xff]  ;;  %v2251_v58 = vadd.f32 %v6041_v27, %v6254_v22  ;;  %v2257_v27 = vadd.f32 %v6057_v53, %v6254_v22  ;;  %v2263_v53 = vadd.f32 %v6071_v43, %v6254_v22 }
 0x2aa   : > { %v6227_v26 = vpop.f32.mrf.mxu0  ;;  %2949 = vmatmul.mubr.f32.gmra.mxu0 %v7834_v36  ;;  %v6262_v1 = vrot.slane %v6242_v42, %v7847_v35  ;;  %v7848_v36 = vld [vmem:[#allocation54_spill] sm:$0xff] }
 0x2ab   : > { %v7849_v54 = vmax.f32 %v7848_v36, 0.0 }
 0x2ac   : > { %v6231_v24 = vpop.f32.mrf.mxu0  ;;  %3098 = vmatmul.mubr.f32.gmra.mxu1 %v7836_v0 }
 0x2ad   : > { %3103 = vmatprep.mubr.f32.mxu1 %v7838_v7 }
 0x2ae   : > { %v6237_v37 = vpop.f32.mrf.mxu0 }
 0x2b0   : > { %v6244_v28 = vpop.f32.mrf.mxu0  ;;  %3104 = vmatmul.mubr.f32.gmra.mxu1 %v7841_v30  ;;  %v7850_v30 = vld [vmem:[#allocation51_spill] sm:$0xff] }
 0x2b1   : > { %3109 = vmatprep.mubr.f32.mxu1 %v7843_v17  ;;  %v7851_v20 = vmax.f32 %v7850_v30, 0.0  ;;  %v2253_v17 = vadd.f32 %v6051_v46, %v6262_v1  ;;  %v2259_v46 = vadd.f32 %v6065_v12, %v6262_v1  ;;  %v2265_v12 = vadd.f32 %v6077_v21, %v6262_v1 }
 0x2b2   : > { %v6250_v31 = vpop.f32.mrf.mxu0  ;;  %v2271_v21 = vadd.f32 %v6089_v45, %v6262_v1  ;;  %v2277_v45 = vadd.f32 %v6101_v62, %v6262_v1  ;;  %v2283_v62 = vadd.f32 %v6113_v56, %v6262_v1  ;;  %v2289_v56 = vadd.f32 %v6125_v40, %v6262_v1 }
 0x2b4   : > { %v6256_v6 = vpop.f32.mrf.mxu0  ;;  %3110 = vmatmul.mubr.f32.gmra.mxu1 %v7846_v48  ;;  %v7853_v48 = vld [vmem:[#allocation55_spill] sm:$0xff] }
 0x2b5   : > { %3115 = vmatprep.mubr.f32.mxu1 %v7849_v54  ;;  %v7854_v2 = vmax.f32 %v7853_v48, 0.0 }
 0x2b6   : > { %v6266_v0 = vpop.f32.mrf.mxu0 }
 0x2b8   : > { %v6270_v7 = vpop.f32.mrf.mxu0  ;;  %v2507_v41 = vpop.f32.mrf.mxu1  ;;  %3116 = vmatmul.mubr.f32.gmra.mxu1 %v7851_v20  ;;  %v7856_v20 = vld [vmem:[#allocation57_spill] sm:$0xff] }
 0x2b9   : > { %v6276_v18 = vadd.f32 %v2507_v41, %v2251_v58  ;;  %3121 = vmatprep.mubr.f32.mxu1 %v7854_v2  ;;  %v7857_v44 = vmax.f32 %v7856_v20, 0.0  ;;  %v7859_v2 = vld [vmem:[#allocation60_spill] sm:$0xff] }
 0x2ba   : > { %v6280_v36 = vpop.f32.mrf.mxu0  ;;  %v2509_v54 = vpop.f32.mrf.mxu1  ;;  %v7860_v41 = vmax.f32 %v7859_v2, 0.0 }
 0x2bb   : > { %7852 = vst [vmem:[#allocation45_spill] sm:$0xff] %v6276_v18  ;;  %v6284_v10 = vadd.f32 %v2509_v54, %v2253_v17 }
 0x2bc   : > { %v6286_v57 = vpop.f32.mrf.mxu0  ;;  %v2513_v30 = vpop.f32.mrf.mxu1  ;;  %3122 = vmatmul.mubr.f32.gmra.mxu1 %v7857_v44  ;;  %v7862_v44 = vld [vmem:[#allocation59_spill] sm:$0xff] }
 0x2bd   : > { %7855 = vst [vmem:[#allocation46_spill] sm:$0xff] %v6284_v10  ;;  %v6292_v58 = vadd.f32 %v2513_v30, %v2257_v27  ;;  %3127 = vmatprep.mubr.f32.mxu1 %v7860_v41  ;;  %v7863_v9 = vmax.f32 %v7862_v44, 0.0  ;;  %v7865_v30 = vld [vmem:[#allocation64_spill] sm:$0xff] }
 0x2be   : > { %v6296_v48 = vpop.f32.mrf.mxu0  ;;  %v2515_v5 = vpop.f32.mrf.mxu1  ;;  %v7866_v2 = vmax.f32 %v7865_v30, 0.0 }
 0x2bf   : > { %7858 = vst [vmem:[#allocation47_spill] sm:$0xff] %v6292_v58  ;;  %v6300_v17 = vadd.f32 %v2515_v5, %v2259_v46  ;;  %v2269_v5 = vadd.f32 %v6083_v51, %v6254_v22  ;;  %v2275_v51 = vadd.f32 %v6095_v13, %v6254_v22  ;;  %v2281_v13 = vadd.f32 %v6107_v49, %v6254_v22 }
 0x2c0   : > { %v6302_v54 = vpop.f32.mrf.mxu0  ;;  %v2519_v20 = vpop.f32.mrf.mxu1  ;;  %3128 = vmatmul.mubr.f32.gmra.mxu1 %v7863_v9  ;;  %v7868_v9 = vld [vmem:[#allocation63_spill] sm:$0xff]  ;;  %v2287_v49 = vadd.f32 %v6119_v63, %v6254_v22  ;;  %v2293_v63 = vadd.f32 %v6131_v25, %v6254_v22 }
 0x2c1   : > { %7861 = vst [vmem:[#allocation48_spill] sm:$0xff] %v6300_v17  ;;  %v6308_v27 = vadd.f32 %v2519_v20, %v2263_v53  ;;  %3133 = vmatprep.mubr.f32.mxu1 %v7866_v2  ;;  %v7869_v18 = vmax.f32 %v7868_v9, 0.0  ;;  %v7871_v20 = vld [vmem:[#allocation68_spill] sm:$0xff] }
 0x2c2   : > { %v6312_v41 = vpop.f32.mrf.mxu0  ;;  %v2521_v35 = vpop.f32.mrf.mxu1  ;;  %v7872_v30 = vmax.f32 %v7871_v20, 0.0 }
 0x2c3   : > { %7864 = vst [vmem:[#allocation49_spill] sm:$0xff] %v6308_v27  ;;  %v6316_v43 = vadd.f32 %v2521_v35, %v2265_v12 }
 0x2c4   : > { %v6318_v46 = vpop.f32.mrf.mxu0  ;;  %v2525_v44 = vpop.f32.mrf.mxu1  ;;  %3134 = vmatmul.mubr.f32.gmra.mxu1 %v7869_v18  ;;  %v7874_v18 = vld [vmem:[#allocation67_spill] sm:$0xff] }
 0x2c5   : > { %7867 = vst [vmem:[#allocation50_spill] sm:$0xff] %v6316_v43  ;;  %v6324_v53 = vadd.f32 %v2525_v44, %v2269_v5  ;;  %3139 = vmatprep.mubr.f32.mxu1 %v7872_v30  ;;  %v7875_v10 = vmax.f32 %v7874_v18, 0.0  ;;  %v7877_v44 = vld [vmem:[#allocation28_spill] sm:$0xff] }
 0x2c6   : > { %v6328_v2 = vpop.f32.mrf.mxu0  ;;  %v2527_v42 = vpop.f32.mrf.mxu1  ;;  %v7878_v20 = vmax.f32 %v7877_v44, 0.0 }
 0x2c7   : > { %7870 = vst [vmem:[#allocation52_spill] sm:$0xff] %v6324_v53  ;;  %v6332_v35 = vadd.f32 %v2527_v42, %v2271_v21 }
 0x2c8   : > { %v6334_v12 = vpop.f32.mrf.mxu0  ;;  %v2531_v9 = vpop.f32.mrf.mxu1  ;;  %3140 = vmatmul.mubr.f32.gmra.mxu1 %v7875_v10  ;;  %v7881_v10 = vld [vmem:[#allocation75_spill] sm:$0xff] }
 0x2c9   : > { %7873 = vst [vmem:[#allocation53_spill] sm:$0xff] %v6332_v35  ;;  %v6340_v5 = vadd.f32 %v2531_v9, %v2275_v51  ;;  %3145 = vmatprep.mubr.f32.mxu1 %v7878_v20  ;;  %v7882_v17 = vmax.f32 %v7881_v10, 0.0  ;;  %v7884_v9 = vld [vmem:[#allocation32_spill] sm:$0xff] }
 0x2ca   : > { %v6344_v30 = vpop.f32.mrf.mxu0  ;;  %v2533_v58 = vpop.f32.mrf.mxu1  ;;  %v7885_v44 = vmax.f32 %v7884_v9, 0.0 }
 0x2cb   : > { %7876 = vst [vmem:[#allocation56_spill] sm:$0xff] %v6340_v5  ;;  %v6348_v42 = vadd.f32 %v2533_v58, %v2277_v45 }
 0x2cc   : > { %v6350_v21 = vpop.f32.mrf.mxu0  ;;  %v2537_v18 = vpop.f32.mrf.mxu1  ;;  %3146 = vmatmul.mubr.f32.gmra.mxu1 %v7882_v17  ;;  %v7889_v17 = vld [vmem:[#allocation30_spill] sm:$0xff] }
 0x2cd   : > { %7879 = vst [vmem:[#allocation58_spill] sm:$0xff] %v6348_v42  ;;  %7880 = vst [vmem:[#allocation61_spill] sm:$0xff] %v6350_v21  ;;  %v6356_v51 = vadd.f32 %v2537_v18, %v2281_v13  ;;  %3151 = vmatprep.mubr.f32.mxu1 %v7885_v44  ;;  %v7890_v21 = vmax.f32 %v7889_v17, 0.0  ;;  %v7892_v18 = vld [vmem:[#allocation34_spill] sm:$0xff] }
 0x2ce   : > { %v6360_v20 = vpop.f32.mrf.mxu0  ;;  %v2539_v27 = vpop.f32.mrf.mxu1  ;;  %v7893_v9 = vmax.f32 %v7892_v18, 0.0 }
 0x2cf   : > { %7883 = vst [vmem:[#allocation62_spill] sm:$0xff] %v6356_v51  ;;  %7886 = vst [vmem:[#allocation65_spill] sm:$0xff] %v6360_v20  ;;  %v6364_v58 = vadd.f32 %v2539_v27, %v2283_v62 }
 0x2d0   : > { %v6366_v45 = vpop.f32.mrf.mxu0  ;;  %v2543_v10 = vpop.f32.mrf.mxu1  ;;  %3152 = vmatmul.mubr.f32.gmra.mxu1 %v7890_v21  ;;  %v7896_v21 = vld [vmem:[#allocation33_spill] sm:$0xff] }
 0x2d1   : > { %7887 = vst [vmem:[#allocation66_spill] sm:$0xff] %v6364_v58  ;;  %7888 = vst [vmem:[#allocation69_spill] sm:$0xff] %v6366_v45  ;;  %v6372_v13 = vadd.f32 %v2543_v10, %v2287_v49  ;;  %3157 = vmatprep.mubr.f32.mxu1 %v7893_v9  ;;  %v7897_v45 = vmax.f32 %v7896_v21, 0.0  ;;  %v7898_v49 = vld [vmem:[#allocation36_spill] sm:$0xff] }
 0x2d2   : > { %v6376_v44 = vpop.f32.mrf.mxu0  ;;  %v2545_v20 = vpop.f32.mrf.mxu1  ;;  %v7899_v10 = vmax.f32 %v7898_v49, 0.0  ;;  %v7908_v49 = vld [vmem:[#allocation37_spill] sm:$0xff] }
 0x2d3   : > { %7891 = vst [vmem:[#allocation70_spill] sm:$0xff] %v6372_v13  ;;  %7894 = vst [vmem:[#allocation71_spill] sm:$0xff] %v6376_v44  ;;  %v6380_v27 = vadd.f32 %v2545_v20, %v2289_v56  ;;  %v7902_v20 = vld [vmem:[#allocation35_spill] sm:$0xff] }
 0x2d4   : > { %v6382_v62 = vpop.f32.mrf.mxu0  ;;  %v2549_v17 = vpop.f32.mrf.mxu1  ;;  %3158 = vmatmul.mubr.f32.gmra.mxu1 %v7897_v45  ;;  %v7903_v56 = vmax.f32 %v7902_v20, 0.0 }
 0x2d5   : > { %7895 = vst [vmem:[#allocation73_spill] sm:$0xff] %v6382_v62  ;;  %v6386_v40 = vadd.f32 %v2549_v17, %v2293_v63  ;;  %3163 = vmatprep.mubr.f32.mxu1 %v7899_v10  ;;  %v7904_v62 = vld [vmem:[#allocation38_spill] sm:$0xff]  ;;  %v7909_v10 = vmax.f32 %v7908_v49, 0.0 }
 0x2d6   : > { %v6390_v18 = vpop.f32.mrf.mxu0  ;;  %v6392_v9 = vpop.f32.mrf.mxu1  ;;  %v7905_v43 = vmax.f32 %v7904_v62, 0.0 }
 0x2d7   : > { %7900 = vst [vmem:[#allocation76_spill] sm:$0xff] %v6390_v18  ;;  %v7910_v18 = vld [vmem:[#allocation40_spill] sm:$0xff] }
 0x2d8   : > { %v6394_v44 = vpop.f32.mrf.mxu0  ;;  %v6396_v25 = vpop.f32.mrf.mxu1  ;;  %3164 = vmatmul.mubr.f32.gmra.mxu1 %v7903_v56  ;;  %v7914_v56 = vld [vmem:[#allocation39_spill] sm:$0xff] }
 0x2d9   : > { %7901 = vst [vmem:[#allocation77_spill] sm:$0xff] %v6394_v44  ;;  %3169 = vmatprep.mubr.f32.mxu1 %v7905_v43  ;;  %v7911_v44 = vmax.f32 %v7910_v18, 0.0 }
 0x2da   : > { %v6402_v45 = vpop.f32.mrf.mxu0  ;;  %v6404_v63 = vpop.f32.mrf.mxu1 }
 0x2db   : > { %7906 = vst [vmem:[#allocation80_spill] sm:$0xff] %v6402_v45  ;;  %v7915_v45 = vmax.f32 %v7914_v56, 0.0  ;;  %v7926_v56 = vmax.f32 %v5991_v15, 0.0 }
 0x2dc   : > { %v6406_v17 = vpop.f32.mrf.mxu0  ;;  %v6408_v21 = vpop.f32.mrf.mxu1  ;;  %3170 = vmatmul.mubr.f32.gmra.mxu1 %v7909_v10  ;;  %v7920_v10 = vld [vmem:[#allocation41_spill] sm:$0xff] }
 0x2dd   : > { %7907 = vst [vmem:[#allocation78_spill] sm:$0xff] %v6406_v17  ;;  %3175 = vmatprep.mubr.f32.mxu1 %v7911_v44  ;;  %v7916_v17 = vld [vmem:[#allocation42_spill] sm:$0xff] }
 0x2de   : > { %v6414_v53 = vpop.f32.mrf.mxu0  ;;  %v6416_v20 = vpop.f32.mrf.mxu1  ;;  %v7917_v35 = vmax.f32 %v7916_v17, 0.0 }
 0x2df   : > { %7912 = vst [vmem:[#allocation79_spill] sm:$0xff] %v6414_v53  ;;  %v7921_v53 = vmax.f32 %v7920_v10, 0.0 }
 0x2e0   : > { %v6418_v62 = vpop.f32.mrf.mxu0  ;;  %v6420_v43 = vpop.f32.mrf.mxu1  ;;  %3176 = vmatmul.mubr.f32.gmra.mxu1 %v7915_v45 }
 0x2e1   : > { %7913 = vst [vmem:[#allocation81_spill] sm:$0xff] %v6418_v62  ;;  %3181 = vmatprep.mubr.f32.mxu1 %v7917_v35  ;;  %v7922_v62 = vld [vmem:[#allocation43_spill] sm:$0xff] }
 0x2e2   : > { %v6426_v5 = vpop.f32.mrf.mxu0  ;;  %v6428_v49 = vpop.f32.mrf.mxu1  ;;  %v7923_v42 = vmax.f32 %v7922_v62, 0.0  ;;  %v7930_v62 = vmax.f32 %v6007_v59, 0.0  ;;  %v2341_v59 = vadd.f32 %v6227_v26, %v6254_v22 }
 0x2e3   : > { %7918 = vst [vmem:[#allocation82_spill] sm:$0xff] %v6426_v5  ;;  %v7927_v5 = vmax.f32 %v6011_v29, 0.0  ;;  %v7934_v29 = vmax.f32 %v6023_v4, 0.0  ;;  %v2343_v4 = vadd.f32 %v6231_v24, %v6262_v1  ;;  %v2349_v24 = vadd.f32 %v6244_v28, %v6262_v1 }
 0x2e4   : > { %v6430_v18 = vpop.f32.mrf.mxu0  ;;  %v6432_v44 = vpop.f32.mrf.mxu1  ;;  %3182 = vmatmul.mubr.f32.gmra.mxu1 %v7921_v53 }
 0x2e5   : > { %7919 = vst [vmem:[#allocation83_spill] sm:$0xff] %v6430_v18  ;;  %3187 = vmatprep.mubr.f32.mxu1 %v7923_v42 }
 0x2e6   : > { %v6438_v51 = vpop.f32.mrf.mxu0  ;;  %v6440_v45 = vpop.f32.mrf.mxu1 }
 0x2e7   : > { %7924 = vst [vmem:[#allocation84_spill] sm:$0xff] %v6438_v51  ;;  %v7931_v51 = vmax.f32 %v6027_v8, 0.0 }
 0x2e8   : > { %v6442_v17 = vpop.f32.mrf.mxu0  ;;  %v6444_v35 = vpop.f32.mrf.mxu1  ;;  %3188 = vmatmul.mubr.f32.gmra.mxu1 %v7926_v56 }
 0x2e9   : > { %7925 = vst [vmem:[#allocation85_spill] sm:$0xff] %v6442_v17  ;;  %3193 = vmatprep.mubr.f32.mxu1 %v7927_v5  ;;  %v7935_v5 = vmax.f32 %v6045_v34, 0.0 }
 0x2ea   : > { %v6450_v18 = vpop.f32.mrf.mxu0  ;;  %v2581_v53 = vpop.f32.mrf.mxu1 }
 0x2eb   : > { %7928 = vst [vmem:[#allocation23_spill] sm:$0xff] %v6450_v18 }
 0x2ec   : > { %v6452_v10 = vpop.f32.mrf.mxu0  ;;  %v2585_v42 = vpop.f32.mrf.mxu1  ;;  %3194 = vmatmul.mubr.f32.gmra.mxu1 %v7930_v62  ;;  %v7938_v62 = vmax.f32 %v6039_v47, 0.0 }
 0x2ed   : > { %7929 = vst [vmem:[#allocation18_spill] sm:$0xff] %v6452_v10  ;;  %3199 = vmatprep.mubr.f32.mxu1 %v7931_v51 }
 0x2ee   : > { %v2587_v17 = vpop.f32.mrf.mxu1  ;;  %v6458_v58 = vpop.f32.mrf.mxu0 }
 0x2ef   : > { %7932 = vst [vmem:[#allocation21_spill] sm:$0xff] %v6458_v58 }
 0x2f0   : > { %v2591_v15 = vpop.f32.mrf.mxu1  ;;  %v6460_v56 = vpop.f32.mrf.mxu0  ;;  %3200 = vmatmul.mubr.f32.gmra.mxu1 %v7934_v29 }
 0x2f1   : > { %7933 = vst [vmem:[#allocation24_spill] sm:$0xff] %v6460_v56  ;;  %3205 = vmatprep.mubr.f32.mxu1 %v7935_v5  ;;  %v2337_v56 = vadd.f32 %v6221_v11, %v6262_v1  ;;  %v2331_v11 = vadd.f32 %v6209_v38, %v6262_v1  ;;  %v2329_v38 = vadd.f32 %v6203_v52, %v6254_v22 }
 0x2f2   : > { %v2593_v10 = vpop.f32.mrf.mxu1  ;;  %v6466_v18 = vpop.f32.mrf.mxu0  ;;  %v2359_v52 = vadd.f32 %v6266_v0, %v6254_v22 }
 0x2f3   : > { %7936 = vst [vmem:[#allocation27_spill] sm:$0xff] %v6466_v18  ;;  %v2347_v18 = vadd.f32 %v6237_v37, %v6254_v22  ;;  %v2594_v26 = vadd.f32 %v2593_v10, %v2337_v56  ;;  %v2588_v56 = vadd.f32 %v2587_v17, %v2331_v11 }
 0x2f4   : > { %v2597_v8 = vpop.f32.mrf.mxu1  ;;  %v6470_v51 = vpop.f32.mrf.mxu0  ;;  %3206 = vmatmul.mubr.f32.gmra.mxu1 %v7938_v62 }
 0x2f5   : > { %7937 = vst [vmem:[#allocation22_spill] sm:$0xff] %v6470_v51  ;;  %v2598_v34 = vadd.f32 %v2597_v8, %v2341_v59  ;;  %v2335_v51 = vadd.f32 %v6215_v23, %v6254_v22  ;;  %v2353_v23 = vadd.f32 %v6250_v31, %v6254_v22  ;;  %v2586_v31 = vadd.f32 %v2585_v42, %v2329_v38 }
 0x2f6   : > { %v2599_v29 = vpop.f32.mrf.mxu1  ;;  %v6478_v5 = vpop.f32.mrf.mxu0  ;;  %v3265_v11 = vmax.f32 %v2588_v56, 0.0  ;;  %v2319_v42 = vadd.f32 %v6185_v33, %v6262_v1  ;;  %v2317_v33 = vadd.f32 %v6179_v19, %v6254_v22  ;;  %v2371_v19 = vadd.f32 %v6296_v48, %v6254_v22 }
 0x2f7   : > { %7939 = vst [vmem:[#allocation25_spill] sm:$0xff] %v6478_v5  ;;  %v2600_v58 = vadd.f32 %v2599_v29, %v2343_v4  ;;  %v2592_v5 = vadd.f32 %v2591_v15, %v2335_v51  ;;  %v3272_v13 = vmax.f32 %v2598_v34, 0.0  ;;  %v3269_v4 = vmax.f32 %v2594_v26, 0.0 }
 0x2f8   : > { %v2603_v47 = vpop.f32.mrf.mxu1  ;;  %v6484_v62 = vpop.f32.mrf.mxu0  ;;  %v2355_v15 = vadd.f32 %v6256_v6, %v6262_v1  ;;  %v2576_v56 = vadd.f32 %v6440_v45, %v2319_v42 }
 0x2f9   : > { %v3273_v59 = vmax.f32 %v2600_v58, 0.0  ;;  %v6490_v8 = vadd.f32 %v2603_v47, %v2347_v18  ;;  %v2325_v18 = vadd.f32 %v6197_v39, %v6262_v1  ;;  %v3268_v17 = vmax.f32 %v2592_v5, 0.0 }
 0x2fa   : > { %v2605_v37 = vpop.f32.mrf.mxu1  ;;  %v6492_v10 = vpop.f32.mrf.mxu0  ;;  %v2323_v39 = vadd.f32 %v6191_v61, %v6254_v22  ;;  %v2361_v5 = vadd.f32 %v6270_v7, %v6262_v1  ;;  %v2365_v61 = vadd.f32 %v6280_v36, %v6254_v22  ;;  %v2574_v36 = vadd.f32 %v6432_v44, %v2317_v33 }
 0x2fb   : > { %7940 = vst [vmem:[#allocation31_spill] sm:$0xff] %v6490_v8  ;;  %v6496_v29 = vadd.f32 %v2605_v37, %v2349_v24  ;;  %3372 = vmatprep.subr.mxu0 %v3273_v59  ;;  %v2582_v47 = vadd.f32 %v2581_v53, %v2325_v18  ;;  %v3264_v53 = vmax.f32 %v2586_v31, 0.0  ;;  %v2367_v18 = vadd.f32 %v6286_v57, %v6262_v1 }
 0x2fc   : > { %v2609_v28 = vpop.f32.mrf.mxu1  ;;  %v6500_v58 = vpop.f32.mrf.mxu0  ;;  %3373 = vmatpush1.xpose.msra.mxu0 %v3272_v13  ;;  %v2580_v0 = vadd.f32 %v6444_v35, %v2323_v39  ;;  %v2313_v35 = vadd.f32 %v6173_v14, %v6262_v1  ;;  %v2311_v57 = vadd.f32 %v6167_v55, %v6254_v22  ;;  %v2307_v44 = vadd.f32 %v6161_v32, %v6262_v1 }
 0x2fd   : > { %v6506_v51 = vadd.f32 %v2609_v28, %v2353_v23  ;;  %3374 = vmatprep.subr.mxu0 %v3269_v4  ;;  %v3261_v4 = vmax.f32 %v2582_v47, 0.0  ;;  %v2373_v39 = vadd.f32 %v6302_v54, %v6262_v1  ;;  %v2377_v55 = vadd.f32 %v6312_v41, %v6254_v22 }
 0x2fe   : > { %v2611_v34 = vpop.f32.mrf.mxu1  ;;  %v6508_v26 = vpop.f32.mrf.mxu0  ;;  %v3260_v45 = vmax.f32 %v2580_v0, 0.0  ;;  %v2568_v48 = vadd.f32 %v6420_v43, %v2311_v57  ;;  %v2564_v0 = vadd.f32 %v6416_v20, %v2307_v44  ;;  %v2305_v32 = vadd.f32 %v6155_v60, %v6254_v22 }
 0x2ff   : > { %v6512_v13 = vadd.f32 %v2611_v34, %v2355_v15  ;;  %v2570_v34 = vadd.f32 %v6428_v49, %v2313_v35  ;;  %v3256_v49 = vmax.f32 %v2574_v36, 0.0  ;;  %v2301_v43 = vadd.f32 %v6149_v3, %v6262_v1 }
 0x300   : > { %v2615_v24 = vpop.f32.mrf.mxu1  ;;  %v6516_v6 = vpop.f32.mrf.mxu0  ;;  %3375 = vmatpush1.xpose.msra.mxu0 %v3268_v17  ;;  %v2562_v41 = vadd.f32 %v6408_v21, %v2305_v32  ;;  %v3252_v20 = vmax.f32 %v2568_v48, 0.0  ;;  %v2383_v60 = vadd.f32 %v6328_v2, %v6254_v22  ;;  %v2299_v3 = vadd.f32 %v6143_v50, %v6254_v22 }
 0x301   : > { %v6522_v59 = vadd.f32 %v2615_v24, %v2359_v52  ;;  %3376 = vmatprep.subr.mxu0 %v3265_v11  ;;  %v3257_v52 = vmax.f32 %v2576_v56, 0.0  ;;  %v2379_v56 = vadd.f32 %v6318_v46, %v6262_v1  ;;  %v2558_v35 = vadd.f32 %v6404_v63, %v2301_v43 }
 0x302   : > { %v2617_v37 = vpop.f32.mrf.mxu1  ;;  %v6525_v23 = vpop.f32.mrf.mxu0  ;;  %v2295_v21 = vadd.f32 %v6137_v16, %v6262_v1  ;;  %v2556_v2 = vadd.f32 %v6396_v25, %v2299_v3  ;;  %v3248_v63 = vmax.f32 %v2562_v41, 0.0  ;;  %v2389_v50 = vadd.f32 %v6344_v30, %v6254_v22 }
 0x303   : > { %v6530_v38 = vadd.f32 %v2617_v37, %v2361_v5  ;;  %v3237_v32 = vmax.f32 %v6380_v27, 0.0  ;;  %v7954_v27 = vld [vmem:[#allocation62_spill] sm:$0xff] }
 0x304   : > { %v2621_v7 = vpop.f32.mrf.mxu1  ;;  %v6534_v28 = vpop.f32.mrf.mxu0  ;;  %3377 = vmatpush1.xpose.msra.mxu0 %v3264_v53  ;;  %v3253_v53 = vmax.f32 %v2570_v34, 0.0  ;;  %v2552_v57 = vadd.f32 %v6392_v9, %v2295_v21  ;;  %v3244_v25 = vmax.f32 %v2556_v2, 0.0  ;;  %v3240_v9 = vmax.f32 %v6386_v40, 0.0 }
 0x305   : > { %v6540_v15 = vadd.f32 %v2621_v7, %v2365_v61  ;;  %3378 = vmatprep.subr.mxu0 %v3261_v4  ;;  %v3232_v3 = vmax.f32 %v7954_v27, 0.0 }
 0x306   : > { %v2623_v31 = vpop.f32.mrf.mxu1  ;;  %v6543_v17 = vpop.f32.mrf.mxu0 }
 0x307   : > { %v6548_v47 = vadd.f32 %v2623_v31, %v2367_v18  ;;  %v3249_v18 = vmax.f32 %v2564_v0, 0.0  ;;  %v2385_v31 = vadd.f32 %v6334_v12, %v6262_v1 }
 0x308   : > { %v2627_v14 = vpop.f32.mrf.mxu1  ;;  %v6552_v11 = vpop.f32.mrf.mxu0  ;;  %3379 = vmatpush1.xpose.msra.mxu0 %v3260_v45 }
 0x309   : > { %v6558_v24 = vadd.f32 %v2627_v14, %v2371_v19  ;;  %3380 = vmatprep.subr.mxu0 %v3257_v52  ;;  %v3245_v14 = vmax.f32 %v2558_v35, 0.0 }
 0x30a   : > { %v2629_v42 = vpop.f32.mrf.mxu1  ;;  %v6561_v5 = vpop.f32.mrf.mxu0 }
 0x30b   : > { %v6566_v37 = vadd.f32 %v2629_v42, %v2373_v39  ;;  %v3241_v42 = vmax.f32 %v2552_v57, 0.0 }
 0x30c   : > { %v2633_v54 = vpop.f32.mrf.mxu1  ;;  %v6570_v61 = vpop.f32.mrf.mxu0  ;;  %3381 = vmatpush1.xpose.msra.mxu0 %v3256_v49 }
 0x30d   : > { %7941 = vst [vmem:[#allocation26_spill] sm:$0xff] %v6570_v61  ;;  %v6576_v4 = vadd.f32 %v2633_v54, %v2377_v55  ;;  %3382 = vmatprep.subr.mxu0 %v3253_v53 }
 0x30e   : > { %v2635_v33 = vpop.f32.mrf.mxu1  ;;  %v6579_v7 = vpop.f32.mrf.mxu0 }
 0x30f   : > { %7942 = vst [vmem:[#allocation19_spill] sm:$0xff] %v6579_v7  ;;  %v6584_v36 = vadd.f32 %v2635_v33, %v2379_v56  ;;  %v7950_v56 = vld [vmem:[#allocation70_spill] sm:$0xff] }
 0x310   : > { %v2639_v46 = vpop.f32.mrf.mxu1  ;;  %v6588_v45 = vpop.f32.mrf.mxu0  ;;  %3383 = vmatpush1.xpose.msra.mxu0 %v3252_v20  ;;  %v3236_v41 = vmax.f32 %v7950_v56, 0.0 }
 0x311   : > { %7943 = vst [vmem:[#allocation29_spill] sm:$0xff] %v6588_v45  ;;  %v6594_v19 = vadd.f32 %v2639_v46, %v2383_v60  ;;  %3384 = vmatprep.subr.mxu0 %v3249_v18  ;;  %v7952_v60 = vld [vmem:[#allocation66_spill] sm:$0xff] }
 0x312   : > { %v2641_v34 = vpop.f32.mrf.mxu1  ;;  %v6597_v52 = vpop.f32.mrf.mxu0  ;;  %v3233_v40 = vmax.f32 %v7952_v60, 0.0 }
 0x313   : > { %7944 = vst [vmem:[#allocation54_spill] sm:$0xff] %v6597_v52  ;;  %v6602_v44 = vadd.f32 %v2641_v34, %v2385_v31  ;;  %v7956_v31 = vld [vmem:[#allocation58_spill] sm:$0xff] }
 0x314   : > { %v2645_v16 = vpop.f32.mrf.mxu1  ;;  %v6604_v39 = vpop.f32.mrf.mxu0  ;;  %3385 = vmatpush1.xpose.msra.mxu0 %v3248_v63  ;;  %v3229_v2 = vmax.f32 %v7956_v31, 0.0  ;;  %v7964_v31 = vld [vmem:[#allocation49_spill] sm:$0xff] }
 0x315   : > { %7945 = vst [vmem:[#allocation51_spill] sm:$0xff] %v6604_v39  ;;  %v6606_v12 = vadd.f32 %v2645_v16, %v2389_v50  ;;  %3386 = vmatprep.subr.mxu0 %v3245_v14  ;;  %v7958_v50 = vld [vmem:[#allocation56_spill] sm:$0xff]  ;;  %v7969_v39 = vld [vmem:[#allocation46_spill] sm:$0xff] }
 0x316   : > { %v6608_v48 = vpop.f32.mrf.mxu1  ;;  %v6610_v49 = vpop.f32.mrf.mxu0  ;;  %v3228_v57 = vmax.f32 %v7958_v50, 0.0 }
 0x317   : > { %7946 = vst [vmem:[#allocation55_spill] sm:$0xff] %v6610_v49  ;;  %v7970_v49 = vld [vmem:[#allocation72_spill] sm:$0xff] }
 0x318   : > { %v6612_v55 = vpop.f32.mrf.mxu1  ;;  %v6614_v30 = vpop.f32.mrf.mxu0  ;;  %3387 = vmatpush1.xpose.msra.mxu0 %v3244_v25  ;;  %v7960_v25 = vld [vmem:[#allocation53_spill] sm:$0xff] }
 0x319   : > { %7947 = vst [vmem:[#allocation57_spill] sm:$0xff] %v6614_v30  ;;  %3388 = vmatprep.subr.mxu0 %v3241_v42  ;;  %v3225_v42 = vmax.f32 %v7960_v25, 0.0  ;;  %v7966_v25 = vld [vmem:[#allocation48_spill] sm:$0xff] }
 0x31a   : > { %v6617_v0 = vpop.f32.mrf.mxu1  ;;  %v6619_v53 = vpop.f32.mrf.mxu0  ;;  %v3217_v7 = vmax.f32 %v7966_v25, 0.0  ;;  %v7973_v25 = vld [vmem:[#allocation85_spill] sm:$0xff] }
 0x31b   : > { %7948 = vst [vmem:[#allocation60_spill] sm:$0xff] %v6619_v53 }
 0x31c   : > { %v6622_v54 = vpop.f32.mrf.mxu1  ;;  %v6624_v43 = vpop.f32.mrf.mxu0  ;;  %3389 = vmatpush1.xpose.msra.mxu0 %v3240_v9 }
 0x31d   : > { %7949 = vst [vmem:[#allocation59_spill] sm:$0xff] %v6624_v43  ;;  %3390 = vmatprep.subr.mxu0 %v3237_v32  ;;  %v7961_v32 = vld [vmem:[#allocation52_spill] sm:$0xff]  ;;  %v7975_v43 = vld [vmem:[#allocation74_spill] sm:$0xff] }
 0x31e   : > { %v6627_v20 = vpop.f32.mrf.mxu1  ;;  %v6629_v33 = vpop.f32.mrf.mxu0  ;;  %v3224_v56 = vmax.f32 %v7961_v32, 0.0 }
 0x31f   : > { %7951 = vst [vmem:[#allocation64_spill] sm:$0xff] %v6629_v33 }
 0x320   : > { %v6632_v35 = vpop.f32.mrf.mxu1  ;;  %v6634_v18 = vpop.f32.mrf.mxu0  ;;  %3391 = vmatpush1.xpose.msra.mxu0 %v3236_v41 }
 0x321   : > { %7953 = vst [vmem:[#allocation63_spill] sm:$0xff] %v6634_v18  ;;  %3392 = vmatprep.subr.mxu0 %v3233_v40  ;;  %v7963_v40 = vld [vmem:[#allocation50_spill] sm:$0xff] }
 0x322   : > { %v6637_v46 = vpop.f32.mrf.mxu1  ;;  %v6639_v21 = vpop.f32.mrf.mxu0  ;;  %v3221_v27 = vmax.f32 %v7963_v40, 0.0  ;;  %v3213_v40 = vmax.f32 %v7969_v39, 0.0  ;;  %v7976_v39 = vld [vmem:[#allocation45_spill] sm:$0xff] }
 0x323   : > { %7955 = vst [vmem:[#allocation68_spill] sm:$0xff] %v6639_v21  ;;  %v3212_v18 = vmax.f32 %v7976_v39, 0.0 }
 0x324   : > { %v6642_v63 = vpop.f32.mrf.mxu1  ;;  %v6644_v34 = vpop.f32.mrf.mxu0  ;;  %3393 = vmatpush1.xpose.msra.mxu0 %v3232_v3 }
 0x325   : > { %7957 = vst [vmem:[#allocation67_spill] sm:$0xff] %v6644_v34  ;;  %3394 = vmatprep.subr.mxu0 %v3229_v2  ;;  %v3220_v2 = vmax.f32 %v7964_v31, 0.0  ;;  %v7972_v31 = vld [vmem:[#allocation23_spill] sm:$0xff] }
 0x326   : > { %v6647_v14 = vpop.f32.mrf.mxu1  ;;  %v6649_v16 = vpop.f32.mrf.mxu0  ;;  %v2437_v30 = vadd.f32 %v7972_v31, %v6254_v22  ;;  %v7978_v31 = vld [vmem:[#allocation21_spill] sm:$0xff] }
 0x327   : > { %7959 = vst [vmem:[#allocation28_spill] sm:$0xff] %v6649_v16 }
 0x328   : > { %v6652_v9 = vpop.f32.mrf.mxu1  ;;  %3395 = vmatpush1.xpose.msra.mxu0 %v3228_v57  ;;  %v6655_v41 = vpop.f32.mrf.mxu0  ;;  %v7967_v57 = vld [vmem:[#allocation47_spill] sm:$0xff] }
 0x329   : > { %3396 = vmatprep.subr.mxu0 %v3225_v42  ;;  %7962 = vst [vmem:[#allocation75_spill] sm:$0xff] %v6655_v41  ;;  %v3216_v42 = vmax.f32 %v7967_v57, 0.0 }
 0x32a   : > { %v2677_v60 = vpop.f32.mrf.mxu1  ;;  %v6659_v50 = vpop.f32.mrf.mxu0 }
 0x32b   : > { %7965 = vst [vmem:[#allocation32_spill] sm:$0xff] %v6659_v50 }
 0x32c   : > { %v2681_v3 = vpop.f32.mrf.mxu1  ;;  %3397 = vmatpush1.xpose.msra.mxu0 %v3224_v56  ;;  %v6663_v32 = vpop.f32.mrf.mxu0  ;;  %v7971_v56 = vld [vmem:[#allocation44_spill] sm:$0xff] }
 0x32d   : > { %3398 = vmatprep.subr.mxu0 %v3221_v27  ;;  %7968 = vst [vmem:[#allocation30_spill] sm:$0xff] %v6663_v32  ;;  %v6668_v27 = vrot.slane %v7971_v56, %v7970_v49  ;;  %v6678_v33 = vrot.slane %v7971_v56, %v7975_v43  ;;  %v7980_v56 = vld [vmem:[#allocation83_spill] sm:$0xff] }
 0x32e   : > { %v2683_v61 = vpop.f32.mrf.mxu1  ;;  %v6681_v49 = vpop.f32.mrf.mxu0  ;;  %v2427_v43 = vadd.f32 %v7980_v56, %v6262_v1  ;;  %v7985_v56 = vld [vmem:[#allocation82_spill] sm:$0xff] }
 0x32f   : > { %7977 = vst [vmem:[#allocation34_spill] sm:$0xff] %v6681_v49  ;;  %v2425_v50 = vadd.f32 %v7985_v56, %v6254_v22  ;;  %v7990_v56 = vld [vmem:[#allocation79_spill] sm:$0xff] }
 0x330   : > { %v2687_v45 = vpop.f32.mrf.mxu1  ;;  %3399 = vmatpush1.xpose.msra.mxu0 %v3220_v2  ;;  %v2433_v2 = vadd.f32 %v7973_v25, %v6262_v1  ;;  %v7979_v25 = vld [vmem:[#allocation84_spill] sm:$0xff] }
 0x331   : > { %3400 = vmatprep.subr.mxu0 %v3217_v7  ;;  %v7974_v7 = vld [vmem:[#allocation18_spill] sm:$0xff]  ;;  %v2431_v32 = vadd.f32 %v7979_v25, %v6254_v22 }
 0x332   : > { %v2689_v52 = vpop.f32.mrf.mxu1  ;;  %v2439_v57 = vadd.f32 %v7974_v7, %v6262_v1 }
 0x333   : > { %v2690_v16 = vadd.f32 %v2689_v52, %v2433_v2 }
 0x334   : > { %v2693_v53 = vpop.f32.mrf.mxu1  ;;  %3401 = vmatpush1.xpose.msra.mxu0 %v3216_v42  ;;  %v2765_v42 = vadd.f32 %v7978_v31, %v6668_v27 }
 0x335   : > { %3402 = vmatprep.subr.mxu0 %v3213_v40  ;;  %v2694_v21 = vadd.f32 %v2693_v53, %v2437_v30  ;;  %v7981_v40 = vld [vmem:[#allocation24_spill] sm:$0xff]  ;;  %v2688_v30 = vadd.f32 %v2687_v45, %v2431_v32  ;;  %v6693_v53 = vpop.f32.mrf.mxu0  ;;  %v3333_v25 = vmax.f32 %v2690_v16, 0.0  ;;  %v7987_v32 = vld [vmem:[#allocation22_spill] sm:$0xff] }
 0x336   : > { %v2695_v34 = vpop.f32.mrf.mxu1  ;;  %v2767_v39 = vadd.f32 %v7981_v40, %v6678_v33 }
 0x337   : > { %v2696_v8 = vadd.f32 %v2695_v34, %v2439_v57  ;;  %v3336_v31 = vmax.f32 %v2694_v21, 0.0  ;;  %v7983_v34 = vld [vmem:[#allocation27_spill] sm:$0xff]  ;;  %v2684_v57 = vadd.f32 %v2683_v61, %v2427_v43  ;;  %v2773_v21 = vadd.f32 %v7987_v32, %v6678_v33  ;;  %v6707_v43 = vpop.f32.mrf.mxu0 }
 0x338   : > { %v3021_v7 = vpop.f32.mrf.mxu1  ;;  %3403 = vmatpush1.xpose.msra.mxu0 %v3212_v18  ;;  %v2771_v2 = vadd.f32 %v7983_v34, %v6668_v27  ;;  %v3332_v61 = vmax.f32 %v2688_v30, 0.0 }
 0x339   : > { %v3337_v41 = vmax.f32 %v2696_v8, 0.0  ;;  %v6691_v49 = vadd.f32 %v3021_v7, %v2765_v42  ;;  %v7986_v8 = vld [vmem:[#allocation81_spill] sm:$0xff]  ;;  %v2682_v7 = vadd.f32 %v2681_v3, %v2425_v50  ;;  %v3329_v34 = vmax.f32 %v2684_v57, 0.0  ;;  %v6722_v57 = vpop.f32.mrf.mxu0 }
 0x33a   : > { %v3023_v52 = vpop.f32.mrf.mxu1  ;;  %v2421_v45 = vadd.f32 %v7986_v8, %v6262_v1  ;;  %v2419_v8 = vadd.f32 %v7990_v56, %v6254_v22  ;;  %v2779_v3 = vadd.f32 %v6484_v62, %v6678_v33  ;;  %v2789_v56 = vadd.f32 %v6508_v26, %v6668_v27 }
 0x33b   : > { %7982 = vst [vmem:[#allocation33_spill] sm:$0xff] %v6691_v49  ;;  %v6697_v18 = vadd.f32 %v3023_v52, %v2767_v39  ;;  %3404 = vmatprep.subr.mxu0 %v3337_v41  ;;  %v7989_v41 = vld [vmem:[#allocation25_spill] sm:$0xff] }
 0x33c   : > { %v3027_v40 = vpop.f32.mrf.mxu1  ;;  %3405 = vmatpush2.xpose.msra.mxu0 %v3336_v31  ;;  %v2777_v39 = vadd.f32 %v7989_v41, %v6668_v27  ;;  %v2678_v52 = vadd.f32 %v2677_v60, %v2421_v45  ;;  %v2676_v30 = vadd.f32 %v6652_v9, %v2419_v8  ;;  %v3328_v60 = vmax.f32 %v2682_v7, 0.0  ;;  %v7993_v41 = vld [vmem:[#allocation77_spill] sm:$0xff] }
 0x33d   : > { %7984 = vst [vmem:[#allocation36_spill] sm:$0xff] %v6697_v18  ;;  %v6705_v42 = vadd.f32 %v3027_v40, %v2771_v2  ;;  %3406 = vmatprep.subr.mxu0 %v3333_v25  ;;  %v7991_v2 = vld [vmem:[#allocation78_spill] sm:$0xff]  ;;  %v2783_v45 = vadd.f32 %v6492_v10, %v6668_v27  ;;  %v2409_v9 = vadd.f32 %v7993_v41, %v6262_v1 }
 0x33e   : > { %v3029_v16 = vpop.f32.mrf.mxu1  ;;  %v2415_v25 = vadd.f32 %v7991_v2, %v6262_v1  ;;  %v2785_v7 = vadd.f32 %v6500_v58, %v6678_v33 }
 0x33f   : > { %7988 = vst [vmem:[#allocation35_spill] sm:$0xff] %v6705_v42  ;;  %v6711_v31 = vadd.f32 %v3029_v16, %v2773_v21  ;;  %v3325_v21 = vmax.f32 %v2678_v52, 0.0  ;;  %v7992_v16 = vld [vmem:[#allocation80_spill] sm:$0xff]  ;;  %v6738_v52 = vpop.f32.mrf.mxu0  ;;  %v2666_v8 = vadd.f32 %v6637_v46, %v2409_v9  ;;  %v7996_v9 = vld [vmem:[#allocation71_spill] sm:$0xff] }
 0x340   : > { %v3033_v49 = vpop.f32.mrf.mxu1  ;;  %3407 = vmatpush2.xpose.msra.mxu0 %v3332_v61  ;;  %v2672_v32 = vadd.f32 %v6647_v14, %v2415_v25  ;;  %v2413_v62 = vadd.f32 %v7992_v16, %v6254_v22  ;;  %v3324_v14 = vmax.f32 %v2676_v30, 0.0  ;;  %v2791_v30 = vadd.f32 %v6516_v6, %v6678_v33 }
 0x341   : > { %v6719_v50 = vadd.f32 %v3033_v49, %v2777_v39  ;;  %3408 = vmatprep.subr.mxu0 %v3329_v34  ;;  %v2795_v16 = vadd.f32 %v6525_v23, %v6668_v27  ;;  %v2401_v6 = vadd.f32 %v7996_v9, %v6254_v22 }
 0x342   : > { %v3035_v40 = vpop.f32.mrf.mxu1  ;;  %v2670_v10 = vadd.f32 %v6642_v63, %v2413_v62  ;;  %v3321_v2 = vmax.f32 %v2672_v32, 0.0  ;;  %v6754_v32 = vpop.f32.mrf.mxu0 }
 0x343   : > { %v6727_v61 = vadd.f32 %v3035_v40, %v2779_v3  ;;  %v7994_v3 = vld [vmem:[#allocation76_spill] sm:$0xff]  ;;  %v7995_v40 = vld [vmem:[#allocation73_spill] sm:$0xff]  ;;  %v2658_v23 = vadd.f32 %v6622_v54, %v2401_v6 }
 0x344   : > { %v3039_v49 = vpop.f32.mrf.mxu1  ;;  %3409 = vmatpush2.xpose.msra.mxu0 %v3328_v60  ;;  %v2407_v58 = vadd.f32 %v7994_v3, %v6254_v22  ;;  %v2403_v63 = vadd.f32 %v7995_v40, %v6262_v1  ;;  %v3320_v46 = vmax.f32 %v2670_v10, 0.0  ;;  %v2797_v10 = vadd.f32 %v6534_v28, %v6678_v33  ;;  %v7998_v40 = vld [vmem:[#allocation65_spill] sm:$0xff] }
 0x345   : > { %v6735_v39 = vadd.f32 %v3039_v49, %v2783_v45  ;;  %3410 = vmatprep.subr.mxu0 %v3325_v21  ;;  %v3317_v49 = vmax.f32 %v2666_v8, 0.0  ;;  %v2395_v28 = vadd.f32 %v7998_v40, %v6254_v22  ;;  %v2807_v22 = vadd.f32 %v6561_v5, %v6668_v27 }
 0x346   : > { %v3041_v34 = vpop.f32.mrf.mxu1  ;;  %v2664_v26 = vadd.f32 %v6632_v35, %v2407_v58  ;;  %v2660_v62 = vadd.f32 %v6627_v20, %v2403_v63  ;;  %v3304_v5 = vmax.f32 %v6606_v12, 0.0  ;;  %v3296_v12 = vmax.f32 %v6576_v4, 0.0 }
 0x347   : > { %v6743_v25 = vadd.f32 %v3041_v34, %v2785_v7  ;;  %v3288_v4 = vmax.f32 %v6540_v15, 0.0  ;;  %v3280_v15 = vmax.f32 %v6506_v51, 0.0  ;;  %v8005_v51 = vld [vmem:[#allocation30_spill] sm:$0xff] }
 0x348   : > { %v3045_v60 = vpop.f32.mrf.mxu1  ;;  %3411 = vmatpush2.xpose.msra.mxu0 %v3324_v14  ;;  %v7997_v14 = vld [vmem:[#allocation69_spill] sm:$0xff]  ;;  %v3316_v20 = vmax.f32 %v2664_v26, 0.0  ;;  %v3313_v58 = vmax.f32 %v2660_v62, 0.0  ;;  %v2803_v26 = vadd.f32 %v6552_v11, %v6678_v33 }
 0x349   : > { %v6751_v45 = vadd.f32 %v3045_v60, %v2789_v56  ;;  %3412 = vmatprep.subr.mxu0 %v3321_v2  ;;  %v2397_v35 = vadd.f32 %v7997_v14, %v6262_v1  ;;  %v6770_v56 = vpop.f32.mrf.mxu0  ;;  %v2801_v2 = vadd.f32 %v6543_v17, %v6668_v27  ;;  %v2652_v17 = vadd.f32 %v6612_v55, %v2395_v28 }
 0x34a   : > { %v3047_v21 = vpop.f32.mrf.mxu1 }
 0x34b   : > { %v6759_v41 = vadd.f32 %v3047_v21, %v2791_v30  ;;  %v2654_v3 = vadd.f32 %v6617_v0, %v2397_v35  ;;  %v7999_v30 = vld [vmem:[#allocation61_spill] sm:$0xff]  ;;  %v3312_v0 = vmax.f32 %v2658_v23, 0.0  ;;  %v6786_v21 = vpop.f32.mrf.mxu0  ;;  %v3308_v6 = vmax.f32 %v2652_v17, 0.0 }
 0x34c   : > { %v3051_v7 = vpop.f32.mrf.mxu1  ;;  %3413 = vmatpush2.xpose.msra.mxu0 %v3320_v46  ;;  %v2391_v54 = vadd.f32 %v7999_v30, %v6262_v1  ;;  %v3301_v23 = vmax.f32 %v6602_v44, 0.0 }
 0x34d   : > { %v6767_v34 = vadd.f32 %v3051_v7, %v2795_v16  ;;  %3414 = vmatprep.subr.mxu0 %v3317_v49  ;;  %v3309_v49 = vmax.f32 %v2654_v3, 0.0  ;;  %v6795_v7 = vpop.f32.mrf.mxu0 }
 0x34e   : > { %v3053_v8 = vpop.f32.mrf.mxu1  ;;  %v2648_v62 = vadd.f32 %v6608_v48, %v2391_v54 }
 0x34f   : > { %v6775_v60 = vadd.f32 %v3053_v8, %v2797_v10  ;;  %v6802_v48 = vpop.f32.mrf.mxu0  ;;  %v3300_v8 = vmax.f32 %v6594_v19, 0.0  ;;  %v3292_v19 = vmax.f32 %v6558_v24, 0.0  ;;  %v3284_v24 = vmax.f32 %v6522_v59, 0.0 }
 0x350   : > { %v3057_v63 = vpop.f32.mrf.mxu1  ;;  %3415 = vmatpush2.xpose.msra.mxu0 %v3316_v20  ;;  %v3305_v14 = vmax.f32 %v2648_v62, 0.0 }
 0x351   : > { %v6783_v46 = vadd.f32 %v3057_v63, %v2801_v2  ;;  %3416 = vmatprep.subr.mxu0 %v3313_v58  ;;  %v6810_v2 = vpop.f32.mrf.mxu0  ;;  %v3297_v58 = vmax.f32 %v6584_v36, 0.0  ;;  %v3293_v63 = vmax.f32 %v6566_v37, 0.0 }
 0x352   : > { %v3059_v16 = vpop.f32.mrf.mxu1 }
 0x353   : > { %v6791_v9 = vadd.f32 %v3059_v16, %v2803_v26  ;;  %v6818_v28 = vpop.f32.mrf.mxu0  ;;  %v3289_v26 = vmax.f32 %v6548_v47, 0.0  ;;  %v3285_v16 = vmax.f32 %v6530_v38, 0.0  ;;  %v3277_v38 = vmax.f32 %v6496_v29, 0.0 }
 0x354   : > { %v3063_v1 = vpop.f32.mrf.mxu1  ;;  %3417 = vmatpush2.xpose.msra.mxu0 %v3312_v0 }
 0x355   : > { %v6793_v11 = vadd.f32 %v3063_v1, %v2807_v22  ;;  %3418 = vmatprep.subr.mxu0 %v3309_v49  ;;  %v6826_v54 = vpop.f32.mrf.mxu0  ;;  %v3281_v49 = vmax.f32 %v6512_v13, 0.0 }
 0x356   : > { %v6797_v55 = vpop.f32.mrf.mxu1 }
 0x357   : > { %v6834_v0 = vpop.f32.mrf.mxu0 }
 0x358   : > { %v6799_v35 = vpop.f32.mrf.mxu1  ;;  %3419 = vmatpush2.xpose.msra.mxu0 %v3308_v6 }
 0x359   : > { %3420 = vmatprep.subr.mxu0 %v3305_v14  ;;  %v6840_v62 = vpop.f32.mrf.mxu0 }
 0x35a   : > { %v6804_v10 = vpop.f32.mrf.mxu1 }
 0x35b   : > { %v6844_v6 = vpop.f32.mrf.mxu0 }
 0x35c   : > { %v6807_v20 = vpop.f32.mrf.mxu1  ;;  %3421 = vmatpush2.xpose.msra.mxu0 %v3304_v5  ;;  %8000 = vst [vmem:[#allocation38_spill] sm:$0xff] %v6844_v6  ;;  %v6847_v5 = vld [vmem:[#allocation9] sm:$0xf] }
 0x35d   : > { %3422 = vmatprep.subr.mxu0 %v3301_v23  ;;  %8001 = vst [vmem:[#allocation37_spill] sm:$0xff] %v6847_v5  ;;  %v8002_v23 = vld [vmem:[#allocation32_spill] sm:$0xff]  ;;  %v6858_v29 = vpop.f32.mrf.mxu0 }
 0x35e   : > { %v6812_v3 = vpop.f32.mrf.mxu1  ;;  %v2855_v59 = vadd.f32 %v8002_v23, %v6668_v27 }
 0x360   : > { %v6815_v40 = vpop.f32.mrf.mxu1  ;;  %3423 = vmatpush2.xpose.msra.mxu0 %v3300_v8 }
 0x361   : > { %3424 = vmatprep.subr.mxu0 %v3297_v58  ;;  %v8003_v58 = vld [vmem:[#allocation17_spill] sm:$0xff] }
 0x362   : > { %v6820_v44 = vpop.f32.mrf.mxu1  ;;  %v3359_v13 = vrot.slane %v6847_v5, %v8003_v58  ;;  %v8008_v58 = vld [vmem:[#allocation20_spill] sm:$0xff] }
 0x363   : > { %v3355_v18 = vrot.slane %v6847_v5, %v8008_v58 }
 0x364   : > { %v6823_v30 = vpop.f32.mrf.mxu1  ;;  %3425 = vmatpush2.xpose.msra.mxu0 %v3296_v12  ;;  %v8004_v12 = vld [vmem:[#allocation75_spill] sm:$0xff]  ;;  %3436 = vmatprep.mubr.f32.mxu0 %v3359_v13  ;;  %v2863_v13 = vadd.f32 %v6693_v53, %v6678_v33  ;;  %v8013_v53 = vld [vmem:[#allocation68_spill] sm:$0xff] }
 0x365   : > { %3426 = vmatprep.subr.mxu0 %v3293_v63  ;;  %v2851_v63 = vadd.f32 %v8004_v12, %v6678_v33  ;;  %v8009_v12 = vld [vmem:[#allocation28_spill] sm:$0xff] }
 0x366   : > { %v6828_v36 = vpop.f32.mrf.mxu1  ;;  %v2849_v42 = vadd.f32 %v8009_v12, %v6668_v27 }
 0x368   : > { %v6831_v17 = vpop.f32.mrf.mxu1  ;;  %3427 = vmatpush2.xpose.msra.mxu0 %v3292_v19  ;;  %v2857_v19 = vadd.f32 %v8005_v51, %v6678_v33 }
 0x369   : > { %3428 = vmatprep.subr.mxu0 %v3289_v26  ;;  %v8006_v26 = vld [vmem:[#allocation31_spill] sm:$0xff] }
 0x36a   : > { %v6836_v37 = vpop.f32.mrf.mxu1 }
 0x36c   : > { %v3099_v22 = vpop.f32.mrf.mxu1  ;;  %3429 = vmatpush2.xpose.msra.mxu0 %v3288_v4  ;;  %v3276_v4 = vmax.f32 %v8006_v26, 0.0 }
 0x36d   : > { %3430 = vmatprep.subr.mxu0 %v3285_v16 }
 0x36e   : > { %v3101_v47 = vpop.f32.mrf.mxu1 }
 0x370   : > { %v3105_v1 = vpop.f32.mrf.mxu1  ;;  %3431 = vmatpush2.xpose.msra.mxu0 %v3284_v24 }
 0x371   : > { %3432 = vmatprep.subr.mxu0 %v3281_v49  ;;  %v8007_v49 = vld [vmem:[#allocation34_spill] sm:$0xff] }
 0x372   : > { %v3107_v14 = vpop.f32.mrf.mxu1 }
 0x373   : > { %v3108_v23 = vadd.f32 %v3107_v14, %v2851_v63  ;;  %v2867_v63 = vadd.f32 %v6707_v43, %v6668_v27  ;;  %v8014_v43 = vld [vmem:[#allocation63_spill] sm:$0xff] }
 0x374   : > { %v3111_v8 = vpop.f32.mrf.mxu1  ;;  %3433 = vmatpush2.xpose.msra.mxu0 %v3280_v15  ;;  %v2861_v15 = vadd.f32 %v8007_v49, %v6668_v27 }
 0x375   : > { %3434 = vmatprep.subr.mxu0 %v3277_v38  ;;  %v3112_v16 = vadd.f32 %v3111_v8, %v2855_v59  ;;  %v8010_v38 = vld [vmem:[#allocation74_spill] sm:$0xff]  ;;  %v8011_v59 = vld [vmem:[#allocation67_spill] sm:$0xff] }
 0x376   : > { %v3113_v24 = vpop.f32.mrf.mxu1  ;;  %v3367_v26 = vrot.slane %v6847_v5, %v8010_v38  ;;  %v2845_v8 = vadd.f32 %v8011_v59, %v6678_v33  ;;  %v3271_v38 = vmax.f32 %v3108_v23, 0.0  ;;  %v3341_v59 = vld [vmem:[#allocation2] sm:$0x1] }
 0x377   : > { %v3114_v6 = vadd.f32 %v3113_v24, %v2857_v19  ;;  %v6876_v19 = vpop.f32.mrf.mxu0  ;;  %v3106_v24 = vadd.f32 %v3105_v1, %v2849_v42  ;;  %v3274_v12 = vmax.f32 %v3112_v16, 0.0  ;;  %v2839_v42 = vadd.f32 %v8014_v43, %v6678_v33 }
 0x378   : > { %v3117_v51 = vpop.f32.mrf.mxu1  ;;  %3435 = vmatpush2.xpose.msra.mxu0 %v3276_v4  ;;  %3507 = vmatprep.mubr.f32.mxu1 %v3367_v26  ;;  %v3102_v58 = vadd.f32 %v3101_v47, %v2845_v8  ;;  %v2869_v1 = vadd.f32 %v6722_v57, %v6678_v33  ;;  %v2873_v8 = vadd.f32 %v6738_v52, %v6668_v27 }
 0x379   : > { %v3275_v49 = vmax.f32 %v3114_v6, 0.0  ;;  %v6872_v14 = vadd.f32 %v3117_v51, %v2861_v15  ;;  %v2843_v6 = vadd.f32 %v8013_v53, %v6668_v27  ;;  %v3969_v51 = vmov 0   ;;  %v6888_v16 = vpop.f32.mrf.mxu0 }
 0x37a   : > { %v3119_v4 = vpop.f32.mrf.mxu1  ;;  %3768 = vset.pattern.permute.xlu0 %v3969_v51  ;;  %v3270_v23 = vmax.f32 %v3106_v24, 0.0 }
 0x37b   : > { %8012 = vst [vmem:[#allocation40_spill] sm:$0xff] %v6872_v14  ;;  %v6878_v5 = vadd.f32 %v3119_v4, %v2863_v13  ;;  %3443 = vmatprep.subr.mxu1 %v3275_v49  ;;  %3437 = vmatmul.mubr.f32.vlgmr.msra.gmra.mxu0 %v3355_v18  ;;  %v3100_v18 = vadd.f32 %v3099_v22, %v2843_v6  ;;  %v3267_v49 = vmax.f32 %v3102_v58, 0.0  ;;  %v8015_v4 = vld [vmem:[#allocation64_spill] sm:$0xff]  ;;  %v6903_v52 = vpop.f32.mrf.mxu0 }
 0x37c   : > { %v3123_v15 = vpop.f32.mrf.mxu1  ;;  %3444 = vmatpush1.xpose.msra.mxu1 %v3274_v12  ;;  %3344 = vperm.xlu0 %3768, %v3341_v59   ;;  %v3096_v13 = vadd.f32 %v6836_v37, %v2839_v42  ;;  %v2837_v57 = vadd.f32 %v8015_v4, %v6668_v27  ;;  %v2875_v22 = vadd.f32 %v6754_v32, %v6678_v33  ;;  %v8017_v42 = vld [vmem:[#allocation60_spill] sm:$0xff] }
 0x37d   : > { %v6886_v47 = vadd.f32 %v3123_v15, %v2867_v63  ;;  %3445 = vmatprep.subr.mxu1 %v3271_v38  ;;  %v8016_v38 = vld [vmem:[#allocation59_spill] sm:$0xff]  ;;  %v3266_v58 = vmax.f32 %v3100_v18, 0.0  ;;  %v2879_v6 = vadd.f32 %v6770_v56, %v6668_v27  ;;  %v2831_v32 = vadd.f32 %v8017_v42, %v6668_v27  ;;  %v6919_v56 = vpop.f32.mrf.mxu0 }
 0x37e   : > { %v3125_v26 = vpop.f32.mrf.mxu1  ;;  %v2833_v59 = vadd.f32 %v8016_v38, %v6678_v33  ;;  %v3094_v37 = vadd.f32 %v6831_v17, %v2837_v57  ;;  %v3263_v51 = vmax.f32 %v3096_v13, 0.0  ;;  %v2881_v17 = vadd.f32 %v6786_v21, %v6678_v33  ;;  %v8019_v38 = vld [vmem:[#allocation55_spill] sm:$0xff] }
 0x37f   : > { %v6893_v12 = vadd.f32 %v3125_v26, %v2869_v1  ;;  %v2825_v21 = vadd.f32 %v8019_v38, %v6668_v27 }
 0x380   : > { %v3129_v63 = vpop.f32.mrf.mxu1  ;;  %3446 = vmatpush1.xpose.msra.mxu1 %v3270_v23  ;;  %v3090_v15 = vadd.f32 %v6828_v36, %v2833_v59  ;;  %v8018_v23 = vld [vmem:[#allocation57_spill] sm:$0xff]  ;;  %v3088_v36 = vadd.f32 %v6823_v30, %v2831_v32  ;;  %v2887_v30 = vadd.f32 %v6802_v48, %v6678_v33 }
 0x381   : > { %v6901_v24 = vadd.f32 %v3129_v63, %v2873_v8  ;;  %3447 = vmatprep.subr.mxu1 %v3267_v49  ;;  %v2827_v26 = vadd.f32 %v8018_v23, %v6678_v33  ;;  %v3262_v8 = vmax.f32 %v3094_v37, 0.0  ;;  %v2885_v49 = vadd.f32 %v6795_v7, %v6668_v27  ;;  %v6935_v7 = vpop.f32.mrf.mxu0 }
 0x382   : > { %v3131_v53 = vpop.f32.mrf.mxu1  ;;  %v3259_v57 = vmax.f32 %v3090_v15, 0.0  ;;  %v2891_v15 = vadd.f32 %v6810_v2, %v6668_v27 }
 0x383   : > { %v6909_v43 = vadd.f32 %v3131_v53, %v2875_v22  ;;  %v3084_v4 = vadd.f32 %v6820_v44, %v2827_v26  ;;  %v8020_v22 = vld [vmem:[#allocation51_spill] sm:$0xff]  ;;  %v3082_v44 = vadd.f32 %v6815_v40, %v2825_v21  ;;  %v3258_v53 = vmax.f32 %v3088_v36, 0.0  ;;  %v8022_v26 = vld [vmem:[#allocation29_spill] sm:$0xff]  ;;  %v6951_v2 = vpop.f32.mrf.mxu0 }
 0x384   : > { %v3135_v1 = vpop.f32.mrf.mxu1  ;;  %3448 = vmatpush1.xpose.msra.mxu1 %v3266_v58  ;;  %v2821_v58 = vadd.f32 %v8020_v22, %v6678_v33  ;;  %v2893_v40 = vadd.f32 %v6818_v28, %v6678_v33  ;;  %v8023_v21 = vld [vmem:[#allocation19_spill] sm:$0xff]  ;;  %v8024_v22 = vld [vmem:[#allocation26_spill] sm:$0xff] }
 0x385   : > { %v6917_v18 = vadd.f32 %v3135_v1, %v2879_v6  ;;  %3449 = vmatprep.subr.mxu1 %v3263_v51  ;;  %v3255_v42 = vmax.f32 %v3084_v4, 0.0  ;;  %v8021_v1 = vld [vmem:[#allocation54_spill] sm:$0xff]  ;;  %v2813_v28 = vadd.f32 %v8023_v21, %v6668_v27 }
 0x386   : > { %v3137_v13 = vpop.f32.mrf.mxu1  ;;  %v3078_v51 = vadd.f32 %v6812_v3, %v2821_v58  ;;  %v2819_v48 = vadd.f32 %v8021_v1, %v6668_v27  ;;  %v2809_v58 = vadd.f32 %v8024_v22, %v6678_v33 }
 0x387   : > { %v6925_v63 = vadd.f32 %v3137_v13, %v2881_v17  ;;  %v2815_v17 = vadd.f32 %v8022_v26, %v6678_v33 }
 0x388   : > { %v3141_v59 = vpop.f32.mrf.mxu1  ;;  %3450 = vmatpush1.xpose.msra.mxu1 %v3262_v8  ;;  %v3076_v3 = vadd.f32 %v6807_v20, %v2819_v48  ;;  %v3254_v8 = vmax.f32 %v3082_v44, 0.0  ;;  %v2899_v20 = vadd.f32 %v6834_v0, %v6678_v33 }
 0x389   : > { %v6933_v37 = vadd.f32 %v3141_v59, %v2885_v49  ;;  %3451 = vmatprep.subr.mxu1 %v3259_v57  ;;  %v2897_v49 = vadd.f32 %v6826_v54, %v6668_v27  ;;  %v3072_v4 = vadd.f32 %v6804_v10, %v2815_v17  ;;  %v3251_v57 = vmax.f32 %v3078_v51, 0.0  ;;  %v6968_v10 = vpop.f32.mrf.mxu0 }
 0x38a   : > { %v3143_v6 = vpop.f32.mrf.mxu1  ;;  %v3070_v54 = vadd.f32 %v6799_v35, %v2813_v28  ;;  %v3250_v44 = vmax.f32 %v3076_v3, 0.0  ;;  %v3239_v3 = vmax.f32 %v6791_v9, 0.0  ;;  %v3231_v9 = vmax.f32 %v6759_v41, 0.0 }
 0x38b   : > { %v6941_v32 = vadd.f32 %v3143_v6, %v2887_v30  ;;  %v2903_v6 = vadd.f32 %v6840_v62, %v6668_v27  ;;  %v3247_v51 = vmax.f32 %v3072_v4, 0.0 }
 0x38c   : > { %v3147_v23 = vpop.f32.mrf.mxu1  ;;  %3452 = vmatpush1.xpose.msra.mxu1 %v3258_v53  ;;  %v3246_v48 = vmax.f32 %v3070_v54, 0.0 }
 0x38d   : > { %v6949_v36 = vadd.f32 %v3147_v23, %v2891_v15  ;;  %3453 = vmatprep.subr.mxu1 %v3255_v42  ;;  %v3066_v15 = vadd.f32 %v6797_v55, %v2809_v58  ;;  %v6977_v23 = vpop.f32.mrf.mxu0  ;;  %v3242_v55 = vmax.f32 %v6793_v11, 0.0  ;;  %v3234_v11 = vmax.f32 %v6767_v34, 0.0 }
 0x38e   : > { %v3149_v13 = vpop.f32.mrf.mxu1  ;;  %v3226_v34 = vmax.f32 %v6735_v39, 0.0 }
 0x38f   : > { %v6957_v38 = vadd.f32 %v3149_v13, %v2893_v40  ;;  %v3243_v26 = vmax.f32 %v3066_v15, 0.0  ;;  %v6984_v62 = vpop.f32.mrf.mxu0  ;;  %v3238_v13 = vmax.f32 %v6783_v46, 0.0  ;;  %v3230_v46 = vmax.f32 %v6751_v45, 0.0 }
 0x390   : > { %v3153_v59 = vpop.f32.mrf.mxu1  ;;  %3454 = vmatpush1.xpose.msra.mxu1 %v3254_v8  ;;  %v3222_v15 = vmax.f32 %v6719_v50, 0.0 }
 0x391   : > { %v6965_v30 = vadd.f32 %v3153_v59, %v2897_v49  ;;  %3455 = vmatprep.subr.mxu1 %v3251_v57  ;;  %v2938_v49 = vpop.f32.mrf.mxu0  ;;  %v3235_v57 = vmax.f32 %v6775_v60, 0.0  ;;  %v3227_v60 = vmax.f32 %v6743_v25, 0.0  ;;  %v8025_v25 = vld [vmem:[#allocation35_spill] sm:$0xff] }
 0x392   : > { %v3155_v53 = vpop.f32.mrf.mxu1 }
 0x393   : > { %v6973_v42 = vadd.f32 %v3155_v53, %v2899_v20  ;;  %v2940_v28 = vpop.f32.mrf.mxu0 }
 0x394   : > { %v3159_v1 = vpop.f32.mrf.mxu1  ;;  %3456 = vmatpush1.xpose.msra.mxu1 %v3250_v44 }
 0x395   : > { %v6975_v0 = vadd.f32 %v3159_v1, %v2903_v6  ;;  %3457 = vmatprep.subr.mxu1 %v3247_v51  ;;  %v2944_v58 = vpop.f32.mrf.mxu0  ;;  %v3223_v6 = vmax.f32 %v6727_v61, 0.0  ;;  %v3219_v1 = vmax.f32 %v6711_v31, 0.0 }
 0x396   : > { %v6979_v35 = vpop.f32.mrf.mxu1 }
 0x397   : > { %v2946_v44 = vpop.f32.mrf.mxu0 }
 0x398   : > { %v6981_v17 = vpop.f32.mrf.mxu1  ;;  %3458 = vmatpush1.xpose.msra.mxu1 %v3246_v48 }
 0x399   : > { %3459 = vmatprep.subr.mxu1 %v3243_v26  ;;  %v2950_v51 = vpop.f32.mrf.mxu0  ;;  %v3218_v26 = vmax.f32 %v8025_v25, 0.0 }
 0x39a   : > { %v6986_v40 = vpop.f32.mrf.mxu1  ;;  %v2951_v61 = vadd.f32 %v2950_v51, %v6668_v27 }
 0x39c   : > { %v6989_v8 = vpop.f32.mrf.mxu1  ;;  %3460 = vmatpush1.xpose.msra.mxu1 %v3242_v55  ;;  %v2952_v55 = vpop.f32.mrf.mxu0 }
 0x39d   : > { %3461 = vmatprep.subr.mxu1 %v3239_v3  ;;  %v8026_v3 = vld [vmem:[#allocation36_spill] sm:$0xff]  ;;  %v2953_v50 = vadd.f32 %v2952_v55, %v6678_v33  ;;  %v2935_v55 = vadd.f32 %v6984_v62, %v6678_v33  ;;  %v2927_v62 = vadd.f32 %v6951_v2, %v6668_v27 }
 0x39e   : > { %v6992_v4 = vpop.f32.mrf.mxu1 }
 0x3a0   : > { %v6995_v21 = vpop.f32.mrf.mxu1  ;;  %3462 = vmatpush1.xpose.msra.mxu1 %v3238_v13  ;;  %v3215_v13 = vmax.f32 %v8026_v3, 0.0 }
 0x3a1   : > { %3463 = vmatprep.subr.mxu1 %v3235_v57 }
 0x3a2   : > { %v6998_v59 = vpop.f32.mrf.mxu1 }
 0x3a4   : > { %v7001_v22 = vpop.f32.mrf.mxu1  ;;  %3464 = vmatpush1.xpose.msra.mxu1 %v3234_v11  ;;  %v2947_v11 = vadd.f32 %v2946_v44, %v6678_v33  ;;  %v2939_v44 = vadd.f32 %v2938_v49, %v6668_v27 }
 0x3a5   : > { %3465 = vmatprep.subr.mxu1 %v3231_v9  ;;  %v8027_v9 = vld [vmem:[#allocation33_spill] sm:$0xff] }
 0x3a6   : > { %v3185_v20 = vpop.f32.mrf.mxu1  ;;  %v3214_v31 = vmax.f32 %v8027_v9, 0.0 }
 0x3a8   : > { %v3189_v54 = vpop.f32.mrf.mxu1  ;;  %3466 = vmatpush1.xpose.msra.mxu1 %v3230_v46 }
 0x3a9   : > { %3467 = vmatprep.subr.mxu1 %v3227_v60 }
 0x3aa   : > { %v3191_v53 = vpop.f32.mrf.mxu1 }
 0x3ac   : > { %v3195_v41 = vpop.f32.mrf.mxu1  ;;  %3468 = vmatpush1.xpose.msra.mxu1 %v3226_v34 }
 0x3ad   : > { %3469 = vmatprep.subr.mxu1 %v3223_v6 }
 0x3ae   : > { %v3197_v45 = vpop.f32.mrf.mxu1 }
 0x3b0   : > { %v3201_v48 = vpop.f32.mrf.mxu1  ;;  %3470 = vmatpush1.xpose.msra.mxu1 %v3222_v15  ;;  %v2945_v15 = vadd.f32 %v2944_v58, %v6668_v27 }
 0x3b1   : > { %3471 = vmatprep.subr.mxu1 %v3219_v1  ;;  %v2941_v1 = vadd.f32 %v2940_v28, %v6678_v33  ;;  %v2933_v28 = vadd.f32 %v6977_v23, %v6668_v27 }
 0x3b2   : > { %v3203_v39 = vpop.f32.mrf.mxu1  ;;  %v3202_v51 = vadd.f32 %v3201_v48, %v2945_v15 }
 0x3b3   : > { %v3204_v34 = vadd.f32 %v3203_v39, %v2947_v11  ;;  %v3196_v39 = vadd.f32 %v3195_v41, %v2939_v44  ;;  %v3190_v48 = vadd.f32 %v3189_v54, %v2933_v28 }
 0x3b4   : > { %v3207_v57 = vpop.f32.mrf.mxu1  ;;  %3472 = vmatpush1.xpose.msra.mxu1 %v3218_v26  ;;  %v3198_v26 = vadd.f32 %v3197_v45, %v2941_v1  ;;  %v2929_v45 = vadd.f32 %v6968_v10, %v6678_v33  ;;  %v2921_v10 = vadd.f32 %v6919_v56, %v6668_v27  ;;  %v3294_v1 = vmax.f32 %v6933_v37, 0.0 }
 0x3b5   : > { %3473 = vmatprep.subr.mxu1 %v3215_v13  ;;  %v3208_v46 = vadd.f32 %v3207_v57, %v2951_v61  ;;  %v3335_v14 = vmax.f32 %v3204_v34, 0.0  ;;  %v3334_v13 = vmax.f32 %v3202_v51, 0.0  ;;  %v3192_v61 = vadd.f32 %v3191_v53, %v2935_v55  ;;  %v8030_v51 = vld [vmem:[#allocation72_spill] sm:$0xff] }
 0x3b6   : > { %v3209_v60 = vpop.f32.mrf.mxu1  ;;  %v3331_v58 = vmax.f32 %v3198_v26, 0.0  ;;  %v3330_v57 = vmax.f32 %v3196_v39, 0.0  ;;  %v3186_v49 = vadd.f32 %v3185_v20, %v2929_v45  ;;  %v3184_v53 = vadd.f32 %v7001_v22, %v2927_v62  ;;  %v8032_v26 = vld [vmem:[#allocation20_spill] sm:$0xff] }
 0x3b7   : > { %v3210_v6 = vadd.f32 %v3209_v60, %v2953_v50  ;;  %v3338_v3 = vmax.f32 %v3208_v46, 0.0  ;;  %v3327_v11 = vmax.f32 %v3192_v61, 0.0  ;;  %v3326_v23 = vmax.f32 %v3190_v48, 0.0 }
 0x3b8   : > { %3474 = vmatpush1.xpose.msra.mxu1 %v3214_v31  ;;  %v3323_v50 = vmax.f32 %v3186_v49, 0.0  ;;  %v2917_v20 = vadd.f32 %v6903_v52, %v6678_v33  ;;  %v3178_v2 = vadd.f32 %v6995_v21, %v2921_v10  ;;  %v3322_v54 = vmax.f32 %v3184_v53, 0.0 }
 0x3b9   : > { %v3339_v25 = vmax.f32 %v3210_v6, 0.0  ;;  %v2915_v22 = vadd.f32 %v6888_v16, %v6668_v27  ;;  %v2909_v21 = vadd.f32 %v6858_v29, %v6668_v27  ;;  %v3303_v27 = vmax.f32 %v6973_v42, 0.0 }
 0x3ba   : > { %v3318_v31 = vmax.f32 %v3178_v2, 0.0  ;;  %v3299_v29 = vmax.f32 %v6957_v38, 0.0  ;;  %v3290_v42 = vmax.f32 %v6917_v18, 0.0  ;;  %v3286_v38 = vmax.f32 %v6901_v24, 0.0  ;;  %v8031_v18 = vld [vmem:[#allocation37_spill] sm:$0xff] }
 0x3bb   : > { %3475 = vmatprep.subr.mxu1 %v3339_v25  ;;  %v3172_v56 = vadd.f32 %v6989_v8, %v2915_v22  ;;  %v3166_v16 = vadd.f32 %v6981_v17, %v2909_v21  ;;  %v3295_v17 = vmax.f32 %v6941_v32, 0.0  ;;  %v3282_v32 = vmax.f32 %v6886_v47, 0.0 }
 0x3bc   : > { %3476 = vmatpush2.xpose.msra.mxu1 %v3338_v3  ;;  %v3279_v37 = vmax.f32 %v6878_v5, 0.0  ;;  %v3363_v3 = vrot.slane %v8031_v18, %v8030_v51 }
 0x3bd   : > { %3477 = vmatprep.subr.mxu1 %v3335_v14  ;;  %v2923_v14 = vadd.f32 %v6935_v7, %v6678_v33  ;;  %v3174_v7 = vadd.f32 %v6992_v4, %v2917_v20  ;;  %v8028_v4 = vld [vmem:[#allocation38_spill] sm:$0xff]  ;;  %v3314_v34 = vmax.f32 %v3172_v56, 0.0  ;;  %v3310_v8 = vmax.f32 %v3166_v16, 0.0 }
 0x3be   : > { %v2905_v60 = vadd.f32 %v8028_v4, %v6678_v33 }
 0x3bf   : > { %v3180_v41 = vadd.f32 %v6998_v59, %v2923_v14  ;;  %v2911_v59 = vadd.f32 %v6876_v19, %v6678_v33  ;;  %v3315_v46 = vmax.f32 %v3174_v7, 0.0  ;;  %v3302_v33 = vmax.f32 %v6965_v30, 0.0 }
 0x3c0   : > { %3478 = vmatpush2.xpose.msra.mxu1 %v3334_v13  ;;  %v3162_v19 = vadd.f32 %v6979_v35, %v2905_v60  ;;  %v3298_v35 = vmax.f32 %v6949_v36, 0.0  ;;  %v3287_v30 = vmax.f32 %v6909_v43, 0.0  ;;  %v3283_v36 = vmax.f32 %v6893_v12, 0.0 }
 0x3c1   : > { %3479 = vmatprep.subr.mxu1 %v3331_v58  ;;  %v3319_v9 = vmax.f32 %v3180_v41, 0.0  ;;  %v3168_v52 = vadd.f32 %v6986_v40, %v2911_v59  ;;  %v3306_v40 = vmax.f32 %v6975_v0, 0.0  ;;  %v3291_v0 = vmax.f32 %v6925_v63, 0.0  ;;  %v8029_v63 = vld [vmem:[#allocation40_spill] sm:$0xff] }
 0x3c2   : > { %v3307_v15 = vmax.f32 %v3162_v19, 0.0  ;;  %v3278_v25 = vmax.f32 %v8029_v63, 0.0  ;;  %v3970_v14 = vmov 1966171168   ;;  %v8034_v7 = vlaneseq }
 0x3c3   : > { %v3311_v6 = vmax.f32 %v3168_v52, 0.0  ;;  %v3530_v53 = vunpack.c.l.s4 %v3970_v14 }
 0x3c4   : > { %3480 = vmatpush2.xpose.msra.mxu1 %v3330_v57  ;;  %vm3546_vm0 = vcmp.lt.s32.totalorder %v8034_v7, 256 }
 0x3c5   : > { %3481 = vmatprep.subr.mxu1 %v3327_v11 }
 0x3c8   : > { %3482 = vmatpush2.xpose.msra.mxu1 %v3326_v23  ;;  %v3531_v23 = vunpack.c.0.s8 %v3530_v53 }
 0x3c9   : > { %3483 = vmatprep.subr.mxu1 %v3323_v50  ;;  %v8033_v50 = vld [vmem:[#allocation16_spill] sm:$0xff] }
 0x3ca   : > { %v3534_v10 = vsub.s32 %v3531_v23, %v8033_v50 }
 0x3cc   : > { %3484 = vmatpush2.xpose.msra.mxu1 %v3322_v54 }
 0x3cd   : > { %3485 = vmatprep.subr.mxu1 %v3319_v9 }
 0x3d0   : > { %3486 = vmatpush2.xpose.msra.mxu1 %v3318_v31 }
 0x3d1   : > { %3487 = vmatprep.subr.mxu1 %v3315_v46 }
 0x3d4   : > { %3488 = vmatpush2.xpose.msra.mxu1 %v3314_v34 }
 0x3d5   : > { %3489 = vmatprep.subr.mxu1 %v3311_v6 }
 0x3d8   : > { %3490 = vmatpush2.xpose.msra.mxu1 %v3310_v8 }
 0x3d9   : > { %3491 = vmatprep.subr.mxu1 %v3307_v15 }
 0x3dc   : > { %3492 = vmatpush2.xpose.msra.mxu1 %v3306_v40 }
 0x3dd   : > { %3493 = vmatprep.subr.mxu1 %v3303_v27 }
 0x3e0   : > { %3494 = vmatpush2.xpose.msra.mxu1 %v3302_v33 }
 0x3e1   : > { %3495 = vmatprep.subr.mxu1 %v3299_v29 }
 0x3e4   : > { %3496 = vmatpush2.xpose.msra.mxu1 %v3298_v35 }
 0x3e5   : > { %3497 = vmatprep.subr.mxu1 %v3295_v17 }
 0x3e8   : > { %3498 = vmatpush2.xpose.msra.mxu1 %v3294_v1 }
 0x3e9   : > { %3499 = vmatprep.subr.mxu1 %v3291_v0 }
 0x3ec   : > { %3500 = vmatpush2.xpose.msra.mxu1 %v3290_v42 }
 0x3ed   : > { %3501 = vmatprep.subr.mxu1 %v3287_v30 }
 0x3f0   : > { %3502 = vmatpush2.xpose.msra.mxu1 %v3286_v38 }
 0x3f1   : > { %3503 = vmatprep.subr.mxu1 %v3283_v36 }
 0x3f4   : > { %3504 = vmatpush2.xpose.msra.mxu1 %v3282_v32 }
 0x3f5   : > { %3505 = vmatprep.subr.mxu1 %v3279_v37 }
 0x3f7   : > { %v3345_v43 = vpop.permute.xlu0 %3344 }
 0x3f8   : > { %3506 = vmatpush2.xpose.msra.mxu1 %v3278_v25  ;;  %v3350_v24 = vrot.slane %v3345_v43, %v8032_v26 }
 0x3fb   : > { %3508 = vmatmul.mubr.f32.vlgmr.msra.gmra.mxu1 %v3363_v3 }
 0x43b   : > { %v3438_v44 = vpop.f32.mrf.mxu0 }
 0x43c   : > { %v3439_v12 = vadd.f32 %v3438_v44, %v3350_v24 }
 0x43d   : > { %v3440_v55 = vpop.f32.mrf.mxu0 }
 0x43e   : > { %v3441_v13 = vadd.f32 %v3440_v55, %v3350_v24 }
 0x4bb   : > { %v3509_v39 = vpop.f32.mrf.mxu1 }
 0x4bc   : > { %v3510_v47 = vadd.f32 %v3509_v39, %v3439_v12 }
 0x4bd   : > { %v3511_v61 = vpop.f32.mrf.mxu1 }
 0x4be   : > { %v3514_v5 = vsub.f32 0.0, %v3510_v47  ;;  %v3512_v58 = vadd.f32 %v3511_v61, %v3441_v13 }
 0x4c0   : > { %v3516_v28 = vmul.f32 1.442695, %v3514_v5  ;;  %v3515_v45 = vsub.f32 0.0, %v3512_v58 }
 0x4c2   : > { %3769 = vpow2.f32 %v3516_v28  ;;  %v3518_v48 = vmul.f32 1.442695, %v3515_v45 }
 0x4c4   : > { %3771 = vpow2.f32 %v3518_v48 }
 0x4cf   : > { %v3770_v57 = vpop.eup %3769 }
 0x4d0   : > { %v3520_v49 = vadd.f32 1.0, %v3770_v57 }
 0x4d1   : > { %v3772_v11 = vpop.eup %3771 }
 0x4d2   : > { %v3521_v62 = vadd.f32 1.0, %v3772_v11  ;;  %3773 = vrcp.f32 %v3520_v49 }
 0x4d4   : > { %3775 = vrcp.f32 %v3521_v62 }
 0x4df   : > { %v3774_v41 = vpop.eup %3773 }
 0x4e1   : > { %v3776_v20 = vpop.eup %3775 }
 0x4e2   : > { %v3528_v2 = vcombine.low %v3774_v41, %v3776_v20 }
 0x4e4   : > { %v3535_v54 = vrot.slane %v3528_v2, %v3534_v10 }
 0x4e6   : > { %v3542_v9 = vrot.slane %v3535_v54, %v3534_v10 }
 0x4e8   : > { %3548 = vst.msk [vmem:[%s341_s30] sm:$0x3] %vm3546_vm0, %v3542_v9 }
 0x4e9   : > { %3902 = shalt.err (!%p3899_p10)
}
 0x4ea   : > { %s3903_s10 = scalar_lea.hbm %s3562_s23, 32  ;;  %s3907_s11 = scalar_lea.hbm %s7111_s7, 64 }
 0x4eb   : > { %p3904_p6 = scmp.ne.s32.totalorder %s3562_s23, %s3903_s10  ;;  %p3908_p3 = scmp.lt.s32.totalorder %s3562_s23, %s7111_s7 }
 0x4ec   : > { %p3909_p11 = scmp.lt.s32.totalorder %s3907_s11, %s3903_s10 }
 0x4ed   : > { %p3905_p4 = pnand %p3904_p6, %p8035_p1 }
 0x4ee   : > { %p3910_p5 = por %p3909_p11, %p3908_p3 }
 0x4ef   : > { %p3906_p8 = pneg %p3905_p4 }
 0x4f1   : > { %p3911_p7 = pnand %p3910_p5, %p3906_p8 }
 0x4f3   : > { %3914 = shalt.err (!%p3911_p7)
}
 0x4f4   : > { %3701 = dma.vmem_to_hbm [thread:$0]  (%p8035_p1), %s3565_s21, 32, %s3562_s23, %s3550_s20  }
 0x4f5 PF: > { %s3576_s30 = sand.u32 1, %s3949_s26   ;;  %p8036_p12 = scmp.ne.s32.totalorder %s7360_s9, 0 }
 0x4f6   : > { %p8037_p9 = scmp.ge.s32.totalorder %s3961_s29, 2  ;;  %s3577_s22 = scalar_lea.sflag [#allocation5], %s3576_s30 }
 0x4f8   : > { %p3718_p13 = pnand %p8037_p9, %p8036_p12 }
 0x4fa   : > { %p3719_p0 = pneg %p3718_p13 }
 0x4fc   : > { %3944 = dma.done.wait (%p3719_p0), %s3577_s22, 32  }
 0x4fd   : > { %3946 = vsyncadd (%p3719_p0), %s3577_s22, 4294967264  ;;  %p24_p2 = scmp.ge.s32.totalorder %s4101_s14, 4   ;;  %s8038_s26 = smov %s3953_s27 }
 0x4fe   : > { %s8039_s27 = smov %s3957_s28  ;;  %s8040_s28 = smov %s4111_s16 }
 0x4ff   : > { %s8041_s29 = smov %s4101_s14  ;;  %26 = sbr.rel (!%p24_p2) target bundleno = 10 (0xa), region = 105 }
 0x504   :  { %3582 = vsyncpa [#allocation4], 1 }
 0x505   :  { %3584 = vsyncpa [#allocation4 + $0x1], 1 }
 0x506   :  { %3585 = vsyncpa [#allocation7], 1 }
 0x507   :  { %3586 = vsyncpa [#allocation10], 1 }
 0x508   :  { %3587 = vsyncpa [#allocation5], 1 }
 0x509   :  { %3589 = vsyncpa [#allocation5 + $0x1], 1 }

</bundles_post_ra>
